<compile_context>
chip_gen: v7x
topology: tpu7x:2x2x1
jax: 0.10.0
libtpu: 0.0.40
codegen_flags: <defaults>
</compile_context>

<pallas_src>
import functools

import jax
import jax.numpy as jnp
import numpy as np
from jax.experimental import pallas as pl
from jax.experimental.pallas import tpu as pltpu


def _deeplab_neck_kernel(img_ref, w_ref, b_ref, out_ref, y_ref,
                         *, Wp, S_full, HO, WO):
    # img_ref: [1, P, Cin]    row-flattened, spatially padded NHWC image
    # w_ref:   [9, Cin, Cout] conv taps (BN scale already folded in)
    # b_ref:   [1, Cout]      folded BN bias
    # out_ref: [1, HO*WO, Cout]
    # y_ref:   VMEM scratch [S_full, Cout]  (fused conv+bn+relu result)

    # --- 3x3 conv as 9 shifted matmuls (contract Cin on the lanes) ---------
    acc = None
    for k in range(9):
        ky, kx = k // 3, k % 3
        lhs = img_ref[0, pl.ds(ky * Wp + kx, S_full), :]          # [S_full, Cin]
        contrib = jnp.dot(lhs, w_ref[k],
                          preferred_element_type=jnp.float32)     # [S_full, Cout]
        acc = contrib if acc is None else acc + contrib

    # --- folded BN bias + ReLU --------------------------------------------
    y_ref[...] = jnp.maximum(acc + b_ref[...], 0.0)

    # --- MaxPool2d(5) (stride 5, floor) ------------------------------------
    # Conv output row index r = oy * Wp + ox  (ox >= W columns are junk border
    # rows that pooling windows never touch).
    for ph in range(HO):
        for pw in range(WO):
            base = 5 * ph * Wp + 5 * pw
            win = y_ref[pl.ds(base, 5), :]                         # [5, Cout]
            for dy in range(1, 5):
                win = jnp.maximum(win, y_ref[pl.ds(base + dy * Wp, 5), :])
            out_ref[0, pl.ds(ph * WO + pw, 1), :] = jnp.max(
                win, axis=0, keepdims=True)


def deeplab_neck(x_nchw, params, eps=1e-5):
    """x_nchw: [B, 256, H, W].  params = (w_conv, gamma, beta, mean, var)."""
    w_conv, gamma, beta, running_mean, running_var = params
    B, Cin, H, W = x_nchw.shape
    Cout = w_conv.shape[0]
    HO, WO = H // 5, W // 5
    Wp = W + 2                      # padded width
    P = (H + 3) * Wp                # padded rows: top 1, bottom 2 (slice slack)
    S_full = H * Wp                 # conv-output rows (incl. junk border cols)

    # Fold BatchNorm (inference) into the conv: w *= scale[co], bias = beta - mean*scale.
    scale = gamma / jnp.sqrt(running_var + eps)                       # [Cout]
    bias = (beta - running_mean * scale).reshape(1, Cout)
    # [Cout, Cin, 3, 3] -> taps [9, Cin, Cout], scaled.
    w_taps = (jnp.transpose(w_conv, (2, 3, 1, 0)).reshape(9, Cin, Cout)
              * scale[None, None, :]).astype(jnp.float32)

    # NCHW -> NHWC, zero-pad spatial, row-flatten (all cheap, contiguous XLA ops).
    x = jnp.transpose(x_nchw, (0, 2, 3, 1))
    xp = jnp.pad(x, ((0, 0), (1, 2), (1, 1), (0, 0)))
    x_flat = xp.reshape(B, P, Cin).astype(jnp.float32)

    kernel = functools.partial(_deeplab_neck_kernel,
                               Wp=Wp, S_full=S_full, HO=HO, WO=WO)

    out_flat = pl.pallas_call(
        kernel,
        out_shape=jax.ShapeDtypeStruct((B, HO * WO, Cout), jnp.float32),
        grid_spec=pltpu.PrefetchScalarGridSpec(
            num_scalar_prefetch=0,
            grid=(B,),
            in_specs=[
                pl.BlockSpec((1, P, Cin), lambda b: (b, 0, 0)),
                pl.BlockSpec((9, Cin, Cout), lambda b: (0, 0, 0)),
                pl.BlockSpec((1, Cout), lambda b: (0, 0)),
            ],
            out_specs=pl.BlockSpec((1, HO * WO, Cout), lambda b: (b, 0, 0)),
            scratch_shapes=[pltpu.VMEM((S_full, Cout), jnp.float32)],
        ),
        compiler_params=pltpu.CompilerParams(
            dimension_semantics=("parallel",)),
    )(x_flat, w_taps, bias)

    # [B, HO*WO, Cout] -> NCHW [B, Cout, HO, WO]
    return jnp.transpose(out_flat.reshape(B, HO, WO, Cout), (0, 3, 1, 2))


def deeplab_neck_reference(x, params, eps=1e-5):
    """Pure-JAX reference mirroring the PyTorch forward (BN in inference mode)."""
    w_conv, gamma, beta, mean, var = params
    y = jax.lax.conv_general_dilated(
        x, w_conv, window_strides=(1, 1), padding=((1, 1), (1, 1)),
        dimension_numbers=("NCHW", "OIHW", "NCHW"),
        precision=jax.lax.Precision.HIGHEST)
    scale = gamma / jnp.sqrt(var + eps)
    y = y * scale[None, :, None, None] + (beta - mean * scale)[None, :, None, None]
    y = jnp.maximum(y, 0.0)
    y = jax.lax.reduce_window(
        y, -jnp.inf, jax.lax.max,
        window_dimensions=(1, 1, 5, 5), window_strides=(1, 1, 5, 5),
        padding="VALID")
    return y


if __name__ == "__main__":
    # Small shapes consistent with the module: in_channels fixed at 256 by the spec.
    B, Cin, H, W = 2, 256, 10, 10
    Cout = 25

    key = jax.random.PRNGKey(0)
    k = jax.random.split(key, 6)
    x = jax.random.normal(k[0], (B, Cin, H, W), jnp.float32)
    w_conv = 0.05 * jax.random.normal(k[1], (Cout, Cin, 3, 3), jnp.float32)
    gamma = 1.0 + 0.1 * jax.random.normal(k[2], (Cout,), jnp.float32)
    beta = 0.1 * jax.random.normal(k[3], (Cout,), jnp.float32)
    running_mean = 0.1 * jax.random.normal(k[4], (Cout,), jnp.float32)
    running_var = jax.random.uniform(k[5], (Cout,), jnp.float32,
                                     minval=0.5, maxval=1.5)
    params = (w_conv, gamma, beta, running_mean, running_var)

    out = deeplab_neck(x, params)
    out = jax.block_until_ready(out)

    ref = deeplab_neck_reference(x, params)
    np.testing.assert_allclose(np.asarray(out), np.asarray(ref),
                               rtol=1e-4, atol=1e-4)

    print("KERNEL_OK")
</pallas_src>

<mosaic_0001>
module attributes {stable_mosaic.version = 11 : i64} {
  func.func @_deeplab_neck_kernel(%arg0: i32, %arg1: memref<1x156x256xf32, #tpu.memory_space<vmem>>, %arg2: memref<9x256x25xf32, #tpu.memory_space<vmem>>, %arg3: memref<1x25xf32, #tpu.memory_space<vmem>>, %arg4: memref<1x4x25xf32, #tpu.memory_space<vmem>>, %arg5: memref<120x25xf32, #tpu.memory_space<vmem>>) attributes {dimension_semantics = [#tpu.dimension_semantics<parallel>], iteration_bounds = array<i64: 2>, scalar_prefetch = 0 : i64, scratch_operands = 1 : i64, tpu.core_type = #tpu.core_type<tc>, window_params = [{transform_indices = @transform_0, window_bounds = array<i64: 1, 156, 256>}, {pipeline_mode = #tpu.pipeline_mode<synchronous>, transform_indices = @transform_1, window_bounds = array<i64: 9, 256, 25>}, {pipeline_mode = #tpu.pipeline_mode<synchronous>, transform_indices = @transform_2, window_bounds = array<i64: 1, 25>}, {transform_indices = @transform_3, window_bounds = array<i64: 1, 4, 25>}]} {
    %c0 = arith.constant 0 : index
    %c0_0 = arith.constant 0 : index
    %c0_1 = arith.constant 0 : index
    %0 = vector.load %arg1[%c0, %c0_0, %c0_1] : memref<1x156x256xf32, #tpu.memory_space<vmem>>, vector<1x120x256xf32>
    %1 = vector.shape_cast %0 : vector<1x120x256xf32> to vector<120x256xf32>
    %c0_2 = arith.constant 0 : index
    %c0_3 = arith.constant 0 : index
    %c0_4 = arith.constant 0 : index
    %2 = vector.load %arg2[%c0_2, %c0_3, %c0_4] : memref<9x256x25xf32, #tpu.memory_space<vmem>>, vector<1x256x25xf32>
    %3 = vector.shape_cast %2 : vector<1x256x25xf32> to vector<256x25xf32>
    %cst = arith.constant dense<0.000000e+00> : vector<120x25xf32>
    %4 = tpu.matmul %1, %3, %cst {dimension_numbers = #tpu.dot_dimension_numbers<[1], [0], [0], [1], [0, 0, 1, 1], [], []>} : vector<120x256xf32>, vector<256x25xf32>, vector<120x25xf32> -> vector<120x25xf32>
    %c0_5 = arith.constant 0 : index
    %c1 = arith.constant 1 : index
    %c0_6 = arith.constant 0 : index
    %5 = vector.load %arg1[%c0_5, %c1, %c0_6] : memref<1x156x256xf32, #tpu.memory_space<vmem>>, vector<1x120x256xf32>
    %6 = vector.shape_cast %5 : vector<1x120x256xf32> to vector<120x256xf32>
    %c1_7 = arith.constant 1 : index
    %c0_8 = arith.constant 0 : index
    %c0_9 = arith.constant 0 : index
    %7 = vector.load %arg2[%c1_7, %c0_8, %c0_9] : memref<9x256x25xf32, #tpu.memory_space<vmem>>, vector<1x256x25xf32>
    %8 = vector.shape_cast %7 : vector<1x256x25xf32> to vector<256x25xf32>
    %cst_10 = arith.constant dense<0.000000e+00> : vector<120x25xf32>
    %9 = tpu.matmul %6, %8, %cst_10 {dimension_numbers = #tpu.dot_dimension_numbers<[1], [0], [0], [1], [0, 0, 1, 1], [], []>} : vector<120x256xf32>, vector<256x25xf32>, vector<120x25xf32> -> vector<120x25xf32>
    %10 = arith.addf %4, %9 : vector<120x25xf32>
    %c0_11 = arith.constant 0 : index
    %c2 = arith.constant 2 : index
    %c0_12 = arith.constant 0 : index
    %11 = vector.load %arg1[%c0_11, %c2, %c0_12] : memref<1x156x256xf32, #tpu.memory_space<vmem>>, vector<1x120x256xf32>
    %12 = vector.shape_cast %11 : vector<1x120x256xf32> to vector<120x256xf32>
    %c2_13 = arith.constant 2 : index
    %c0_14 = arith.constant 0 : index
    %c0_15 = arith.constant 0 : index
    %13 = vector.load %arg2[%c2_13, %c0_14, %c0_15] : memref<9x256x25xf32, #tpu.memory_space<vmem>>, vector<1x256x25xf32>
    %14 = vector.shape_cast %13 : vector<1x256x25xf32> to vector<256x25xf32>
    %cst_16 = arith.constant dense<0.000000e+00> : vector<120x25xf32>
    %15 = tpu.matmul %12, %14, %cst_16 {dimension_numbers = #tpu.dot_dimension_numbers<[1], [0], [0], [1], [0, 0, 1, 1], [], []>} : vector<120x256xf32>, vector<256x25xf32>, vector<120x25xf32> -> vector<120x25xf32>
    %16 = arith.addf %10, %15 : vector<120x25xf32>
    %c0_17 = arith.constant 0 : index
    %c12 = arith.constant 12 : index
    %c0_18 = arith.constant 0 : index
    %17 = vector.load %arg1[%c0_17, %c12, %c0_18] : memref<1x156x256xf32, #tpu.memory_space<vmem>>, vector<1x120x256xf32>
    %18 = vector.shape_cast %17 : vector<1x120x256xf32> to vector<120x256xf32>
    %c3 = arith.constant 3 : index
    %c0_19 = arith.constant 0 : index
    %c0_20 = arith.constant 0 : index
    %19 = vector.load %arg2[%c3, %c0_19, %c0_20] : memref<9x256x25xf32, #tpu.memory_space<vmem>>, vector<1x256x25xf32>
    %20 = vector.shape_cast %19 : vector<1x256x25xf32> to vector<256x25xf32>
    %cst_21 = arith.constant dense<0.000000e+00> : vector<120x25xf32>
    %21 = tpu.matmul %18, %20, %cst_21 {dimension_numbers = #tpu.dot_dimension_numbers<[1], [0], [0], [1], [0, 0, 1, 1], [], []>} : vector<120x256xf32>, vector<256x25xf32>, vector<120x25xf32> -> vector<120x25xf32>
    %22 = arith.addf %16, %21 : vector<120x25xf32>
    %c0_22 = arith.constant 0 : index
    %c13 = arith.constant 13 : index
    %c0_23 = arith.constant 0 : index
    %23 = vector.load %arg1[%c0_22, %c13, %c0_23] : memref<1x156x256xf32, #tpu.memory_space<vmem>>, vector<1x120x256xf32>
    %24 = vector.shape_cast %23 : vector<1x120x256xf32> to vector<120x256xf32>
    %c4 = arith.constant 4 : index
    %c0_24 = arith.constant 0 : index
    %c0_25 = arith.constant 0 : index
    %25 = vector.load %arg2[%c4, %c0_24, %c0_25] : memref<9x256x25xf32, #tpu.memory_space<vmem>>, vector<1x256x25xf32>
    %26 = vector.shape_cast %25 : vector<1x256x25xf32> to vector<256x25xf32>
    %cst_26 = arith.constant dense<0.000000e+00> : vector<120x25xf32>
    %27 = tpu.matmul %24, %26, %cst_26 {dimension_numbers = #tpu.dot_dimension_numbers<[1], [0], [0], [1], [0, 0, 1, 1], [], []>} : vector<120x256xf32>, vector<256x25xf32>, vector<120x25xf32> -> vector<120x25xf32>
    %28 = arith.addf %22, %27 : vector<120x25xf32>
    %c0_27 = arith.constant 0 : index
    %c14 = arith.constant 14 : index
    %c0_28 = arith.constant 0 : index
    %29 = vector.load %arg1[%c0_27, %c14, %c0_28] : memref<1x156x256xf32, #tpu.memory_space<vmem>>, vector<1x120x256xf32>
    %30 = vector.shape_cast %29 : vector<1x120x256xf32> to vector<120x256xf32>
    %c5 = arith.constant 5 : index
    %c0_29 = arith.constant 0 : index
    %c0_30 = arith.constant 0 : index
    %31 = vector.load %arg2[%c5, %c0_29, %c0_30] : memref<9x256x25xf32, #tpu.memory_space<vmem>>, vector<1x256x25xf32>
    %32 = vector.shape_cast %31 : vector<1x256x25xf32> to vector<256x25xf32>
    %cst_31 = arith.constant dense<0.000000e+00> : vector<120x25xf32>
    %33 = tpu.matmul %30, %32, %cst_31 {dimension_numbers = #tpu.dot_dimension_numbers<[1], [0], [0], [1], [0, 0, 1, 1], [], []>} : vector<120x256xf32>, vector<256x25xf32>, vector<120x25xf32> -> vector<120x25xf32>
    %34 = arith.addf %28, %33 : vector<120x25xf32>
    %c0_32 = arith.constant 0 : index
    %c24 = arith.constant 24 : index
    %c0_33 = arith.constant 0 : index
    %35 = vector.load %arg1[%c0_32, %c24, %c0_33] : memref<1x156x256xf32, #tpu.memory_space<vmem>>, vector<1x120x256xf32>
    %36 = vector.shape_cast %35 : vector<1x120x256xf32> to vector<120x256xf32>
    %c6 = arith.constant 6 : index
    %c0_34 = arith.constant 0 : index
    %c0_35 = arith.constant 0 : index
    %37 = vector.load %arg2[%c6, %c0_34, %c0_35] : memref<9x256x25xf32, #tpu.memory_space<vmem>>, vector<1x256x25xf32>
    %38 = vector.shape_cast %37 : vector<1x256x25xf32> to vector<256x25xf32>
    %cst_36 = arith.constant dense<0.000000e+00> : vector<120x25xf32>
    %39 = tpu.matmul %36, %38, %cst_36 {dimension_numbers = #tpu.dot_dimension_numbers<[1], [0], [0], [1], [0, 0, 1, 1], [], []>} : vector<120x256xf32>, vector<256x25xf32>, vector<120x25xf32> -> vector<120x25xf32>
    %40 = arith.addf %34, %39 : vector<120x25xf32>
    %c0_37 = arith.constant 0 : index
    %c25 = arith.constant 25 : index
    %c0_38 = arith.constant 0 : index
    %41 = vector.load %arg1[%c0_37, %c25, %c0_38] : memref<1x156x256xf32, #tpu.memory_space<vmem>>, vector<1x120x256xf32>
    %42 = vector.shape_cast %41 : vector<1x120x256xf32> to vector<120x256xf32>
    %c7 = arith.constant 7 : index
    %c0_39 = arith.constant 0 : index
    %c0_40 = arith.constant 0 : index
    %43 = vector.load %arg2[%c7, %c0_39, %c0_40] : memref<9x256x25xf32, #tpu.memory_space<vmem>>, vector<1x256x25xf32>
    %44 = vector.shape_cast %43 : vector<1x256x25xf32> to vector<256x25xf32>
    %cst_41 = arith.constant dense<0.000000e+00> : vector<120x25xf32>
    %45 = tpu.matmul %42, %44, %cst_41 {dimension_numbers = #tpu.dot_dimension_numbers<[1], [0], [0], [1], [0, 0, 1, 1], [], []>} : vector<120x256xf32>, vector<256x25xf32>, vector<120x25xf32> -> vector<120x25xf32>
    %46 = arith.addf %40, %45 : vector<120x25xf32>
    %c0_42 = arith.constant 0 : index
    %c26 = arith.constant 26 : index
    %c0_43 = arith.constant 0 : index
    %47 = vector.load %arg1[%c0_42, %c26, %c0_43] : memref<1x156x256xf32, #tpu.memory_space<vmem>>, vector<1x120x256xf32>
    %48 = vector.shape_cast %47 : vector<1x120x256xf32> to vector<120x256xf32>
    %c8 = arith.constant 8 : index
    %c0_44 = arith.constant 0 : index
    %c0_45 = arith.constant 0 : index
    %49 = vector.load %arg2[%c8, %c0_44, %c0_45] : memref<9x256x25xf32, #tpu.memory_space<vmem>>, vector<1x256x25xf32>
    %50 = vector.shape_cast %49 : vector<1x256x25xf32> to vector<256x25xf32>
    %cst_46 = arith.constant dense<0.000000e+00> : vector<120x25xf32>
    %51 = tpu.matmul %48, %50, %cst_46 {dimension_numbers = #tpu.dot_dimension_numbers<[1], [0], [0], [1], [0, 0, 1, 1], [], []>} : vector<120x256xf32>, vector<256x25xf32>, vector<120x25xf32> -> vector<120x25xf32>
    %52 = arith.addf %46, %51 : vector<120x25xf32>
    %c0_47 = arith.constant 0 : index
    %c0_48 = arith.constant 0 : index
    %53 = vector.load %arg3[%c0_47, %c0_48] : memref<1x25xf32, #tpu.memory_space<vmem>>, vector<1x25xf32>
    %54 = vector.broadcast %53 : vector<1x25xf32> to vector<120x25xf32>
    %55 = arith.addf %52, %54 : vector<120x25xf32>
    %cst_49 = arith.constant 0.000000e+00 : f32
    %56 = vector.broadcast %cst_49 : f32 to vector<120x25xf32>
    %57 = arith.maximumf %55, %56 : vector<120x25xf32>
    %c0_50 = arith.constant 0 : index
    %c0_51 = arith.constant 0 : index
    %58 = vector.load %arg5[%c0_50, %c0_51] : memref<120x25xf32, #tpu.memory_space<vmem>>, vector<120x25xf32>
    tpu.vector_store %arg5[%c0_50, %c0_51], %57 {strides = array<i32>} : memref<120x25xf32, #tpu.memory_space<vmem>>, vector<120x25xf32>,
    %c0_52 = arith.constant 0 : index
    %c0_53 = arith.constant 0 : index
    %59 = vector.load %arg5[%c0_52, %c0_53] : memref<120x25xf32, #tpu.memory_space<vmem>>, vector<5x25xf32>
    %c12_54 = arith.constant 12 : index
    %c0_55 = arith.constant 0 : index
    %60 = vector.load %arg5[%c12_54, %c0_55] : memref<120x25xf32, #tpu.memory_space<vmem>>, vector<5x25xf32>
    %61 = arith.maximumf %59, %60 : vector<5x25xf32>
    %c24_56 = arith.constant 24 : index
    %c0_57 = arith.constant 0 : index
    %62 = vector.load %arg5[%c24_56, %c0_57] : memref<120x25xf32, #tpu.memory_space<vmem>>, vector<5x25xf32>
    %63 = arith.maximumf %61, %62 : vector<5x25xf32>
    %c36 = arith.constant 36 : index
    %c0_58 = arith.constant 0 : index
    %64 = vector.load %arg5[%c36, %c0_58] : memref<120x25xf32, #tpu.memory_space<vmem>>, vector<5x25xf32>
    %65 = arith.maximumf %63, %64 : vector<5x25xf32>
    %c48 = arith.constant 48 : index
    %c0_59 = arith.constant 0 : index
    %66 = vector.load %arg5[%c48, %c0_59] : memref<120x25xf32, #tpu.memory_space<vmem>>, vector<5x25xf32>
    %67 = arith.maximumf %65, %66 : vector<5x25xf32>
    %cst_60 = arith.constant dense<0xFF800000> : vector<25xf32>
    %68 = vector.multi_reduction <maximumf>, %67, %cst_60 [0] : vector<5x25xf32> to vector<25xf32>
    %69 = vector.shape_cast %68 : vector<25xf32> to vector<1x25xf32>
    %c0_61 = arith.constant 0 : index
    %c0_62 = arith.constant 0 : index
    %c0_63 = arith.constant 0 : index
    %70 = vector.load %arg4[%c0_61, %c0_62, %c0_63] : memref<1x4x25xf32, #tpu.memory_space<vmem>>, vector<1x1x25xf32>
    %71 = vector.shape_cast %70 : vector<1x1x25xf32> to vector<1x25xf32>
    %72 = vector.shape_cast %69 : vector<1x25xf32> to vector<1x1x25xf32>
    tpu.vector_store %arg4[%c0_61, %c0_62, %c0_63], %72 {strides = array<i32>} : memref<1x4x25xf32, #tpu.memory_space<vmem>>, vector<1x1x25xf32>,
    %c5_64 = arith.constant 5 : index
    %c0_65 = arith.constant 0 : index
    %73 = vector.load %arg5[%c5_64, %c0_65] : memref<120x25xf32, #tpu.memory_space<vmem>>, vector<5x25xf32>
    %c17 = arith.constant 17 : index
    %c0_66 = arith.constant 0 : index
    %74 = vector.load %arg5[%c17, %c0_66] : memref<120x25xf32, #tpu.memory_space<vmem>>, vector<5x25xf32>
    %75 = arith.maximumf %73, %74 : vector<5x25xf32>
    %c29 = arith.constant 29 : index
    %c0_67 = arith.constant 0 : index
    %76 = vector.load %arg5[%c29, %c0_67] : memref<120x25xf32, #tpu.memory_space<vmem>>, vector<5x25xf32>
    %77 = arith.maximumf %75, %76 : vector<5x25xf32>
    %c41 = arith.constant 41 : index
    %c0_68 = arith.constant 0 : index
    %78 = vector.load %arg5[%c41, %c0_68] : memref<120x25xf32, #tpu.memory_space<vmem>>, vector<5x25xf32>
    %79 = arith.maximumf %77, %78 : vector<5x25xf32>
    %c53 = arith.constant 53 : index
    %c0_69 = arith.constant 0 : index
    %80 = vector.load %arg5[%c53, %c0_69] : memref<120x25xf32, #tpu.memory_space<vmem>>, vector<5x25xf32>
    %81 = arith.maximumf %79, %80 : vector<5x25xf32>
    %cst_70 = arith.constant dense<0xFF800000> : vector<25xf32>
    %82 = vector.multi_reduction <maximumf>, %81, %cst_70 [0] : vector<5x25xf32> to vector<25xf32>
    %83 = vector.shape_cast %82 : vector<25xf32> to vector<1x25xf32>
    %c0_71 = arith.constant 0 : index
    %c1_72 = arith.constant 1 : index
    %c0_73 = arith.constant 0 : index
    %84 = vector.load %arg4[%c0_71, %c1_72, %c0_73] : memref<1x4x25xf32, #tpu.memory_space<vmem>>, vector<1x1x25xf32>
    %85 = vector.shape_cast %84 : vector<1x1x25xf32> to vector<1x25xf32>
    %86 = vector.shape_cast %83 : vector<1x25xf32> to vector<1x1x25xf32>
    tpu.vector_store %arg4[%c0_71, %c1_72, %c0_73], %86 {strides = array<i32>} : memref<1x4x25xf32, #tpu.memory_space<vmem>>, vector<1x1x25xf32>,
    %c60 = arith.constant 60 : index
    %c0_74 = arith.constant 0 : index
    %87 = vector.load %arg5[%c60, %c0_74] : memref<120x25xf32, #tpu.memory_space<vmem>>, vector<5x25xf32>
    %c72 = arith.constant 72 : index
    %c0_75 = arith.constant 0 : index
    %88 = vector.load %arg5[%c72, %c0_75] : memref<120x25xf32, #tpu.memory_space<vmem>>, vector<5x25xf32>
    %89 = arith.maximumf %87, %88 : vector<5x25xf32>
    %c84 = arith.constant 84 : index
    %c0_76 = arith.constant 0 : index
    %90 = vector.load %arg5[%c84, %c0_76] : memref<120x25xf32, #tpu.memory_space<vmem>>, vector<5x25xf32>
    %91 = arith.maximumf %89, %90 : vector<5x25xf32>
    %c96 = arith.constant 96 : index
    %c0_77 = arith.constant 0 : index
    %92 = vector.load %arg5[%c96, %c0_77] : memref<120x25xf32, #tpu.memory_space<vmem>>, vector<5x25xf32>
    %93 = arith.maximumf %91, %92 : vector<5x25xf32>
    %c108 = arith.constant 108 : index
    %c0_78 = arith.constant 0 : index
    %94 = vector.load %arg5[%c108, %c0_78] : memref<120x25xf32, #tpu.memory_space<vmem>>, vector<5x25xf32>
    %95 = arith.maximumf %93, %94 : vector<5x25xf32>
    %cst_79 = arith.constant dense<0xFF800000> : vector<25xf32>
    %96 = vector.multi_reduction <maximumf>, %95, %cst_79 [0] : vector<5x25xf32> to vector<25xf32>
    %97 = vector.shape_cast %96 : vector<25xf32> to vector<1x25xf32>
    %c0_80 = arith.constant 0 : index
    %c2_81 = arith.constant 2 : index
    %c0_82 = arith.constant 0 : index
    %98 = vector.load %arg4[%c0_80, %c2_81, %c0_82] : memref<1x4x25xf32, #tpu.memory_space<vmem>>, vector<1x1x25xf32>
    %99 = vector.shape_cast %98 : vector<1x1x25xf32> to vector<1x25xf32>
    %100 = vector.shape_cast %97 : vector<1x25xf32> to vector<1x1x25xf32>
    tpu.vector_store %arg4[%c0_80, %c2_81, %c0_82], %100 {strides = array<i32>} : memref<1x4x25xf32, #tpu.memory_space<vmem>>, vector<1x1x25xf32>,
    %c65 = arith.constant 65 : index
    %c0_83 = arith.constant 0 : index
    %101 = vector.load %arg5[%c65, %c0_83] : memref<120x25xf32, #tpu.memory_space<vmem>>, vector<5x25xf32>
    %c77 = arith.constant 77 : index
    %c0_84 = arith.constant 0 : index
    %102 = vector.load %arg5[%c77, %c0_84] : memref<120x25xf32, #tpu.memory_space<vmem>>, vector<5x25xf32>
    %103 = arith.maximumf %101, %102 : vector<5x25xf32>
    %c89 = arith.constant 89 : index
    %c0_85 = arith.constant 0 : index
    %104 = vector.load %arg5[%c89, %c0_85] : memref<120x25xf32, #tpu.memory_space<vmem>>, vector<5x25xf32>
    %105 = arith.maximumf %103, %104 : vector<5x25xf32>
    %c101 = arith.constant 101 : index
    %c0_86 = arith.constant 0 : index
    %106 = vector.load %arg5[%c101, %c0_86] : memref<120x25xf32, #tpu.memory_space<vmem>>, vector<5x25xf32>
    %107 = arith.maximumf %105, %106 : vector<5x25xf32>
    %c113 = arith.constant 113 : index
    %c0_87 = arith.constant 0 : index
    %108 = vector.load %arg5[%c113, %c0_87] : memref<120x25xf32, #tpu.memory_space<vmem>>, vector<5x25xf32>
    %109 = arith.maximumf %107, %108 : vector<5x25xf32>
    %cst_88 = arith.constant dense<0xFF800000> : vector<25xf32>
    %110 = vector.multi_reduction <maximumf>, %109, %cst_88 [0] : vector<5x25xf32> to vector<25xf32>
    %111 = vector.shape_cast %110 : vector<25xf32> to vector<1x25xf32>
    %c0_89 = arith.constant 0 : index
    %c3_90 = arith.constant 3 : index
    %c0_91 = arith.constant 0 : index
    %112 = vector.load %arg4[%c0_89, %c3_90, %c0_91] : memref<1x4x25xf32, #tpu.memory_space<vmem>>, vector<1x1x25xf32>
    %113 = vector.shape_cast %112 : vector<1x1x25xf32> to vector<1x25xf32>
    %114 = vector.shape_cast %111 : vector<1x25xf32> to vector<1x1x25xf32>
    tpu.vector_store %arg4[%c0_89, %c3_90, %c0_91], %114 {strides = array<i32>} : memref<1x4x25xf32, #tpu.memory_space<vmem>>, vector<1x1x25xf32>,
    return
  }
  func.func @transform_0(%arg0: i32) -> (i32, i32, i32) {
    %c0_i32 = arith.constant 0 : i32
    %c0_i32_0 = arith.constant 0 : i32
    %c0_i32_1 = arith.constant 0 : i32
    return %arg0, %c0_i32, %c0_i32_0 : i32, i32, i32
  }
  func.func @transform_1(%arg0: i32) -> (i32, i32, i32) {
    %c0_i32 = arith.constant 0 : i32
    %c0_i32_0 = arith.constant 0 : i32
    %c0_i32_1 = arith.constant 0 : i32
    %c0_i32_2 = arith.constant 0 : i32
    return %c0_i32, %c0_i32_0, %c0_i32_1 : i32, i32, i32
  }
  func.func @transform_2(%arg0: i32) -> (i32, i32) {
    %c0_i32 = arith.constant 0 : i32
    %c0_i32_0 = arith.constant 0 : i32
    %c0_i32_1 = arith.constant 0 : i32
    return %c0_i32, %c0_i32_0 : i32, i32
  }
  func.func @transform_3(%arg0: i32) -> (i32, i32, i32) {
    %c0_i32 = arith.constant 0 : i32
    %c0_i32_0 = arith.constant 0 : i32
    %c0_i32_1 = arith.constant 0 : i32
    return %arg0, %c0_i32, %c0_i32_0 : i32, i32, i32
  }
}

</mosaic_0001>

<bundles_post_ra>
// kernel: tpu_custom_call.1
= control target key start
LH: loop header
LB: loop body
LE: loop exit
PB: predicated region body
PF: predicated region fallthrough
CT: control target
= control target key end

     0   :  { %8 = vsyncpa [#allocation4], 0  ;;  %s6444_s0 = inlined_call_operand.vmem [shape: f32[2,156,256], index: 0, kind: input, shape index: {}]   ;;  %s6445_s1 = inlined_call_operand.vmem [shape: f32[9,256,25], index: 1, kind: input, shape index: {}]   ;;  %s6446_s2 = inlined_call_operand.vmem [shape: f32[1,25], index: 2, kind: input, shape index: {}]   ;;  %s6447_s3 = inlined_call_operand.hbm [shape: f32[2,4,25], index: 3, kind: output, shape index: {}]  }
   0x1   :  { %10 = vsyncpa [#allocation4 + $0x1], 0  ;;  %s4328_s12 = smov 0   ;;  %s4330_s13 = smov 0  }
   0x2   :  { %s4332_s14 = smov 0   ;;  %s4334_s15 = smov 0  }
   0x3 LB: > { %s4349_s16 = sadd.s32 4294967295, %s4305_s15   ;;  %s2931_s17 = sadd.s32 4294967294, %s4305_s15   ;;  %s4305_s15 = sphi %s4334_s15, %s6463_s15   ;;  %s4301_s14 = sphi %s4332_s14, %s6462_s14   ;;  %s4297_s13 = sphi %s4330_s13, %s6461_s13   ;;  %s4293_s12 = sphi %s4328_s12, %s6460_s12  }
   0x4   : > { %s4353_s18 = sadd.s32 1, %s4305_s15   ;;  %s91_s19 = sadd.s32 1, %s4301_s14 }
   0x5   : > { %s88_s20 = ssub.s32 %s4305_s15, %s4353_s18  ;;  %p101_p0 = scmp.ne.s32.totalorder %s4301_s14, %s4297_s13 }
   0x6   : > { %p89_p1 = scmp.eq.s32.totalorder %s88_s20, 0  ;;  %p102_p2 = scmp.eq.s32.totalorder %s4349_s16, 1 }
   0x7   : > { %p107_p3 = scmp.ne.s32.totalorder %s4297_s13, %s4293_s12  ;;  %p108_p4 = scmp.eq.s32.totalorder %s2931_s17, 1 }
   0x8   : > { %s4364_s21 = scalar_select %p89_p1, %s4301_s14, %s91_s19  }
   0x9   : > { %p4366_p5 = por %p102_p2, %p101_p0  ;;  %p4370_p6 = por %p108_p4, %p107_p3 }
   0xa   : > { %p2934_p7 = scmp.ge.s32.totalorder %s4305_s15, 1  ;;  %p140_p8 = scmp.lt.s32.totalorder %s4305_s15, 3 }
   0xc   : > { %p141_p9 = pnand %p2934_p7, %p140_p8 }
   0xd   : > { %v2953_v0 = vld [vmem:[%s6445_s1 + $0x180] sm:$0xff] (!%p141_p9)  ;;  %v2954_v1 = vld [vmem:[%s6445_s1 + $0x188] sm:$0xff] (!%p141_p9)  ;;  %p164_p10 = scmp.lt.s32.totalorder (!%p141_p9), %s4349_s16, 1  ;;  %v2955_v5 = vld [vmem:[%s6445_s1 + $0x190] sm:$0xff] (!%p141_p9)  ;;  %vm300_vm0 = vcmask (!%p141_p9), 1046528   ;;  %vm1059_vm1 = vcmask (!%p141_p9), 1043456  }
   0xe   : > { %144 = sbr.rel (%p141_p9) target bundleno = 576 (0x240), region = 32  ;;  %v2937_v2 = vld [vmem:[%s6445_s1 + $0x100] sm:$0xff] (!%p141_p9)  ;;  %v3891_v3 = vpack.c.bf16 (!%p141_p9), %v2954_v1, %v2953_v0  ;;  %v2938_v4 = vld [vmem:[%s6445_s1 + $0x108] sm:$0xff] (!%p141_p9)  ;;  %v2956_v6 = vld [vmem:[%s6445_s1 + $0x198] sm:$0xff] (!%p141_p9)  ;;  %vm1348_vm2 = vcmask (!%p141_p9), 1042432   ;;  %vm714_vm3 = vcmask (!%p141_p9), 1045504  }
   0xf   : > { %v3893_v7 = vpack.c.bf16 (!%p141_p9), %v2938_v4, %v2937_v2  ;;  %v3895_v8 = vpack.c.bf16 (!%p141_p9), %v2956_v6, %v2955_v5  ;;  %v2939_v9 = vld [vmem:[%s6445_s1 + $0x110] sm:$0xff] (!%p141_p9)  ;;  %v2940_v10 = vld [vmem:[%s6445_s1 + $0x118] sm:$0xff] (!%p141_p9)  ;;  %v2957_v11 = vld [vmem:[%s6445_s1 + $0x1a0] sm:$0xff] (!%p141_p9)  ;;  %vm1637_vm4 = vcmask (!%p141_p9), 1041408   ;;  %vm2772_vm5 = vcmask (!%p141_p9), 203776   ;;  %s161_s26 = sand.u32 (!%p141_p9), 1, %s4297_s13  }
  0x10   : > { %4179 = vmatprep.subr.bf16.mxu1 (!%p141_p9), %v3891_v3  ;;  %3892 = vmatprep.subr.bf16.mxu0 (!%p141_p9), %v3891_v3  ;;  %v2958_v12 = vld [vmem:[%s6445_s1 + $0x1a8] sm:$0xff] (!%p141_p9)  ;;  %v3897_v13 = vpack.c.bf16 (!%p141_p9), %v2940_v10, %v2939_v9  ;;  %v2941_v15 = vld [vmem:[%s6445_s1 + $0x120] sm:$0xff] (!%p141_p9)  ;;  %v2959_v17 = vld [vmem:[%s6445_s1 + $0x1b0] sm:$0xff] (!%p141_p9)  ;;  %vm2797_vm6 = vcmask (!%p141_p9), 200704   ;;  %vm2805_vm7 = vcmask (!%p141_p9), 196608   ;;  %s3195_s29 = sshll.u32 (!%p141_p9), %s4349_s16, 6 }
  0x11   : > { %4187 = vmatpush3.bf16.msra.mxu1 (!%p141_p9), %v3893_v7  ;;  %3894 = vmatpush3.bf16.msra.mxu0 (!%p141_p9), %v3893_v7  ;;  %v3899_v14 = vpack.c.bf16 (!%p141_p9), %v2958_v12, %v2957_v11  ;;  %v2942_v16 = vld [vmem:[%s6445_s1 + $0x128] sm:$0xff] (!%p141_p9)  ;;  %v2960_v18 = vld [vmem:[%s6445_s1 + $0x1b8] sm:$0xff] (!%p141_p9)  ;;  %v2943_v21 = vld [vmem:[%s6445_s1 + $0x130] sm:$0xff] (!%p141_p9)  ;;  %s6396_s6 = scalar_lea.hbm (!%p141_p9), %s6447_s3, %s3195_s29  ;;  %s4307_s8 = smov (!%p141_p9), [#allocation3]  }
  0x12   : > { %4180 = vmatprep.subr.bf16.mxu1 (!%p141_p9), %v3895_v8  ;;  %3896 = vmatprep.subr.bf16.mxu0 (!%p141_p9), %v3895_v8  ;;  %v3901_v19 = vpack.c.bf16 (!%p141_p9), %v2942_v16, %v2941_v15  ;;  %v3903_v20 = vpack.c.bf16 (!%p141_p9), %v2960_v18, %v2959_v17  ;;  %v2944_v22 = vld [vmem:[%s6445_s1 + $0x138] sm:$0xff] (!%p141_p9)  ;;  %v2961_v23 = vld [vmem:[%s6445_s1 + $0x1c0] sm:$0xff] (!%p141_p9)  ;;  %v2962_v24 = vld [vmem:[%s6445_s1 + $0x1c8] sm:$0xff] (!%p141_p9)  ;;  %s4247_s9 = sshll.u32 (!%p141_p9), %s4307_s8, 4  ;;  %s4248_s9 = int_to_ptr.vmem [resolvable:$false] %s4247_s9 }
  0x13   : > { %v3905_v28 = vpack.c.bf16 (!%p141_p9), %v2944_v22, %v2943_v21  ;;  %v3907_v31 = vpack.c.bf16 (!%p141_p9), %v2962_v24, %v2961_v23  ;;  %v2945_v32 = vld [vmem:[%s6445_s1 + $0x140] sm:$0xff] (!%p141_p9)  ;;  %v2946_v33 = vld [vmem:[%s6445_s1 + $0x148] sm:$0xff] (!%p141_p9)  ;;  %v2963_v36 = vld [vmem:[%s6445_s1 + $0x1d0] sm:$0xff] (!%p141_p9)  ;;  %s4249_s10 = scalar_lea.vmem (!%p141_p9), %s4248_s9, 128 }
  0x14   : > { %v2964_v37 = vld [vmem:[%s6445_s1 + $0x1d8] sm:$0xff] (!%p141_p9)  ;;  %v3909_v40 = vpack.c.bf16 (!%p141_p9), %v2946_v33, %v2945_v32  ;;  %v2947_v43 = vld [vmem:[%s6445_s1 + $0x150] sm:$0xff] (!%p141_p9)  ;;  %v2965_v45 = vld [vmem:[%s6445_s1 + $0x1e0] sm:$0xff] (!%p141_p9) }
  0x15   : > { %s165_s24 = scalar_select %p164_p10, %s4349_s16, 1  ;;  %4188 = vmatpush3.bf16.msra.mxu1 %v3897_v13  ;;  %3898 = vmatpush3.bf16.msra.mxu0 %v3897_v13  ;;  %v3911_v42 = vpack.c.bf16 %v2964_v37, %v2963_v36  ;;  %v2948_v44 = vld [vmem:[%s6445_s1 + $0x158] sm:$0xff]  ;;  %v2966_v46 = vld [vmem:[%s6445_s1 + $0x1e8] sm:$0xff]  ;;  %v2949_v49 = vld [vmem:[%s6445_s1 + $0x160] sm:$0xff] }
  0x16   : > { %4181 = vmatprep.subr.bf16.mxu1 %v3899_v14  ;;  %3900 = vmatprep.subr.bf16.mxu0 %v3899_v14  ;;  %v3913_v47 = vpack.c.bf16 %v2948_v44, %v2947_v43  ;;  %v3915_v48 = vpack.c.bf16 %v2966_v46, %v2965_v45  ;;  %v2950_v50 = vld [vmem:[%s6445_s1 + $0x168] sm:$0xff]  ;;  %v2967_v51 = vld [vmem:[%s6445_s1 + $0x1f0] sm:$0xff]  ;;  %v2968_v52 = vld [vmem:[%s6445_s1 + $0x1f8] sm:$0xff]  ;;  %s2859_s16 = scalar_lea.sflag [#allocation4], %s161_s26 }
  0x17   : > { %s4195_s27 = smul.u32 320, %s165_s24  ;;  %v2951_v53 = vld [vmem:[%s6445_s1 + $0x170] sm:$0xff]  ;;  %v2952_v54 = vld [vmem:[%s6445_s1 + $0x178] sm:$0xff]  ;;  %v3917_v55 = vpack.c.bf16 %v2950_v50, %v2949_v49  ;;  %v215_v58 = vld [vmem:[%s6445_s1 + $0x80] sm:$0xff]  ;;  %v3919_v59 = vpack.c.bf16 %v2968_v52, %v2967_v51 }
  0x18   : > { %v216_v60 = vld [vmem:[%s6445_s1 + $0x88] sm:$0xff]  ;;  %v4519_v63 = vld [vmem:[%s6445_s1] sm:$0xff]  ;;  %v3921_v7 = vpack.c.bf16 %v2952_v54, %v2951_v53  ;;  %v217_v11 = vld [vmem:[%s6445_s1 + $0x90] sm:$0xff] }
  0x19   : > { %s4423_s11 = scalar_lea.vmem %s6444_s0, %s4195_s27  ;;  %4189 = vmatpush3.bf16.msra.mxu1 %v3901_v19  ;;  %3902 = vmatpush3.bf16.msra.mxu0 %v3901_v19  ;;  %v2985_v0 = vld [vmem:[%s6445_s1 + $0x280] sm:$0xff]  ;;  %v2986_v1 = vld [vmem:[%s6445_s1 + $0x288] sm:$0xff]  ;;  %v3923_v13 = vpack.c.bf16 %v216_v60, %v215_v58  ;;  %v218_v15 = vld [vmem:[%s6445_s1 + $0x98] sm:$0xff]  ;;  %s2935_s27 = sshll.u32 %s161_s26, 2 }
  0x1a   : > { %v4438_v25 = vld [vmem:[%s4423_s11 + $0x88] sm:$0xff]  ;;  %v4441_v26 = vld [vmem:[%s4423_s11 + $0x98] sm:$0xff]  ;;  %4182 = vmatprep.subr.bf16.mxu1 %v3903_v20  ;;  %3904 = vmatprep.subr.bf16.mxu0 %v3903_v20  ;;  %v4501_v56 = vld [vmem:[%s4423_s11 + $0x80] sm:$0xff]  ;;  %v3955_v14 = vpack.c.bf16 %v2986_v1, %v2985_v0  ;;  %s6380_s28 = scalar_lea.vmem [#allocation3], %s2935_s27 }
  0x1b   : > { %v333_v27 = vrot.slane %v4438_v25, 1  ;;  %v337_v29 = vrot.slane %v4441_v26, 1  ;;  %v4446_v30 = vld [vmem:[%s4423_s11 + $0x18] sm:$0xff]  ;;  %v232_v34 = vld [vmem:[%s4423_s11 + $0x8] sm:$0xfe]  ;;  %v4504_v57 = vld [vmem:[%s4423_s11 + $0x90] sm:$0xff] }
  0x1c   : > { %v305_v35 = vrot.slane %v4446_v30, 1  ;;  %v304_v39 = vrot.slane %v232_v34, 1  ;;  %v4513_v61 = vld [vmem:[%s4423_s11 + $0x10] sm:$0xff]  ;;  %v231_v62 = vld [vmem:[%s4423_s11] sm:$0xfe]  ;;  %v331_v2 = vrot.slane %v4501_v56, 1 }
  0x1d   : > { %v338_v38 = vsel %vm300_vm0, %v333_v27, %v337_v29  ;;  %4190 = vmatpush3.bf16.msra.mxu1 %v3905_v28  ;;  %3906 = vmatpush3.bf16.msra.mxu0 %v3905_v28  ;;  %v335_v3 = vrot.slane %v4504_v57, 1  ;;  %v200_v4 = vld [vmem:[%s6445_s1 + $0x8] sm:$0xff]  ;;  %v2969_v5 = vld [vmem:[%s6445_s1 + $0x200] sm:$0xff]  ;;  %v301_v8 = vrot.slane %v231_v62, 1  ;;  %v302_v9 = vrot.slane %v4513_v61, 1  ;;  %v4561_v19 = vld [vmem:[%s6445_s1 + $0x10] sm:$0xff] }
  0x1e   : > { %497 = vmatprep.mubr.f32.mxu1 %v338_v38  ;;  %v306_v41 = vsel %vm300_vm0, %v304_v39, %v305_v35  ;;  %4183 = vmatprep.subr.bf16.mxu1 %v3907_v31  ;;  %v4536_v6 = vld [vmem:[%s4423_s11 + $0x28] sm:$0xff]  ;;  %v4552_v16 = vld [vmem:[%s4423_s11 + $0x20] sm:$0xff]  ;;  %v4566_v20 = vld [vmem:[%s6445_s1 + $0x18] sm:$0xff]  ;;  %v3925_v23 = vpack.c.bf16 %v200_v4, %v4519_v63  ;;  %s2872_s30 = sshll.u32 %s6380_s28, 4  ;;  %s6398_s30 = int_to_ptr.vmem [resolvable:$true] %s2872_s30 }
  0x1f   : > { %3908 = vmatprep.subr.bf16.mxu0 %v3907_v31  ;;  %457 = vmatprep.mubr.f32.mxu0 %v306_v41  ;;  %v2970_v10 = vld [vmem:[%s6445_s1 + $0x208] sm:$0xff]  ;;  %v4555_v17 = vld [vmem:[%s4423_s11 + $0xa0] sm:$0xff]  ;;  %v309_v18 = vrot.slane %v4536_v6, 1  ;;  %v2987_v21 = vld [vmem:[%s6445_s1 + $0x290] sm:$0xff]  ;;  %v336_v22 = vsel %vm300_vm0, %v331_v2, %v335_v3  ;;  %v303_v33 = vsel %vm300_vm0, %v301_v8, %v302_v9  ;;  %v307_v36 = vrot.slane %v4552_v16, 1  ;;  %s4243_s7 = scalar_lea.vmem %s6398_s30, 64  ;;  %p4250_p0 = scmp.lt.s32.totalorder %s6398_s30, %s4248_s9 }
  0x20   : > { %v4546_v12 = vld [vmem:[%s4423_s11 + $0xa8] sm:$0xff]  ;;  %v2988_v24 = vld [vmem:[%s6445_s1 + $0x298] sm:$0xff]  ;;  %v4584_v31 = vld [vmem:[%s6445_s1 + $0x210] sm:$0xff]  ;;  %v3957_v34 = vpack.c.bf16 %v2970_v10, %v2969_v5  ;;  %v339_v38 = vrot.slane %v4555_v17, 1  ;;  %v3927_v41 = vpack.c.bf16 %v218_v15, %v217_v11  ;;  %p4244_p11 = scmp.ne.s32.totalorder %s6398_s30, %s4243_s7  ;;  %p4251_p1 = scmp.lt.s32.totalorder %s4249_s10, %s4243_s7 }
  0x21   : > { %4191 = vmatpush3.bf16.msra.mxu1 %v3909_v40  ;;  %3910 = vmatpush3.bf16.msra.mxu0 %v3909_v40  ;;  %v341_v28 = vrot.slane %v4546_v12, 1  ;;  %v4587_v32 = vld [vmem:[%s4423_s11 + $0x38] sm:$0xff]  ;;  %v4596_v39 = vld [vmem:[%s4423_s11 + $0x30] sm:$0xff]  ;;  %v220_v43 = vld [vmem:[%s6445_s1 + $0xa8] sm:$0xff]  ;;  %v310_v45 = vsel %vm300_vm0, %v305_v35, %v309_v18  ;;  %v3959_v46 = vpack.c.bf16 %v2988_v24, %v2987_v21  ;;  %v3929_v35 = vpack.c.bf16 %v4566_v20, %v4561_v19 }
  0x22   : > { %4184 = vmatprep.subr.bf16.mxu1 %v3911_v42  ;;  %3912 = vmatprep.subr.bf16.mxu0 %v3911_v42  ;;  %v2972_v37 = vld [vmem:[%s6445_s1 + $0x218] sm:$0xff]  ;;  %v219_v42 = vld [vmem:[%s6445_s1 + $0xa0] sm:$0xff]  ;;  %v4608_v44 = vld [vmem:[%s4423_s11 + $0xb0] sm:$0xff]  ;;  %v311_v52 = vrot.slane %v4596_v39, 1  ;;  %v340_v60 = vsel %vm300_vm0, %v335_v3, %v339_v38  ;;  %p4245_p12 = pnand %p4244_p11, %p4366_p5  ;;  %p4252_p2 = por %p4251_p1, %p4250_p0 }
  0x23   : > { %v4599_v40 = vld [vmem:[%s4423_s11 + $0xb8] sm:$0xff]  ;;  %v4622_v49 = vld [vmem:[%s6445_s1 + $0x28] sm:$0xff]  ;;  %v2989_v50 = vld [vmem:[%s6445_s1 + $0x2a0] sm:$0xff]  ;;  %v342_v51 = vsel %vm300_vm0, %v337_v29, %v341_v28  ;;  %v308_v29 = vsel %vm300_vm0, %v302_v9, %v307_v36  ;;  %v343_v63 = vrot.slane %v4608_v44, 1  ;;  %v3931_v4 = vpack.c.bf16 %v220_v43, %v219_v42 }
  0x24   : > { %v2990_v53 = vld [vmem:[%s6445_s1 + $0x2a8] sm:$0xff]  ;;  %v345_v54 = vrot.slane %v4599_v40, 1  ;;  %v4657_v0 = vld [vmem:[%s6445_s1 + $0xb0] sm:$0xff]  ;;  %v4665_v3 = vld [vmem:[%s6445_s1 + $0xb8] sm:$0xff]  ;;  %p4246_p13 = pneg %p4245_p12 }
  0x25   : > { %4192 = vmatpush3.bf16.msra.mxu1 %v3913_v47  ;;  %3914 = vmatpush3.bf16.msra.mxu0 %v3913_v47  ;;  %v313_v47 = vrot.slane %v4587_v32, 1  ;;  %v4643_v58 = vld [vmem:[%s4423_s11 + $0x48] sm:$0xff]  ;;  %v4668_v5 = vld [vmem:[%s4423_s11 + $0x40] sm:$0xff]  ;;  %v3963_v9 = vpack.c.bf16 %v2990_v53, %v2989_v50  ;;  %v4680_v11 = vld [vmem:[%s6445_s1 + $0x30] sm:$0xff] }
  0x26   : > { %4185 = vmatprep.subr.bf16.mxu1 %v3915_v48  ;;  %3916 = vmatprep.subr.bf16.mxu0 %v3915_v48  ;;  %v4617_v48 = vld [vmem:[%s6445_s1 + $0x20] sm:$0xff]  ;;  %v2974_v62 = vld [vmem:[%s6445_s1 + $0x228] sm:$0xff]  ;;  %v317_v10 = vrot.slane %v4643_v58, 1  ;;  %v346_v19 = vsel %vm300_vm0, %v341_v28, %v345_v54  ;;  %v2992_v20 = vld [vmem:[%s6445_s1 + $0x2b8] sm:$0xff]  ;;  %v344_v28 = vsel %vm300_vm0, %v339_v38, %v343_v63  ;;  %p4253_p3 = pnand %p4252_p2, %p4246_p13 }
  0x27   : > { %v4660_v1 = vld [vmem:[%s4423_s11 + $0xc8] sm:$0xff]  ;;  %v314_v8 = vsel %vm300_vm0, %v309_v18, %v313_v47  ;;  %v3933_v15 = vpack.c.bf16 %v4622_v49, %v4617_v48  ;;  %v312_v18 = vsel %vm300_vm0, %v307_v36, %v311_v52  ;;  %v4722_v36 = vld [vmem:[%s4423_s11 + $0x50] sm:$0xff]  ;;  %v4732_v38 = vld [vmem:[%s6445_s1 + $0xc0] sm:$0xff] }
  0x28   : > { %v349_v21 = vrot.slane %v4660_v1, 1  ;;  %v4737_v42 = vld [vmem:[%s6445_s1 + $0xc8] sm:$0xff]  ;;  %v4740_v43 = vld [vmem:[%s4423_s11 + $0xd0] sm:$0xff]  ;;  %v4751_v49 = vld [vmem:[%s6445_s1 + $0x40] sm:$0xff] }
  0x29   : > { %4193 = vmatpush3.bf16.msra.mxu1 %v3917_v55  ;;  %3918 = vmatpush3.bf16.msra.mxu0 %v3917_v55  ;;  %v4640_v55 = vld [vmem:[%s6445_s1 + $0x220] sm:$0xff]  ;;  %v4756_v50 = vld [vmem:[%s6445_s1 + $0x48] sm:$0xff] }
  0x2a   : > { %4186 = vmatprep.subr.bf16.mxu1 %v3919_v59  ;;  %3920 = vmatprep.subr.bf16.mxu0 %v3919_v59  ;;  %v3961_v59 = vpack.c.bf16 %v2972_v37, %v4584_v31  ;;  %v3965_v24 = vpack.c.bf16 %v2974_v62, %v4640_v55  ;;  %v315_v31 = vrot.slane %v4668_v5, 1  ;;  %v4725_v37 = vld [vmem:[%s4423_s11 + $0xd8] sm:$0xff]  ;;  %v350_v53 = vsel %vm300_vm0, %v345_v54, %v349_v21  ;;  %v4788_v62 = vld [vmem:[%s4423_s11 + $0x68] sm:$0xff] }
  0x2b   : > { %v319_v55 = vrot.slane %v4722_v36, 1 }
  0x2c   : > { %v316_v54 = vsel %vm300_vm0, %v311_v52, %v315_v31  ;;  %v4812_v52 = vld [vmem:[%s6445_s1 + $0xd8] sm:$0xff] }
  0x2d   : > { %4194 = vmatpush3.bf16.msra.mxu1 %v3921_v7  ;;  %3922 = vmatpush3.bf16.msra.mxu0 %v3921_v7  ;;  %v4671_v7 = vld [vmem:[%s4423_s11 + $0xc0] sm:$0xff] }
  0x2e   : > { %3924 = vmatprep.subr.bf16.mxu1 %v3923_v13  ;;  %3956 = vmatprep.subr.bf16.mxu0 %v3955_v14  ;;  %v4685_v13 = vld [vmem:[%s6445_s1 + $0x38] sm:$0xff]  ;;  %v2991_v14 = vld [vmem:[%s6445_s1 + $0x2b0] sm:$0xff] }
  0x30   : > { %498 = vmatmul.mubr.f32.vlgmr.msra.gmra.mrb[0].mxu1 %v336_v22  ;;  %458 = vmatmul.mubr.f32.vlgmr.msra.gmra.mrb[0].mxu0 %v303_v33  ;;  %v4705_v22 = vld [vmem:[%s6445_s1 + $0x230] sm:$0xff]  ;;  %v4718_v33 = vld [vmem:[%s6445_s1 + $0x238] sm:$0xff] }
  0x31   : > { %3926 = vmatpush3.bf16.msra.mxu1 %v3925_v23  ;;  %3958 = vmatpush3.bf16.msra.mxu0 %v3957_v34  ;;  %v4708_v23 = vld [vmem:[%s4423_s11 + $0x58] sm:$0xff]  ;;  %v347_v34 = vrot.slane %v4671_v7, 1 }
  0x32   : > { %3928 = vmatprep.subr.bf16.mxu1 %v3927_v41  ;;  %462 = vmatprep.mubr.f32.mxu0 %v310_v45  ;;  %v3935_v41 = vpack.c.bf16 %v4665_v3, %v4657_v0  ;;  %v318_v45 = vsel %vm300_vm0, %v313_v47, %v317_v10  ;;  %v321_v48 = vrot.slane %v4708_v23, 1  ;;  %v4766_v47 = vld [vmem:[%s6445_s1 + $0x2c8] sm:$0xff]  ;;  %v4791_v0 = vld [vmem:[%s4423_s11 + $0x60] sm:$0xff] }
  0x33   : > { %3960 = vmatprep.subr.bf16.mxu0 %v3959_v46  ;;  %502 = vmatprep.mubr.f32.mxu1 %v342_v51  ;;  %v3967_v46 = vpack.c.bf16 %v2992_v20, %v2991_v14  ;;  %v3937_v51 = vpack.c.bf16 %v4685_v13, %v4680_v11  ;;  %v348_v3 = vsel %vm300_vm0, %v343_v63, %v347_v34  ;;  %v4815_v11 = vld [vmem:[%s4423_s11 + $0xe8] sm:$0xff]  ;;  %v4822_v13 = vld [vmem:[%s6445_s1 + $0x50] sm:$0xff]  ;;  %v4825_v14 = vld [vmem:[%s4423_s11 + $0xe0] sm:$0xff]  ;;  %v325_v20 = vrot.slane %v4788_v62, 1 }
  0x34   : > { %463 = vmatmul.mubr.f32.gmra.mrb[2].mxu0 %v308_v29  ;;  %503 = vmatmul.mubr.f32.gmra.mrb[2].mxu1 %v340_v60  ;;  %v353_v29 = vrot.slane %v4725_v37, 1  ;;  %v4785_v60 = vld [vmem:[%s6445_s1 + $0x248] sm:$0xff]  ;;  %v3939_v63 = vpack.c.bf16 %v4737_v42, %v4732_v38  ;;  %v2996_v42 = vld [vmem:[%s6445_s1 + $0x2d8] sm:$0xff] }
  0x35   : > { %3930 = vmatpush3.bf16.msra.mxu1 %v3929_v35  ;;  %3962 = vmatpush3.bf16.msra.mxu0 %v3961_v59  ;;  %v4761_v35 = vld [vmem:[%s6445_s1 + $0x2c0] sm:$0xff] }
  0x36   : > { %3932 = vmatprep.subr.bf16.mxu1 %v3931_v4  ;;  %467 = vmatprep.mubr.f32.mxu0 %v314_v8  ;;  %v4780_v59 = vld [vmem:[%s6445_s1 + $0x240] sm:$0xff]  ;;  %v3969_v4 = vpack.c.bf16 %v4718_v33, %v4705_v22  ;;  %v351_v8 = vrot.slane %v4740_v43, 1  ;;  %v4841_v22 = vld [vmem:[%s6445_s1 + $0x58] sm:$0xff]  ;;  %v4848_v33 = vld [vmem:[%s4423_s11 + $0x70] sm:$0xff]  ;;  %v354_v38 = vsel %vm300_vm0, %v349_v21, %v353_v29 }
  0x37   : > { %3964 = vmatprep.subr.bf16.mxu0 %v3963_v9  ;;  %507 = vmatprep.mubr.f32.mxu1 %v346_v19  ;;  %v4807_v9 = vld [vmem:[%s6445_s1 + $0xd0] sm:$0xff]  ;;  %v3971_v19 = vpack.c.bf16 %v4766_v47, %v4761_v35  ;;  %v355_v35 = vrot.slane %v4825_v14, 1  ;;  %v4882_v47 = vld [vmem:[%s6445_s1 + $0xe0] sm:$0xff] }
  0x38   : > { %468 = vmatmul.mubr.f32.gmra.mrb[4].mxu0 %v312_v18  ;;  %508 = vmatmul.mubr.f32.gmra.mrb[4].mxu1 %v344_v28  ;;  %v322_v18 = vsel %vm300_vm0, %v317_v10, %v321_v48  ;;  %v2995_v28 = vld [vmem:[%s6445_s1 + $0x2d0] sm:$0xff]  ;;  %v3941_v10 = vpack.c.bf16 %v4756_v50, %v4751_v49  ;;  %v234_v49 = vld [vmem:[%s4423_s11 + $0xf8] sm:$0x1]  ;;  %v352_v21 = vsel %vm300_vm0, %v347_v34, %v351_v8 }
  0x39   : > { %3934 = vmatpush3.bf16.msra.mxu1 %v3933_v15  ;;  %3966 = vmatpush3.bf16.msra.mxu0 %v3965_v24  ;;  %v4828_v15 = vld [vmem:[%s4423_s11 + $0x78] sm:$0xff]  ;;  %v323_v24 = vrot.slane %v4791_v0, 1  ;;  %v3943_v34 = vpack.c.bf16 %v4812_v52, %v4807_v9  ;;  %v326_v9 = vsel %vm300_vm0, %v321_v48, %v325_v20 }
  0x3a   : > { %3936 = vmatprep.subr.bf16.mxu1 %v3935_v41  ;;  %472 = vmatprep.mubr.f32.mxu0 %v318_v45  ;;  %v320_v41 = vsel %vm300_vm0, %v315_v31, %v319_v55  ;;  %v357_v45 = vrot.slane %v4815_v11, 1  ;;  %v3973_v31 = vpack.c.bf16 %v4785_v60, %v4780_v59  ;;  %v2980_v50 = vld [vmem:[%s6445_s1 + $0x258] sm:$0xff]  ;;  %v3945_v59 = vpack.c.bf16 %v4841_v22, %v4822_v13  ;;  %v4897_v60 = vld [vmem:[%s6445_s1 + $0x60] sm:$0xff] }
  0x3b   : > { %3968 = vmatprep.subr.bf16.mxu0 %v3967_v46  ;;  %512 = vmatprep.mubr.f32.mxu1 %v350_v53  ;;  %v4865_v46 = vld [vmem:[%s6445_s1 + $0x250] sm:$0xff]  ;;  %v329_v53 = vrot.slane %v4828_v15, 1  ;;  %v324_v52 = vsel %vm300_vm0, %v319_v55, %v323_v24  ;;  %v2997_v13 = vld [vmem:[%s6445_s1 + $0x2e0] sm:$0xff]  ;;  %v361_v22 = vrot.slane %v234_v49, 1 }
  0x3c   : > { %473 = vmatmul.mubr.f32.gmra.mrb[6].mxu0 %v316_v54  ;;  %513 = vmatmul.mubr.f32.gmra.mrb[6].mxu1 %v348_v3  ;;  %v4902_v54 = vld [vmem:[%s6445_s1 + $0x68] sm:$0xff]  ;;  %v233_v3 = vld [vmem:[%s4423_s11 + $0xf0] sm:$0x1]  ;;  %v358_v48 = vsel %vm300_vm0, %v353_v29, %v357_v45  ;;  %v3977_v55 = vpack.c.bf16 %v2980_v50, %v4865_v46  ;;  %v719_v29 = vrot.slane %v4446_v30, 2  ;;  %v356_v46 = vsel %vm300_vm0, %v351_v8, %v355_v35 }
  0x3d   : > { %3938 = vmatpush3.bf16.msra.mxu1 %v3937_v51  ;;  %3970 = vmatpush3.bf16.msra.mxu0 %v3969_v4  ;;  %v4887_v51 = vld [vmem:[%s6445_s1 + $0xe8] sm:$0xff]  ;;  %v327_v4 = vrot.slane %v4848_v33, 1  ;;  %v330_v49 = vsel %vm300_vm0, %v325_v20, %v329_v53  ;;  %v359_v50 = vrot.slane %v233_v3, 1  ;;  %v362_v20 = vsel %vm300_vm0, %v357_v45, %v361_v22 }
  0x3e   : > { %3940 = vmatprep.subr.bf16.mxu1 %v3939_v63  ;;  %477 = vmatprep.mubr.f32.mxu0 %v322_v18  ;;  %v3975_v63 = vpack.c.bf16 %v2996_v42, %v2995_v28  ;;  %v2998_v18 = vld [vmem:[%s6445_s1 + $0x2e8] sm:$0xff]  ;;  %v3947_v28 = vpack.c.bf16 %v4887_v51, %v4882_v47  ;;  %v4935_v42 = vld [vmem:[%s6445_s1 + $0xf0] sm:$0xff]  ;;  %v334_v47 = vsel %vm300_vm0, %v329_v53, %v333_v27  ;;  %v3000_v27 = vld [vmem:[%s6445_s1 + $0x2f8] sm:$0xff]  ;;  %v6448_v53 = vrot.slane %v4536_v6, 4 }
  0x3f   : > { %3972 = vmatprep.subr.bf16.mxu0 %v3971_v19  ;;  %517 = vmatprep.mubr.f32.mxu1 %v354_v38  ;;  %v4919_v19 = vld [vmem:[%s6445_s1 + $0x260] sm:$0xff]  ;;  %v4930_v38 = vld [vmem:[%s6445_s1 + $0x268] sm:$0xff]  ;;  %v6449_v45 = vrot.slane %v4552_v16, 4  ;;  %v1066_v3 = vrot.slane %v4596_v39, 4  ;;  %v1355_v22 = vrot.slane %v4596_v39, 5 }
  0x40   : > { %478 = vmatmul.mubr.f32.gmra.mrb[8].mxu0 %v320_v41  ;;  %518 = vmatmul.mubr.f32.gmra.mrb[8].mxu1 %v352_v21  ;;  %v4940_v41 = vld [vmem:[%s6445_s1 + $0xf8] sm:$0xff]  ;;  %v3949_v21 = vpack.c.bf16 %v4902_v54, %v4897_v60  ;;  %v3981_v51 = vpack.c.bf16 %v4930_v38, %v4919_v19  ;;  %v674_v60 = vld [vmem:[%s4423_s11 + $0x8] sm:$0xfc]  ;;  %v1068_v54 = vrot.slane %v4587_v32, 4  ;;  %v1072_v19 = vrot.slane %v4643_v58, 4 }
  0x41   : > { %3942 = vmatpush3.bf16.msra.mxu1 %v3941_v10  ;;  %3974 = vmatpush3.bf16.msra.mxu0 %v3973_v31  ;;  %v328_v10 = vsel %vm300_vm0, %v323_v24, %v327_v4  ;;  %v3979_v31 = vpack.c.bf16 %v2998_v18, %v2997_v13  ;;  %v2999_v24 = vld [vmem:[%s6445_s1 + $0x2f0] sm:$0xff]  ;;  %v214_v13 = vld [vmem:[%s6445_s1 + $0x78] sm:$0xff]  ;;  %v6450_v18 = vrot.slane %v4536_v6, 5 }
  0x42   : > { %3944 = vmatprep.subr.bf16.mxu1 %v3943_v34  ;;  %482 = vmatprep.mubr.f32.mxu0 %v326_v9  ;;  %v3951_v34 = vpack.c.bf16 %v4940_v41, %v4935_v42  ;;  %v1357_v9 = vrot.slane %v4587_v32, 5  ;;  %v4998_v38 = vsel %vm1059_vm1, %v6448_v53, %v1068_v54  ;;  %v1070_v42 = vrot.slane %v4668_v5, 4 }
  0x43   : > { %3976 = vmatprep.subr.bf16.mxu0 %v3975_v63  ;;  %522 = vmatprep.mubr.f32.mxu1 %v358_v48  ;;  %v360_v63 = vsel %vm300_vm0, %v355_v35, %v359_v50  ;;  %v2983_v35 = vld [vmem:[%s6445_s1 + $0x270] sm:$0xff]  ;;  %v673_v48 = vld [vmem:[%s4423_s11] sm:$0xfc]  ;;  %v3983_v41 = vpack.c.bf16 %v3000_v27, %v2999_v24  ;;  %v718_v50 = vrot.slane %v674_v60, 2  ;;  %v3050_v27 = vld [vmem:[%s6445_s1 + $0x488] sm:$0xff]  ;;  %v5038_v60 = vsel %vm1059_vm1, %v1068_v54, %v1072_v19 }
  0x44   : > { %483 = vmatmul.mubr.f32.gmra.mrb[10].mxu0 %v324_v52  ;;  %523 = vmatmul.mubr.f32.gmra.mrb[10].mxu1 %v356_v46  ;;  %v213_v52 = vld [vmem:[%s6445_s1 + $0x70] sm:$0xff]  ;;  %v3017_v46 = vld [vmem:[%s6445_s1 + $0x380] sm:$0xff]  ;;  %v5015_v53 = vsel %vm1348_vm2, %v6450_v18, %v1357_v9  ;;  %v715_v18 = vrot.slane %v673_v48, 2  ;;  %v5044_v8 = vsel %vm1059_vm1, %v1066_v3, %v1070_v42  ;;  %v3052_v48 = vld [vmem:[%s6445_s1 + $0x498] sm:$0xff] }
  0x45   : > { %3946 = vmatpush3.bf16.msra.mxu1 %v3945_v59  ;;  %3978 = vmatpush3.bf16.msra.mxu0 %v3977_v55  ;;  %v2984_v59 = vld [vmem:[%s6445_s1 + $0x278] sm:$0xff]  ;;  %v6451_v55 = vrot.slane %v4552_v16, 5  ;;  %v3049_v24 = vld [vmem:[%s6445_s1 + $0x480] sm:$0xff] }
  0x46   : > { %3948 = vmatprep.subr.bf16.mxu1 %v3947_v28  ;;  %487 = vmatprep.mubr.f32.mxu0 %v330_v49  ;;  %v5003_v28 = vsel %vm1059_vm1, %v6449_v45, %v1066_v3  ;;  %v3018_v49 = vld [vmem:[%s6445_s1 + $0x388] sm:$0xff]  ;;  %v1361_v45 = vrot.slane %v4643_v58, 5  ;;  %v3001_v54 = vld [vmem:[%s6445_s1 + $0x300] sm:$0xff]  ;;  %v4019_v3 = vpack.c.bf16 %v3050_v27, %v3049_v24  ;;  %v727_v24 = vrot.slane %v4587_v32, 2  ;;  %v3003_v27 = vld [vmem:[%s6445_s1 + $0x310] sm:$0xff] }
  0x47   : > { %3980 = vmatprep.subr.bf16.mxu0 %v3979_v31  ;;  %527 = vmatprep.mubr.f32.mxu1 %v362_v20  ;;  %v332_v31 = vsel %vm300_vm0, %v327_v4, %v331_v2  ;;  %v170_v20 = vld [vmem:[%s4423_s11 + $0x8] sm:$0xff]  ;;  %v1359_v2 = vrot.slane %v4668_v5, 5  ;;  %v3953_v4 = vpack.c.bf16 %v214_v13, %v213_v52  ;;  %v3033_v52 = vld [vmem:[%s6445_s1 + $0x400] sm:$0xff]  ;;  %v723_v13 = vrot.slane %v4536_v6, 2 }
  0x48   : > { %488 = vmatmul.mubr.f32.gmra.mrb[12].mxu0 %v328_v10  ;;  %528 = vmatmul.mubr.f32.gmra.mrb[12].mxu1 %v360_v63  ;;  %v5033_v10 = vsel %vm1348_vm2, %v6451_v55, %v1355_v22  ;;  %v3985_v63 = vpack.c.bf16 %v2984_v59, %v2983_v35  ;;  %v3987_v55 = vpack.c.bf16 %v3018_v49, %v3017_v46  ;;  %v3020_v35 = vld [vmem:[%s6445_s1 + $0x398] sm:$0xff]  ;;  %v3051_v59 = vld [vmem:[%s6445_s1 + $0x490] sm:$0xff]  ;;  %v6454_v49 = vrot.slane %v4513_v61, 2 }
  0x49   : > { %3950 = vmatpush3.bf16.msra.mxu1 %v3949_v21  ;;  %3982 = vmatpush3.bf16.msra.mxu0 %v3981_v51  ;;  %v3002_v21 = vld [vmem:[%s6445_s1 + $0x308] sm:$0xff]  ;;  %v5055_v51 = vsel %vm1348_vm2, %v1357_v9, %v1361_v45 }
  0x4a   : > { %3952 = vmatprep.subr.bf16.mxu1 %v3951_v34  ;;  %492 = vmatprep.mubr.f32.mxu0 %v334_v47  ;;  %v5060_v34 = vsel %vm1348_vm2, %v1355_v22, %v1359_v2  ;;  %v720_v47 = vsel %vm714_vm3, %v718_v50, %v719_v29  ;;  %v3034_v9 = vld [vmem:[%s6445_s1 + $0x408] sm:$0xff]  ;;  %v3019_v22 = vld [vmem:[%s6445_s1 + $0x390] sm:$0xff]  ;;  %v3989_v46 = vpack.c.bf16 %v3002_v21, %v3001_v54  ;;  %v3036_v21 = vld [vmem:[%s6445_s1 + $0x418] sm:$0xff] }
  0x4b   : > { %3984 = vmatprep.subr.bf16.mxu0 %v3983_v41  ;;  %597 = vmatprep.mubr.f32.mxu1 %v170_v20  ;;  %v169_v41 = vld [vmem:[%s4423_s11] sm:$0xff]  ;;  %v717_v50 = vsel %vm714_vm3, %v715_v18, %v6454_v49  ;;  %v4021_v20 = vpack.c.bf16 %v3034_v9, %v3033_v52  ;;  %v724_v18 = vsel %vm714_vm3, %v719_v29, %v723_v13  ;;  %v3022_v29 = vld [vmem:[%s6445_s1 + $0x3a8] sm:$0xff] }
  0x4c   : > { %493 = vmatmul.mubr.f32.gmra.mrb[14].mxu0 %v332_v31  ;;  %v721_v31 = vrot.slane %v4552_v16, 2  ;;  %v4023_v54 = vpack.c.bf16 %v3052_v48, %v3051_v59  ;;  %v3054_v52 = vld [vmem:[%s6445_s1 + $0x4a8] sm:$0xff]  ;;  %v6455_v9 = vmov %v6454_v49  ;;  %v728_v59 = vsel %vm714_vm3, %v723_v13, %v727_v24  ;;  %v3037_v13 = vld [vmem:[%s6445_s1 + $0x420] sm:$0xff] }
  0x4d   : > { %3954 = vmatpush3.bf16.msra.mxu1 %v3953_v4  ;;  %3986 = vmatpush3.bf16.msra.mxu0 %v3985_v63  ;;  %v3004_v4 = vld [vmem:[%s6445_s1 + $0x318] sm:$0xff]  ;;  %v3991_v63 = vpack.c.bf16 %v3020_v35, %v3019_v22  ;;  %v725_v35 = vrot.slane %v4596_v39, 2  ;;  %v731_v49 = vrot.slane %v4643_v58, 2 }
  0x4e   : > { %3988 = vmatprep.subr.bf16.mxu1 %v3987_v55  ;;  %871 = vmatprep.mubr.f32.mxu0 %v720_v47  ;;  %v3035_v55 = vld [vmem:[%s6445_s1 + $0x410] sm:$0xff]  ;;  %v3021_v47 = vld [vmem:[%s6445_s1 + $0x3a0] sm:$0xff]  ;;  %v722_v22 = vsel %vm714_vm3, %v6455_v9, %v721_v31  ;;  %v3993_v48 = vpack.c.bf16 %v3004_v4, %v3003_v27  ;;  %v3024_v4 = vld [vmem:[%s6445_s1 + $0x3b8] sm:$0xff] }
  0x4f   : > { %4020 = vmatprep.subr.bf16.mxu0 %v4019_v3  ;;  %v3053_v3 = vld [vmem:[%s6445_s1 + $0x4a0] sm:$0xff]  ;;  %v3023_v27 = vld [vmem:[%s6445_s1 + $0x3b0] sm:$0xff] }
  0x50   : > { %598 = vmatmul.mubr.f32.vlgmr.msra.gmra.mrb[14].mxu1 %v169_v41  ;;  %872 = vmatmul.mubr.f32.vlgmr.msra.gmra.mrb[16].mxu0 %v717_v50  ;;  %v4025_v41 = vpack.c.bf16 %v3036_v21, %v3035_v55  ;;  %v3995_v50 = vpack.c.bf16 %v3022_v29, %v3021_v47  ;;  %v4027_v9 = vpack.c.bf16 %v3054_v52, %v3053_v3  ;;  %v735_v47 = vrot.slane %v4708_v23, 2  ;;  %v3007_v3 = vld [vmem:[%s6445_s1 + $0x330] sm:$0xff]  ;;  %v3008_v52 = vld [vmem:[%s6445_s1 + $0x338] sm:$0xff] }
  0x51   : > { %3990 = vmatpush3.bf16.msra.mxu1 %v3989_v46  ;;  %602 = vmatprep.mubr.f32.mxu1 %v4446_v30  ;;  %v3005_v46 = vld [vmem:[%s6445_s1 + $0x320] sm:$0xff]  ;;  %v3006_v30 = vld [vmem:[%s6445_s1 + $0x328] sm:$0xff]  ;;  %v732_v55 = vsel %vm714_vm3, %v727_v24, %v731_v49  ;;  %v3039_v24 = vld [vmem:[%s6445_s1 + $0x430] sm:$0xff] }
  0x52   : > { %4022 = vmatpush3.bf16.msra.mxu0 %v4021_v20  ;;  %876 = vmatprep.mubr.f32.mxu0 %v724_v18  ;;  %v3038_v20 = vld [vmem:[%s6445_s1 + $0x428] sm:$0xff]  ;;  %v3055_v18 = vld [vmem:[%s6445_s1 + $0x4b0] sm:$0xff]  ;;  %v3997_v21 = vpack.c.bf16 %v3006_v30, %v3005_v46  ;;  %v3057_v46 = vld [vmem:[%s6445_s1 + $0x4c0] sm:$0xff] }
  0x53   : > { %3992 = vmatprep.subr.bf16.mxu1 %v3991_v63  ;;  %4024 = vmatprep.subr.bf16.mxu0 %v4023_v54  ;;  %v3056_v63 = vld [vmem:[%s6445_s1 + $0x4b8] sm:$0xff]  ;;  %v726_v54 = vsel %vm714_vm3, %v721_v31, %v725_v35  ;;  %v4029_v29 = vpack.c.bf16 %v3038_v20, %v3037_v13  ;;  %v3999_v31 = vpack.c.bf16 %v3024_v4, %v3023_v27  ;;  %v3058_v30 = vld [vmem:[%s6445_s1 + $0x4c8] sm:$0xff]  ;;  %v739_v20 = vrot.slane %v4788_v62, 2 }
  0x54   : > { %603 = vmatmul.mubr.f32.gmra.mrb[16].mxu1 %v4513_v61  ;;  %877 = vmatmul.mubr.f32.gmra.mrb[18].mxu0 %v722_v22  ;;  %v729_v61 = vrot.slane %v4668_v5, 2  ;;  %v4031_v22 = vpack.c.bf16 %v3056_v63, %v3055_v18  ;;  %v736_v13 = vsel %vm714_vm3, %v731_v49, %v735_v47  ;;  %v4001_v27 = vpack.c.bf16 %v3008_v52, %v3007_v3  ;;  %v3009_v18 = vld [vmem:[%s6445_s1 + $0x340] sm:$0xff]  ;;  %v3010_v63 = vld [vmem:[%s6445_s1 + $0x348] sm:$0xff]  ;;  %v3059_v3 = vld [vmem:[%s6445_s1 + $0x4d0] sm:$0xff] }
  0x55   : > { %607 = vmatprep.mubr.f32.mxu1 %v4536_v6  ;;  %881 = vmatprep.mubr.f32.mxu0 %v728_v59  ;;  %v3040_v59 = vld [vmem:[%s6445_s1 + $0x438] sm:$0xff]  ;;  %v3041_v49 = vld [vmem:[%s6445_s1 + $0x440] sm:$0xff] }
  0x56   : > { %3994 = vmatpush3.bf16.msra.mxu1 %v3993_v48  ;;  %4026 = vmatpush3.bf16.msra.mxu0 %v4025_v41  ;;  %v3025_v48 = vld [vmem:[%s6445_s1 + $0x3c0] sm:$0xff]  ;;  %v3026_v41 = vld [vmem:[%s6445_s1 + $0x3c8] sm:$0xff]  ;;  %v4033_v4 = vpack.c.bf16 %v3040_v59, %v3039_v24  ;;  %v3060_v52 = vld [vmem:[%s6445_s1 + $0x4d8] sm:$0xff]  ;;  %v740_v24 = vsel %vm714_vm3, %v735_v47, %v739_v20  ;;  %v743_v59 = vrot.slane %v4828_v15, 2 }
  0x57   : > { %3996 = vmatprep.subr.bf16.mxu1 %v3995_v50  ;;  %4028 = vmatprep.subr.bf16.mxu0 %v4027_v9  ;;  %v730_v50 = vsel %vm714_vm3, %v725_v35, %v729_v61  ;;  %v733_v9 = vrot.slane %v4722_v36, 2  ;;  %v4003_v35 = vpack.c.bf16 %v3026_v41, %v3025_v48  ;;  %v4005_v48 = vpack.c.bf16 %v3010_v63, %v3009_v18  ;;  %v3043_v47 = vld [vmem:[%s6445_s1 + $0x450] sm:$0xff]  ;;  %v3061_v18 = vld [vmem:[%s6445_s1 + $0x4e0] sm:$0xff]  ;;  %v3062_v63 = vld [vmem:[%s6445_s1 + $0x4e8] sm:$0xff] }
  0x58   : > { %608 = vmatmul.mubr.f32.gmra.mrb[18].mxu1 %v4552_v16  ;;  %882 = vmatmul.mubr.f32.gmra.mrb[20].mxu0 %v726_v54  ;;  %v4035_v54 = vpack.c.bf16 %v3058_v30, %v3057_v46  ;;  %v3011_v46 = vld [vmem:[%s6445_s1 + $0x350] sm:$0xff]  ;;  %v3012_v30 = vld [vmem:[%s6445_s1 + $0x358] sm:$0xff] }
  0x59   : > { %612 = vmatprep.mubr.f32.mxu1 %v4587_v32  ;;  %886 = vmatprep.mubr.f32.mxu0 %v732_v55  ;;  %v3042_v55 = vld [vmem:[%s6445_s1 + $0x448] sm:$0xff] }
  0x5a   : > { %3998 = vmatpush3.bf16.msra.mxu1 %v3997_v21  ;;  %4030 = vmatpush3.bf16.msra.mxu0 %v4029_v29  ;;  %v3027_v21 = vld [vmem:[%s6445_s1 + $0x3d0] sm:$0xff]  ;;  %v3028_v29 = vld [vmem:[%s6445_s1 + $0x3d8] sm:$0xff]  ;;  %v4037_v41 = vpack.c.bf16 %v3042_v55, %v3041_v49  ;;  %v744_v49 = vsel %vm714_vm3, %v739_v20, %v743_v59  ;;  %v747_v55 = vrot.slane %v4438_v25, 2  ;;  %v3045_v25 = vld [vmem:[%s6445_s1 + $0x460] sm:$0xff] }
  0x5b   : > { %4000 = vmatprep.subr.bf16.mxu1 %v3999_v31  ;;  %4032 = vmatprep.subr.bf16.mxu0 %v4031_v22  ;;  %v734_v31 = vsel %vm714_vm3, %v729_v61, %v733_v9  ;;  %v737_v22 = vrot.slane %v4791_v0, 2  ;;  %v4007_v61 = vpack.c.bf16 %v3028_v29, %v3027_v21  ;;  %v4009_v21 = vpack.c.bf16 %v3012_v30, %v3011_v46  ;;  %v3046_v20 = vld [vmem:[%s6445_s1 + $0x468] sm:$0xff]  ;;  %v3064_v46 = vld [vmem:[%s6445_s1 + $0x4f8] sm:$0xff] }
  0x5c   : > { %613 = vmatmul.mubr.f32.gmra.mrb[20].mxu1 %v4596_v39  ;;  %887 = vmatmul.mubr.f32.gmra.mrb[22].mxu0 %v730_v50  ;;  %v4039_v50 = vpack.c.bf16 %v3060_v52, %v3059_v3  ;;  %v3013_v3 = vld [vmem:[%s6445_s1 + $0x360] sm:$0xff]  ;;  %v3014_v52 = vld [vmem:[%s6445_s1 + $0x368] sm:$0xff] }
  0x5d   : > { %617 = vmatprep.mubr.f32.mxu1 %v4643_v58  ;;  %891 = vmatprep.mubr.f32.mxu0 %v736_v13  ;;  %v3044_v13 = vld [vmem:[%s6445_s1 + $0x458] sm:$0xff] }
  0x5e   : > { %4002 = vmatpush3.bf16.msra.mxu1 %v4001_v27  ;;  %4034 = vmatpush3.bf16.msra.mxu0 %v4033_v4  ;;  %v3029_v27 = vld [vmem:[%s6445_s1 + $0x3e0] sm:$0xff]  ;;  %v3030_v4 = vld [vmem:[%s6445_s1 + $0x3e8] sm:$0xff]  ;;  %v4041_v29 = vpack.c.bf16 %v3044_v13, %v3043_v47  ;;  %v751_v47 = vrot.slane %v4441_v26, 2  ;;  %v4013_v13 = vpack.c.bf16 %v3014_v52, %v3013_v3  ;;  %v3047_v26 = vld [vmem:[%s6445_s1 + $0x470] sm:$0xff]  ;;  %v749_v52 = vrot.slane %v4504_v57, 2 }
  0x5f   : > { %4004 = vmatprep.subr.bf16.mxu1 %v4003_v35  ;;  %4036 = vmatprep.subr.bf16.mxu0 %v4035_v54  ;;  %v738_v35 = vsel %vm714_vm3, %v733_v9, %v737_v22  ;;  %v741_v54 = vrot.slane %v4848_v33, 2  ;;  %v4011_v9 = vpack.c.bf16 %v3030_v4, %v3029_v27  ;;  %v4045_v27 = vpack.c.bf16 %v3046_v20, %v3045_v25  ;;  %v3015_v4 = vld [vmem:[%s6445_s1 + $0x370] sm:$0xff] }
  0x60   : > { %618 = vmatmul.mubr.f32.gmra.mrb[22].mxu1 %v4668_v5  ;;  %892 = vmatmul.mubr.f32.gmra.mrb[24].mxu0 %v734_v31  ;;  %v4043_v31 = vpack.c.bf16 %v3062_v63, %v3061_v18  ;;  %v3016_v18 = vld [vmem:[%s6445_s1 + $0x378] sm:$0xff] }
  0x61   : > { %622 = vmatprep.mubr.f32.mxu1 %v4708_v23  ;;  %896 = vmatprep.mubr.f32.mxu0 %v740_v24  ;;  %v3031_v24 = vld [vmem:[%s6445_s1 + $0x3f0] sm:$0xff]  ;;  %v742_v30 = vsel %vm714_vm3, %v737_v22, %v741_v54  ;;  %v4017_v25 = vpack.c.bf16 %v3016_v18, %v3015_v4  ;;  %v4236_v4 = vld [vmem:[%s4423_s11 + $0x98] sm:$0xff]  ;;  %v757_v18 = vrot.slane %v4608_v44, 2 }
  0x62   : > { %4006 = vmatpush3.bf16.msra.mxu1 %v4005_v48  ;;  %4038 = vmatpush3.bf16.msra.mxu0 %v4037_v41  ;;  %v3032_v48 = vld [vmem:[%s6445_s1 + $0x3f8] sm:$0xff]  ;;  %v3063_v41 = vld [vmem:[%s6445_s1 + $0x4f0] sm:$0xff] }
  0x63   : > { %4008 = vmatprep.subr.bf16.mxu1 %v4007_v61  ;;  %4040 = vmatprep.subr.bf16.mxu0 %v4039_v50  ;;  %v745_v61 = vrot.slane %v4501_v56, 2  ;;  %v748_v50 = vsel %vm714_vm3, %v743_v59, %v747_v55  ;;  %v4015_v22 = vpack.c.bf16 %v3032_v48, %v3031_v24  ;;  %v4047_v63 = vpack.c.bf16 %v3064_v46, %v3063_v41  ;;  %v3048_v59 = vld [vmem:[%s6445_s1 + $0x478] sm:$0xff]  ;;  %v4235_v41 = vld [vmem:[%s4423_s11 + $0x88] sm:$0xff] }
  0x64   : > { %623 = vmatmul.mubr.f32.gmra.mrb[24].mxu1 %v4722_v36  ;;  %897 = vmatmul.mubr.f32.gmra.mrb[26].mxu0 %v738_v35  ;;  %v3081_v35 = vld [vmem:[%s6445_s1 + $0x580] sm:$0xff]  ;;  %v4049_v20 = vpack.c.bf16 %v3048_v59, %v3047_v26 }
  0x65   : > { %627 = vmatprep.mubr.f32.mxu1 %v4788_v62  ;;  %901 = vmatprep.mubr.f32.mxu0 %v744_v49  ;;  %v3082_v49 = vld [vmem:[%s6445_s1 + $0x588] sm:$0xff]  ;;  %v746_v3 = vsel %vm714_vm3, %v741_v54, %v745_v61  ;;  %v750_v54 = vsel %vm714_vm3, %v745_v61, %v749_v52  ;;  %v1648_v61 = vrot.slane %v4668_v5, 6  ;;  %v3137_v5 = vld [vmem:[%s6445_s1 + $0x740] sm:$0xff] }
  0x66   : > { %4010 = vmatpush3.bf16.msra.mxu1 %v4009_v21  ;;  %4042 = vmatpush3.bf16.msra.mxu0 %v4041_v29  ;;  %v3113_v21 = vld [vmem:[%s6445_s1 + $0x680] sm:$0xff]  ;;  %v3114_v29 = vld [vmem:[%s6445_s1 + $0x688] sm:$0xff]  ;;  %v4051_v24 = vpack.c.bf16 %v3082_v49, %v3081_v35 }
  0x67   : > { %4012 = vmatprep.subr.bf16.mxu1 %v4011_v9  ;;  %4044 = vmatprep.subr.bf16.mxu0 %v4043_v31  ;;  %v752_v9 = vsel %vm714_vm3, %v747_v55, %v751_v47  ;;  %v755_v31 = vrot.slane %v4546_v12, 2  ;;  %v4083_v48 = vpack.c.bf16 %v3114_v29, %v3113_v21  ;;  %v753_v55 = vrot.slane %v4555_v17, 2 }
  0x68   : > { %628 = vmatmul.mubr.f32.gmra.mrb[26].mxu1 %v4791_v0  ;;  %902 = vmatmul.mubr.f32.gmra.mrb[28].mxu0 %v742_v30  ;;  %v759_v30 = vrot.slane %v4599_v40, 2  ;;  %v761_v21 = vrot.slane %v4671_v7, 2  ;;  %v767_v29 = vrot.slane %v4725_v37, 2 }
  0x69   : > { %632 = vmatprep.mubr.f32.mxu1 %v4828_v15  ;;  %906 = vmatprep.mubr.f32.mxu0 %v748_v50  ;;  %v756_v46 = vsel %vm714_vm3, %v751_v47, %v755_v31  ;;  %v1646_v50 = vrot.slane %v4587_v32, 6  ;;  %v754_v47 = vsel %vm714_vm3, %v749_v52, %v753_v55  ;;  %v1639_v32 = vrot.slane %v4552_v16, 6 }
  0x6a   : > { %4014 = vmatpush3.bf16.msra.mxu1 %v4013_v13  ;;  %4046 = vmatpush3.bf16.msra.mxu0 %v4045_v27  ;;  %v1644_v13 = vrot.slane %v4596_v39, 6  ;;  %v1650_v27 = vrot.slane %v4643_v58, 6  ;;  %v760_v39 = vsel %vm714_vm3, %v755_v31, %v759_v30  ;;  %v758_v49 = vsel %vm714_vm3, %v753_v55, %v757_v18  ;;  %v676_v31 = vld [vmem:[%s4423_s11 + $0xf8] sm:$0x3] }
  0x6b   : > { %4016 = vmatprep.subr.bf16.mxu1 %v4015_v22  ;;  %4048 = vmatprep.subr.bf16.mxu0 %v4047_v63  ;;  %v1642_v22 = vrot.slane %v4536_v6, 6 }
  0x6c   : > { %633 = vmatmul.mubr.f32.gmra.mrb[28].mxu1 %v4848_v33  ;;  %907 = vmatmul.mubr.f32.gmra.mrb[30].mxu0 %v746_v3  ;;  %v5330_v26 = vsel %vm1637_vm4, %v1639_v32, %v1644_v13  ;;  %v5336_v59 = vsel %vm1637_vm4, %v1646_v50, %v1650_v27  ;;  %v5341_v35 = vsel %vm1637_vm4, %v1644_v13, %v1648_v61  ;;  %v765_v3 = vrot.slane %v4740_v43, 2 }
  0x6d   : > { %637 = vmatprep.mubr.f32.mxu1 %v4235_v41  ;;  %911 = vmatprep.mubr.f32.mxu0 %v752_v9  ;;  %v5325_v63 = vsel %vm1637_vm4, %v1642_v22, %v1646_v50  ;;  %v771_v9 = vrot.slane %v4815_v11, 2  ;;  %v1308_v41 = vld [vmem:[%s4423_s11 + $0x18] sm:$0xe0]  ;;  %v1307_v50 = vld [vmem:[%s4423_s11 + $0x10] sm:$0xe0] }
  0x6e   : > { %4018 = vmatpush3.bf16.msra.mxu1 %v4017_v25  ;;  %4050 = vmatpush3.bf16.msra.mxu0 %v4049_v20  ;;  %v775_v20 = vrot.slane %v676_v31, 2 }
  0x6f   : > { %4052 = vmatprep.subr.bf16.mxu1 %v4051_v24  ;;  %4084 = vmatprep.subr.bf16.mxu0 %v4083_v48  ;;  %v772_v25 = vsel %vm714_vm3, %v767_v29, %v771_v9  ;;  %v675_v24 = vld [vmem:[%s4423_s11 + $0xf0] sm:$0x3]  ;;  %v963_v48 = vld [vmem:[%s4423_s11 + $0x18] sm:$0xf0] }
  0x70   : > { %638 = vmatmul.mubr.f32.gmra.mrb[30].mxu1 %v4501_v56  ;;  %912 = vmatmul.mubr.f32.gmra.mrb[32].mxu0 %v750_v54  ;;  %v763_v56 = vrot.slane %v4660_v1, 2  ;;  %v776_v54 = vsel %vm714_vm3, %v771_v9, %v775_v20  ;;  %v1063_v55 = vrot.slane %v963_v48, 4  ;;  %v6459_v9 = vrot.slane %v4552_v16, 5  ;;  %v3099_v48 = vld [vmem:[%s6445_s1 + $0x610] sm:$0xff] }
  0x71   : > { %642 = vmatprep.mubr.f32.mxu1 %v4236_v4  ;;  %916 = vmatprep.mubr.f32.mxu0 %v756_v46  ;;  %v962_v46 = vld [vmem:[%s4423_s11 + $0x10] sm:$0xf0]  ;;  %v6456_v4 = vrot.slane %v4536_v6, 4 }
  0x72   : > { %v768_v52 = vsel %vm714_vm3, %v763_v56, %v767_v29  ;;  %v1060_v13 = vrot.slane %v962_v46, 4  ;;  %v3115_v29 = vld [vmem:[%s6445_s1 + $0x690] sm:$0xff]  ;;  %v1076_v46 = vrot.slane %v4708_v23, 4 }
  0x74   : > { %643 = vmatmul.mubr.f32.gmra.mrb[32].mxu1 %v4504_v57  ;;  %917 = vmatmul.mubr.f32.gmra.mrb[34].mxu0 %v754_v47  ;;  %v764_v57 = vsel %vm714_vm3, %v759_v30, %v763_v56  ;;  %v1352_v30 = vrot.slane %v1308_v41, 5  ;;  %v1065_v47 = vsel %vm1059_vm1, %v1063_v55, %v6456_v4  ;;  %v3097_v56 = vld [vmem:[%s6445_s1 + $0x600] sm:$0xff]  ;;  %v3100_v41 = vld [vmem:[%s6445_s1 + $0x618] sm:$0xff]  ;;  %v3118_v55 = vld [vmem:[%s6445_s1 + $0x6a8] sm:$0xff] }
  0x75   : > { %647 = vmatprep.mubr.f32.mxu1 %v4546_v12  ;;  %921 = vmatprep.mubr.f32.mxu0 %v760_v39  ;;  %v762_v12 = vsel %vm714_vm3, %v757_v18, %v761_v21  ;;  %v6457_v18 = vrot.slane %v4536_v6, 5  ;;  %v3162_v6 = vld [vmem:[%s6445_s1 + $0x808] sm:$0xff] }
  0x77   : > { %v1354_v39 = vsel %vm1348_vm2, %v1352_v30, %v6457_v18  ;;  %v1074_v18 = vrot.slane %v4722_v36, 4 }
  0x78   : > { %648 = vmatmul.mubr.f32.gmra.mrb[34].mxu1 %v4555_v17  ;;  %922 = vmatmul.mubr.f32.gmra.mrb[36].mxu0 %v758_v49  ;;  %v766_v17 = vsel %vm714_vm3, %v761_v21, %v765_v3  ;;  %v3098_v49 = vld [vmem:[%s6445_s1 + $0x608] sm:$0xff]  ;;  %v3083_v21 = vld [vmem:[%s6445_s1 + $0x590] sm:$0xff] }
  0x79   : > { %652 = vmatprep.mubr.f32.mxu1 %v4599_v40  ;;  %926 = vmatprep.mubr.f32.mxu0 %v764_v57  ;;  %v769_v40 = vrot.slane %v4825_v14, 2  ;;  %v3084_v57 = vld [vmem:[%s6445_s1 + $0x598] sm:$0xff] }
  0x7a   : > { %v4055_v20 = vpack.c.bf16 %v3084_v57, %v3083_v21  ;;  %v1369_v57 = vrot.slane %v4788_v62, 5 }
  0x7c   : > { %653 = vmatmul.mubr.f32.gmra.mrb[36].mxu1 %v4608_v44  ;;  %927 = vmatmul.mubr.f32.gmra.mrb[38].mxu0 %v762_v12  ;;  %v770_v44 = vsel %vm714_vm3, %v765_v3, %v769_v40  ;;  %v3116_v12 = vld [vmem:[%s6445_s1 + $0x698] sm:$0xff]  ;;  %v6458_v3 = vrot.slane %v4552_v16, 4 }
  0x7d   : > { %657 = vmatprep.mubr.f32.mxu1 %v4660_v1  ;;  %931 = vmatprep.mubr.f32.mxu0 %v768_v52  ;;  %v773_v1 = vrot.slane %v675_v24, 2  ;;  %v4087_v24 = vpack.c.bf16 %v3116_v12, %v3115_v29  ;;  %v3089_v12 = vld [vmem:[%s6445_s1 + $0x5c0] sm:$0xff] }
  0x7e   : > { %v1062_v52 = vsel %vm1059_vm1, %v1060_v13, %v6458_v3  ;;  %v3069_v13 = vld [vmem:[%s6445_s1 + $0x520] sm:$0xff]  ;;  %v1075_v3 = vsel %vm1059_vm1, %v1070_v42, %v1074_v18 }
  0x80   : > { %658 = vmatmul.mubr.f32.gmra.mrb[38].mxu1 %v4671_v7  ;;  %932 = vmatmul.mubr.f32.gmra.mrb[40].mxu0 %v766_v17  ;;  %v774_v7 = vsel %vm714_vm3, %v769_v40, %v773_v1  ;;  %v4085_v17 = vpack.c.bf16 %v3098_v49, %v3097_v56  ;;  %v3067_v40 = vld [vmem:[%s6445_s1 + $0x510] sm:$0xff]  ;;  %v3086_v1 = vld [vmem:[%s6445_s1 + $0x5a8] sm:$0xff]  ;;  %v1080_v56 = vrot.slane %v4788_v62, 4  ;;  %v3104_v62 = vld [vmem:[%s6445_s1 + $0x638] sm:$0xff] }
  0x81   : > { %662 = vmatprep.mubr.f32.mxu1 %v4725_v37  ;;  %936 = vmatprep.mubr.f32.mxu0 %v772_v25  ;;  %v1349_v37 = vrot.slane %v1307_v50, 5  ;;  %v3068_v25 = vld [vmem:[%s6445_s1 + $0x518] sm:$0xff]  ;;  %v4089_v50 = vpack.c.bf16 %v3100_v41, %v3099_v48  ;;  %v3074_v41 = vld [vmem:[%s6445_s1 + $0x548] sm:$0xff] }
  0x82   : > { %v4057_v30 = vpack.c.bf16 %v3068_v25, %v3067_v40  ;;  %v1373_v25 = vrot.slane %v4828_v15, 5 }
  0x83   : > { %v1351_v31 = vsel %vm1348_vm2, %v1349_v37, %v6459_v9  ;;  %v3070_v37 = vld [vmem:[%s6445_s1 + $0x528] sm:$0xff]  ;;  %v3121_v9 = vld [vmem:[%s6445_s1 + $0x6c0] sm:$0xff] }
  0x84   : > { %663 = vmatmul.mubr.f32.gmra.mrb[40].mxu1 %v4740_v43  ;;  %937 = vmatmul.mubr.f32.gmra.mrb[42].mxu0 %v770_v44  ;;  %v3065_v43 = vld [vmem:[%s6445_s1 + $0x500] sm:$0xff]  ;;  %v4061_v21 = vpack.c.bf16 %v3070_v37, %v3069_v13  ;;  %v3124_v13 = vld [vmem:[%s6445_s1 + $0x6d8] sm:$0xff] }
  0x85   : > { %667 = vmatprep.mubr.f32.mxu1 %v4815_v11  ;;  %941 = vmatprep.mubr.f32.mxu0 %v776_v54  ;;  %v3066_v11 = vld [vmem:[%s6445_s1 + $0x508] sm:$0xff]  ;;  %v3085_v44 = vld [vmem:[%s6445_s1 + $0x5a0] sm:$0xff] }
  0x86   : > { %v3117_v54 = vld [vmem:[%s6445_s1 + $0x6a0] sm:$0xff] }
  0x87   : > { %v4091_v4 = vpack.c.bf16 %v3118_v55, %v3117_v54  ;;  %v3106_v54 = vld [vmem:[%s6445_s1 + $0x648] sm:$0xff]  ;;  %v3091_v55 = vld [vmem:[%s6445_s1 + $0x5d0] sm:$0xff] }
  0x88   : > { %668 = vmatmul.mubr.f32.gmra.mrb[42].mxu1 %v4825_v14  ;;  %942 = vmatmul.mubr.f32.gmra.mrb[44].mxu0 %v774_v7  ;;  %v4053_v14 = vpack.c.bf16 %v3066_v11, %v3065_v43  ;;  %v1365_v7 = vrot.slane %v4708_v23, 5  ;;  %v3102_v23 = vld [vmem:[%s6445_s1 + $0x628] sm:$0xff]  ;;  %v3119_v43 = vld [vmem:[%s6445_s1 + $0x6b0] sm:$0xff]  ;;  %v3120_v11 = vld [vmem:[%s6445_s1 + $0x6b8] sm:$0xff] }
  0x89   : > { %1216 = vmatprep.mubr.f32.mxu1 %v1065_v47  ;;  %1505 = vmatprep.mubr.f32.mxu0 %v1354_v39  ;;  %v3087_v47 = vld [vmem:[%s6445_s1 + $0x5b0] sm:$0xff]  ;;  %v3088_v39 = vld [vmem:[%s6445_s1 + $0x5b8] sm:$0xff]  ;;  %v4095_v29 = vpack.c.bf16 %v3120_v11, %v3119_v43 }
  0x8a   : > { %v1366_v49 = vsel %vm1348_vm2, %v1361_v45, %v1365_v7  ;;  %v3103_v45 = vld [vmem:[%s6445_s1 + $0x630] sm:$0xff]  ;;  %v1370_v40 = vsel %vm1348_vm2, %v1365_v7, %v1369_v57 }
  0x8b   : > { %v4097_v48 = vpack.c.bf16 %v3104_v62, %v3103_v45  ;;  %v3123_v7 = vld [vmem:[%s6445_s1 + $0x6d0] sm:$0xff] }
  0x8c   : > { %1217 = vmatmul.mubr.f32.vlgmr.msra.gmra.mrb[44].mxu1 %v1062_v52  ;;  %1506 = vmatmul.mubr.f32.vlgmr.msra.gmra.mrb[46].mxu0 %v1351_v31  ;;  %v1078_v52 = vrot.slane %v4791_v0, 4  ;;  %v1367_v31 = vrot.slane %v4791_v0, 5 }
  0x8d   : > { %4054 = vmatpush3.bf16.msra.mxu1 %v4053_v14  ;;  %1221 = vmatprep.mubr.f32.mxu1 %v4998_v38  ;;  %v4059_v38 = vpack.c.bf16 %v3086_v1, %v3085_v44  ;;  %v3090_v14 = vld [vmem:[%s6445_s1 + $0x5c8] sm:$0xff] }
  0x8e   : > { %4086 = vmatpush3.bf16.msra.mxu0 %v4085_v17  ;;  %1510 = vmatprep.mubr.f32.mxu0 %v5015_v53  ;;  %v3101_v53 = vld [vmem:[%s6445_s1 + $0x620] sm:$0xff]  ;;  %v1084_v17 = vrot.slane %v4828_v15, 4  ;;  %v4067_v44 = vpack.c.bf16 %v3090_v14, %v3089_v12  ;;  %v5589_v14 = vld [vmem:[%s4423_s11 + $0x90] sm:$0xff] }
  0x8f   : > { %4056 = vmatprep.subr.bf16.mxu1 %v4055_v20  ;;  %4088 = vmatprep.subr.bf16.mxu0 %v4087_v24  ;;  %v5514_v20 = vld [vmem:[%s4423_s11 + $0x88] sm:$0xff]  ;;  %v3105_v15 = vld [vmem:[%s6445_s1 + $0x640] sm:$0xff] }
  0x90   : > { %1222 = vmatmul.mubr.f32.gmra.mrb[46].mxu1 %v5003_v28  ;;  %1511 = vmatmul.mubr.f32.gmra.mrb[48].mxu0 %v5033_v10  ;;  %v1077_v28 = vsel %vm1059_vm1, %v1072_v19, %v1076_v46  ;;  %v1363_v10 = vrot.slane %v4722_v36, 5  ;;  %v3072_v36 = vld [vmem:[%s6445_s1 + $0x538] sm:$0xff]  ;;  %v4063_v19 = vpack.c.bf16 %v3088_v39, %v3087_v47  ;;  %v1374_v47 = vsel %vm1348_vm2, %v1369_v57, %v1373_v25  ;;  %v3093_v57 = vld [vmem:[%s6445_s1 + $0x5e0] sm:$0xff] }
  0x91   : > { %1226 = vmatprep.mubr.f32.mxu1 %v5038_v60  ;;  %1515 = vmatprep.mubr.f32.mxu0 %v5055_v51  ;;  %v4093_v60 = vpack.c.bf16 %v3102_v23, %v3101_v53  ;;  %v3071_v51 = vld [vmem:[%s6445_s1 + $0x530] sm:$0xff]  ;;  %v1088_v53 = vrot.slane %v5514_v20, 4  ;;  %v5549_v23 = vld [vmem:[%s4423_s11 + $0x80] sm:$0xff]  ;;  %v5554_v39 = vld [vmem:[%s4423_s11 + $0x98] sm:$0xff]  ;;  %v4101_v11 = vpack.c.bf16 %v3106_v54, %v3105_v15 }
  0x92   : > { %4058 = vmatpush3.bf16.msra.mxu1 %v4057_v30  ;;  %4090 = vmatpush3.bf16.msra.mxu0 %v4089_v50  ;;  %v1364_v42 = vsel %vm1348_vm2, %v1359_v2, %v1363_v10  ;;  %v4065_v24 = vpack.c.bf16 %v3072_v36, %v3071_v51  ;;  %v3073_v2 = vld [vmem:[%s6445_s1 + $0x540] sm:$0xff]  ;;  %v1082_v30 = vrot.slane %v4848_v33, 4  ;;  %v3092_v50 = vld [vmem:[%s6445_s1 + $0x5d8] sm:$0xff]  ;;  %v1368_v37 = vsel %vm1348_vm2, %v1363_v10, %v1367_v31  ;;  %v3094_v36 = vld [vmem:[%s6445_s1 + $0x5e8] sm:$0xff] }
  0x93   : > { %4060 = vmatprep.subr.bf16.mxu1 %v4059_v38  ;;  %4092 = vmatprep.subr.bf16.mxu0 %v4091_v4  ;;  %v1085_v38 = vsel %vm1059_vm1, %v1080_v56, %v1084_v17  ;;  %v1371_v4 = vrot.slane %v4848_v33, 5  ;;  %v4069_v43 = vpack.c.bf16 %v3074_v41, %v3073_v2  ;;  %v3076_v33 = vld [vmem:[%s6445_s1 + $0x558] sm:$0xff]  ;;  %v4071_v10 = vpack.c.bf16 %v3092_v50, %v3091_v55  ;;  %v3127_v15 = vld [vmem:[%s6445_s1 + $0x6f0] sm:$0xff]  ;;  %v5629_v50 = vld [vmem:[%s4423_s11 + $0xa0] sm:$0xff] }
  0x94   : > { %1227 = vmatmul.mubr.f32.gmra.mrb[48].mxu1 %v5044_v8  ;;  %1516 = vmatmul.mubr.f32.gmra.mrb[50].mxu0 %v5060_v34  ;;  %v3122_v8 = vld [vmem:[%s6445_s1 + $0x6c8] sm:$0xff]  ;;  %v1081_v34 = vsel %vm1059_vm1, %v1076_v46, %v1080_v56  ;;  %v1079_v46 = vsel %vm1059_vm1, %v1074_v18, %v1078_v52  ;;  %v1377_v18 = vrot.slane %v5514_v20, 5  ;;  %v4103_v56 = vpack.c.bf16 %v3124_v13, %v3123_v7  ;;  %v3128_v54 = vld [vmem:[%s6445_s1 + $0x6f8] sm:$0xff] }
  0x95   : > { %1231 = vmatprep.mubr.f32.mxu1 %v1077_v28  ;;  %1520 = vmatprep.mubr.f32.mxu0 %v1366_v49  ;;  %v4099_v1 = vpack.c.bf16 %v3122_v8, %v3121_v9  ;;  %v3075_v28 = vld [vmem:[%s6445_s1 + $0x550] sm:$0xff]  ;;  %v1375_v51 = vrot.slane %v5549_v23, 5  ;;  %v1083_v45 = vsel %vm1059_vm1, %v1078_v52, %v1082_v30  ;;  %v1372_v62 = vsel %vm1348_vm2, %v1367_v31, %v1371_v4  ;;  %v3077_v52 = vld [vmem:[%s6445_s1 + $0x560] sm:$0xff]  ;;  %v3078_v31 = vld [vmem:[%s6445_s1 + $0x568] sm:$0xff] }
  0x96   : > { %4062 = vmatpush3.bf16.msra.mxu1 %v4061_v21  ;;  %4094 = vmatpush3.bf16.msra.mxu0 %v4093_v60  ;;  %v3107_v49 = vld [vmem:[%s6445_s1 + $0x650] sm:$0xff]  ;;  %v3108_v21 = vld [vmem:[%s6445_s1 + $0x658] sm:$0xff]  ;;  %v1086_v60 = vrot.slane %v5549_v23, 4  ;;  %v1089_v12 = vsel %vm1059_vm1, %v1084_v17, %v1088_v53  ;;  %v1378_v9 = vsel %vm1348_vm2, %v1373_v25, %v1377_v18  ;;  %v1381_v8 = vrot.slane %v5554_v39, 5  ;;  %v3109_v25 = vld [vmem:[%s6445_s1 + $0x660] sm:$0xff] }
  0x97   : > { %4064 = vmatprep.subr.bf16.mxu1 %v4063_v19  ;;  %4096 = vmatprep.subr.bf16.mxu0 %v4095_v29  ;;  %v3125_v19 = vld [vmem:[%s6445_s1 + $0x6e0] sm:$0xff]  ;;  %v3126_v29 = vld [vmem:[%s6445_s1 + $0x6e8] sm:$0xff]  ;;  %v4073_v0 = vpack.c.bf16 %v3076_v33, %v3075_v28  ;;  %v4075_v17 = vpack.c.bf16 %v3094_v36, %v3093_v57  ;;  %v1376_v41 = vsel %vm1348_vm2, %v1371_v4, %v1375_v51  ;;  %v3112_v28 = vld [vmem:[%s6445_s1 + $0x678] sm:$0xff] }
  0x98   : > { %1232 = vmatmul.mubr.f32.gmra.mrb[50].mxu1 %v1075_v3  ;;  %1521 = vmatmul.mubr.f32.gmra.mrb[52].mxu0 %v1364_v42  ;;  %v1092_v3 = vrot.slane %v5554_v39, 4  ;;  %v5594_v42 = vld [vmem:[%s4423_s11 + $0xa8] sm:$0xff]  ;;  %v1087_v2 = vsel %vm1059_vm1, %v1082_v30, %v1086_v60  ;;  %v1382_v13 = vsel %vm1348_vm2, %v1377_v18, %v1381_v8  ;;  %v3111_v18 = vld [vmem:[%s6445_s1 + $0x670] sm:$0xff]  ;;  %v3145_v33 = vld [vmem:[%s6445_s1 + $0x780] sm:$0xff] }
  0x99   : > { %1236 = vmatprep.mubr.f32.mxu1 %v1081_v34  ;;  %1525 = vmatprep.mubr.f32.mxu0 %v1370_v40  ;;  %v4105_v34 = vpack.c.bf16 %v3108_v21, %v3107_v49  ;;  %v4107_v40 = vpack.c.bf16 %v3126_v29, %v3125_v19  ;;  %v1096_v30 = vrot.slane %v5594_v42, 4  ;;  %v1385_v7 = vrot.slane %v5594_v42, 5  ;;  %v3146_v49 = vld [vmem:[%s6445_s1 + $0x788] sm:$0xff]  ;;  %v3177_v21 = vld [vmem:[%s6445_s1 + $0x880] sm:$0xff] }
  0x9a   : > { %4066 = vmatpush3.bf16.msra.mxu1 %v4065_v24  ;;  %4098 = vmatpush3.bf16.msra.mxu0 %v4097_v48  ;;  %v3110_v24 = vld [vmem:[%s6445_s1 + $0x668] sm:$0xff]  ;;  %v3095_v48 = vld [vmem:[%s6445_s1 + $0x5f0] sm:$0xff]  ;;  %v1093_v55 = vsel %vm1059_vm1, %v1088_v53, %v1092_v3  ;;  %v1383_v29 = vrot.slane %v5629_v50, 5 }
  0x9b   : > { %4068 = vmatprep.subr.bf16.mxu1 %v4067_v44  ;;  %4100 = vmatprep.subr.bf16.mxu0 %v4099_v1  ;;  %v1090_v44 = vrot.slane %v5589_v14, 4  ;;  %v3096_v1 = vld [vmem:[%s6445_s1 + $0x5f8] sm:$0xff]  ;;  %v4109_v4 = vpack.c.bf16 %v3110_v24, %v3109_v25  ;;  %v3079_v53 = vld [vmem:[%s6445_s1 + $0x570] sm:$0xff]  ;;  %v3178_v57 = vld [vmem:[%s6445_s1 + $0x888] sm:$0xff]  ;;  %v1097_v36 = vsel %vm1059_vm1, %v1092_v3, %v1096_v30  ;;  %v1386_v19 = vsel %vm1348_vm2, %v1381_v8, %v1385_v7 }
  0x9c   : > { %1237 = vmatmul.mubr.f32.gmra.mrb[52].mxu1 %v1079_v46  ;;  %1526 = vmatmul.mubr.f32.gmra.mrb[54].mxu0 %v1368_v37  ;;  %v1379_v46 = vrot.slane %v5589_v14, 5  ;;  %v5634_v37 = vld [vmem:[%s4423_s11 + $0xb8] sm:$0xff]  ;;  %v4147_v3 = vpack.c.bf16 %v3178_v57, %v3177_v21 }
  0x9d   : > { %1241 = vmatprep.mubr.f32.mxu1 %v1085_v38  ;;  %1530 = vmatprep.mubr.f32.mxu0 %v1374_v47  ;;  %v4077_v38 = vpack.c.bf16 %v3078_v31, %v3077_v52  ;;  %v3080_v47 = vld [vmem:[%s6445_s1 + $0x578] sm:$0xff] }
  0x9e   : > { %4070 = vmatpush3.bf16.msra.mxu1 %v4069_v43  ;;  %4102 = vmatpush3.bf16.msra.mxu0 %v4101_v11  ;;  %v4079_v43 = vpack.c.bf16 %v3096_v1, %v3095_v48  ;;  %v4111_v11 = vpack.c.bf16 %v3128_v54, %v3127_v15  ;;  %v1384_v52 = vsel %vm1348_vm2, %v1379_v46, %v1383_v29  ;;  %v5684_v48 = vld [vmem:[%s4423_s11 + $0xc0] sm:$0xff] }
  0x9f   : > { %4072 = vmatprep.subr.bf16.mxu1 %v4071_v10  ;;  %4104 = vmatprep.subr.bf16.mxu0 %v4103_v56  ;;  %v1091_v10 = vsel %vm1059_vm1, %v1086_v60, %v1090_v44  ;;  %v1094_v56 = vrot.slane %v5629_v50, 4  ;;  %v1380_v60 = vsel %vm1348_vm2, %v1375_v51, %v1379_v46  ;;  %v4115_v51 = vpack.c.bf16 %v3146_v49, %v3145_v33  ;;  %v5712_v33 = vld [vmem:[%s4423_s11 + $0xe0] sm:$0xff] }
  0xa0   : > { %1242 = vmatmul.mubr.f32.gmra.mrb[54].mxu1 %v1083_v45  ;;  %1531 = vmatmul.mubr.f32.gmra.mrb[56].mxu0 %v1372_v62  ;;  %v1100_v45 = vrot.slane %v5634_v37, 4  ;;  %v5670_v62 = vld [vmem:[%s4423_s11 + $0xb0] sm:$0xff]  ;;  %v1102_v15 = vrot.slane %v5684_v48, 4  ;;  %v1391_v54 = vrot.slane %v5684_v48, 5  ;;  %v1110_v57 = vrot.slane %v5712_v33, 4 }
  0xa1   : > { %1246 = vmatprep.mubr.f32.mxu1 %v1089_v12  ;;  %1535 = vmatprep.mubr.f32.mxu0 %v1378_v9  ;;  %v1389_v12 = vrot.slane %v5634_v37, 5  ;;  %v4081_v9 = vpack.c.bf16 %v3080_v47, %v3079_v53  ;;  %v1095_v8 = vsel %vm1059_vm1, %v1090_v44, %v1094_v56  ;;  %v1098_v31 = vrot.slane %v5670_v62, 4 }
  0xa2   : > { %4074 = vmatpush3.bf16.msra.mxu1 %v4073_v0  ;;  %4106 = vmatpush3.bf16.msra.mxu0 %v4105_v34  ;;  %v4113_v0 = vpack.c.bf16 %v3112_v28, %v3111_v18  ;;  %v5674_v34 = vld [vmem:[%s4423_s11 + $0xc8] sm:$0xff] }
  0xa3   : > { %4076 = vmatprep.subr.bf16.mxu1 %v4075_v17  ;;  %4108 = vmatprep.subr.bf16.mxu0 %v4107_v40  ;;  %v1387_v17 = vrot.slane %v5670_v62, 5  ;;  %v1101_v40 = vsel %vm1059_vm1, %v1096_v30, %v1100_v45  ;;  %v1390_v25 = vsel %vm1348_vm2, %v1385_v7, %v1389_v12  ;;  %v1104_v24 = vrot.slane %v5674_v34, 4  ;;  %v5698_v7 = vld [vmem:[%s4423_s11 + $0xd0] sm:$0xff] }
  0xa4   : > { %1247 = vmatmul.mubr.f32.gmra.mrb[56].mxu1 %v1087_v2  ;;  %1536 = vmatmul.mubr.f32.gmra.mrb[58].mxu0 %v1376_v41  ;;  %v1393_v2 = vrot.slane %v5674_v34, 5  ;;  %v5688_v41 = vld [vmem:[%s4423_s11 + $0xd8] sm:$0xff]  ;;  %v1099_v44 = vsel %vm1059_vm1, %v1094_v56, %v1098_v31  ;;  %v1106_v47 = vrot.slane %v5698_v7, 4 }
  0xa5   : > { %1251 = vmatprep.mubr.f32.mxu1 %v1093_v55  ;;  %1540 = vmatprep.mubr.f32.mxu0 %v1382_v13  ;;  %v1388_v1 = vsel %vm1348_vm2, %v1383_v29, %v1387_v17  ;;  %v1105_v55 = vsel %vm1059_vm1, %v1100_v45, %v1104_v24  ;;  %v1108_v30 = vrot.slane %v5688_v41, 4  ;;  %v1397_v13 = vrot.slane %v5688_v41, 5  ;;  %v5716_v56 = vld [vmem:[%s4423_s11 + $0xf8] sm:$0xff]  ;;  %v5726_v45 = vld [vmem:[%s4423_s11 + $0xf0] sm:$0xff] }
  0xa6   : > { %4078 = vmatpush3.bf16.msra.mxu1 %v4077_v38  ;;  %4110 = vmatpush3.bf16.msra.mxu0 %v4109_v4  ;;  %v1394_v46 = vsel %vm1348_vm2, %v1389_v12, %v1393_v2  ;;  %v5702_v38 = vld [vmem:[%s4423_s11 + $0xe8] sm:$0xff]  ;;  %v1103_v4 = vsel %vm1059_vm1, %v1098_v31, %v1102_v15  ;;  %v1392_v53 = vsel %vm1348_vm2, %v1387_v17, %v1391_v54  ;;  %v1116_v29 = vrot.slane %v5716_v56, 4 }
  0xa7   : > { %4080 = vmatprep.subr.bf16.mxu1 %v4079_v43  ;;  %4112 = vmatprep.subr.bf16.mxu0 %v4111_v11  ;;  %v1395_v43 = vrot.slane %v5698_v7, 5  ;;  %v1109_v11 = vsel %vm1059_vm1, %v1104_v24, %v1108_v30  ;;  %v1398_v18 = vsel %vm1348_vm2, %v1393_v2, %v1397_v13  ;;  %v1112_v28 = vrot.slane %v5702_v38, 4  ;;  %v1309_v2 = vld [vmem:[%s4423_s11 + $0x100] sm:$0x1f] }
  0xa8   : > { %1252 = vmatmul.mubr.f32.gmra.mrb[58].mxu1 %v1091_v10  ;;  %1541 = vmatmul.mubr.f32.gmra.mrb[60].mxu0 %v1380_v60  ;;  %v1401_v10 = vrot.slane %v5702_v38, 5  ;;  %v1107_v49 = vsel %vm1059_vm1, %v1102_v15, %v1106_v47  ;;  %v1399_v60 = vrot.slane %v5712_v33, 5  ;;  %v1405_v12 = vrot.slane %v5716_v56, 5 }
  0xa9   : > { %1256 = vmatprep.mubr.f32.mxu1 %v1097_v36  ;;  %1545 = vmatprep.mubr.f32.mxu0 %v1386_v19  ;;  %v1396_v21 = vsel %vm1348_vm2, %v1391_v54, %v1395_v43  ;;  %v1113_v36 = vsel %vm1059_vm1, %v1108_v30, %v1112_v28  ;;  %v1117_v31 = vsel %vm1059_vm1, %v1112_v28, %v1116_v29  ;;  %v3129_v28 = vld [vmem:[%s6445_s1 + $0x700] sm:$0xff] }
  0xaa   : > { %4082 = vmatpush3.bf16.msra.mxu1 %v4081_v9  ;;  %4114 = vmatpush3.bf16.msra.mxu0 %v4113_v0  ;;  %v1402_v19 = vsel %vm1348_vm2, %v1397_v13, %v1401_v10  ;;  %v993_v9 = vld [vmem:[%s4423_s11 + $0x108] sm:$0xf]  ;;  %v1406_v17 = vsel %vm1348_vm2, %v1401_v10, %v1405_v12 }
  0xab   : > { %4116 = vmatprep.subr.bf16.mxu1 %v4115_v51  ;;  %4148 = vmatprep.subr.bf16.mxu0 %v4147_v3  ;;  %v1310_v0 = vld [vmem:[%s4423_s11 + $0x108] sm:$0x1f]  ;;  %v1111_v51 = vsel %vm1059_vm1, %v1106_v47, %v1110_v57  ;;  %v1400_v3 = vsel %vm1348_vm2, %v1395_v43, %v1399_v60 }
  0xac   : > { %1257 = vmatmul.mubr.f32.gmra.mrb[60].mxu1 %v1095_v8  ;;  %1546 = vmatmul.mubr.f32.gmra.mrb[62].mxu0 %v1384_v52  ;;  %v1114_v8 = vrot.slane %v5726_v45, 4  ;;  %v1403_v52 = vrot.slane %v5726_v45, 5  ;;  %v1409_v24 = vrot.slane %v1310_v0, 5  ;;  %v3130_v10 = vld [vmem:[%s6445_s1 + $0x708] sm:$0xff]  ;;  %v3131_v0 = vld [vmem:[%s6445_s1 + $0x710] sm:$0xff] }
  0xad   : > { %1261 = vmatprep.mubr.f32.mxu1 %v1101_v40  ;;  %1550 = vmatprep.mubr.f32.mxu0 %v1390_v25  ;;  %v1120_v40 = vrot.slane %v993_v9, 4  ;;  %v992_v25 = vld [vmem:[%s4423_s11 + $0x100] sm:$0xf]  ;;  %v5780_v9 = vld [vmem:[%s4423_s11 + $0x48] sm:$0xff] }
  0xae   : > { %v1404_v15 = vsel %vm1348_vm2, %v1399_v60, %v1403_v52  ;;  %v1118_v54 = vrot.slane %v992_v25, 4  ;;  %v1410_v30 = vsel %vm1348_vm2, %v1405_v12, %v1409_v24  ;;  %v3180_v60 = vld [vmem:[%s6445_s1 + $0x898] sm:$0xff]  ;;  %v5808_v25 = vld [vmem:[%s4423_s11 + $0x40] sm:$0xff] }
  0xaf   : > { %v5812_v24 = vld [vmem:[%s4423_s11 + $0x58] sm:$0xff] }
  0xb0   : > { %1262 = vmatmul.mubr.f32.gmra.mrb[62].mxu1 %v1099_v44  ;;  %1551 = vmatmul.mubr.f32.gmra.mrb[64].mxu0 %v1388_v1  ;;  %v1597_v44 = vld [vmem:[%s4423_s11 + $0x18] sm:$0xc0]  ;;  %v1115_v1 = vsel %vm1059_vm1, %v1110_v57, %v1114_v8  ;;  %v3179_v57 = vld [vmem:[%s6445_s1 + $0x890] sm:$0xff] }
  0xb1   : > { %1266 = vmatprep.mubr.f32.mxu1 %v1105_v55  ;;  %1555 = vmatprep.mubr.f32.mxu0 %v1394_v46  ;;  %v1407_v55 = vrot.slane %v1309_v2, 5  ;;  %v1121_v46 = vsel %vm1059_vm1, %v1116_v29, %v1120_v40  ;;  %v1641_v13 = vrot.slane %v1597_v44, 6  ;;  %v1885_v29 = vld [vmem:[%s4423_s11 + $0x30] sm:$0xff]  ;;  %v4151_v16 = vpack.c.bf16 %v3180_v60, %v3179_v57  ;;  %v3182_v40 = vld [vmem:[%s6445_s1 + $0x8a8] sm:$0xff]  ;;  %v4237_v44 = vld [vmem:[%s4423_s11 + $0x58] sm:$0xff] }
  0xb2   : > { %v3136_v57 = vld [vmem:[%s6445_s1 + $0x738] sm:$0xff]  ;;  %v3167_v60 = vld [vmem:[%s6445_s1 + $0x830] sm:$0xff] }
  0xb3   : > { %v1408_v47 = vsel %vm1348_vm2, %v1403_v52, %v1407_v55  ;;  %v3149_v52 = vld [vmem:[%s6445_s1 + $0x7a0] sm:$0xff] }
  0xb4   : > { %1267 = vmatmul.mubr.f32.gmra.mrb[64].mxu1 %v1103_v4  ;;  %1556 = vmatmul.mubr.f32.gmra.mrb[66].mxu0 %v1392_v53  ;;  %v1596_v4 = vld [vmem:[%s4423_s11 + $0x10] sm:$0xc0]  ;;  %v1119_v53 = vsel %vm1059_vm1, %v1114_v8, %v1118_v54  ;;  %v3164_v8 = vld [vmem:[%s6445_s1 + $0x818] sm:$0xff]  ;;  %v3133_v54 = vld [vmem:[%s6445_s1 + $0x720] sm:$0xff] }
  0xb5   : > { %1271 = vmatprep.mubr.f32.mxu1 %v1109_v11  ;;  %1560 = vmatprep.mubr.f32.mxu0 %v1398_v18  ;;  %v1638_v43 = vrot.slane %v1596_v4, 6  ;;  %v1643_v11 = vsel %vm1637_vm4, %v1641_v13, %v1642_v22  ;;  %v1886_v18 = vld [vmem:[%s4423_s11 + $0x38] sm:$0xff]  ;;  %v3147_v22 = vld [vmem:[%s6445_s1 + $0x790] sm:$0xff]  ;;  %v3166_v13 = vld [vmem:[%s6445_s1 + $0x828] sm:$0xff] }
  0xb6   : > { %v3151_v4 = vld [vmem:[%s6445_s1 + $0x7b0] sm:$0xff] }
  0xb8   : > { %1272 = vmatmul.mubr.f32.gmra.mrb[66].mxu1 %v1107_v49  ;;  %1561 = vmatmul.mubr.f32.gmra.mrb[68].mxu0 %v1396_v21  ;;  %v3161_v49 = vld [vmem:[%s6445_s1 + $0x800] sm:$0xff]  ;;  %v3148_v21 = vld [vmem:[%s6445_s1 + $0x798] sm:$0xff] }
  0xb9   : > { %1276 = vmatprep.mubr.f32.mxu1 %v1113_v36  ;;  %1565 = vmatprep.mubr.f32.mxu0 %v1402_v19  ;;  %v1640_v36 = vsel %vm1637_vm4, %v1638_v43, %v1639_v32  ;;  %v4117_v19 = vpack.c.bf16 %v3130_v10, %v3129_v28  ;;  %v4149_v12 = vpack.c.bf16 %v3162_v6, %v3161_v49  ;;  %v3163_v32 = vld [vmem:[%s6445_s1 + $0x810] sm:$0xff]  ;;  %v3184_v43 = vld [vmem:[%s6445_s1 + $0x8b8] sm:$0xff]  ;;  %v5851_v10 = vld [vmem:[%s4423_s11 + $0x68] sm:$0xff] }
  0xba   : > { %v4239_v49 = vld [vmem:[%s4423_s11 + $0x68] sm:$0xff] }
  0xbb   : > { %v1658_v6 = vrot.slane %v4239_v49, 6  ;;  %v3139_v49 = vld [vmem:[%s6445_s1 + $0x750] sm:$0xff] }
  0xbc   : > { %1277 = vmatmul.mubr.f32.gmra.mrb[68].mxu1 %v1111_v51  ;;  %1566 = vmatmul.mubr.f32.gmra.mrb[70].mxu0 %v1400_v3  ;;  %v3132_v51 = vld [vmem:[%s6445_s1 + $0x718] sm:$0xff]  ;;  %v4119_v3 = vpack.c.bf16 %v3148_v21, %v3147_v22 }
  0xbd   : > { %1281 = vmatprep.mubr.f32.mxu1 %v1117_v31  ;;  %1570 = vmatprep.mubr.f32.mxu0 %v1406_v17  ;;  %v3150_v31 = vld [vmem:[%s6445_s1 + $0x7a8] sm:$0xff]  ;;  %v3181_v17 = vld [vmem:[%s6445_s1 + $0x8a0] sm:$0xff]  ;;  %v4121_v2 = vpack.c.bf16 %v3132_v51, %v3131_v0 }
  0xbe   : > { %v4123_v55 = vpack.c.bf16 %v3150_v31, %v3149_v52  ;;  %v3186_v0 = vld [vmem:[%s6445_s1 + $0x8c8] sm:$0xff]  ;;  %v4241_v52 = vld [vmem:[%s4423_s11 + $0x78] sm:$0xff] }
  0xbf   : > { %v1662_v31 = vrot.slane %v4241_v52, 6  ;;  %v3173_v52 = vld [vmem:[%s6445_s1 + $0x860] sm:$0xff] }
  0xc0   : > { %1282 = vmatmul.mubr.f32.gmra.mrb[70].mxu1 %v1115_v1  ;;  %1571 = vmatmul.mubr.f32.gmra.mrb[72].mxu0 %v1404_v15  ;;  %v1654_v1 = vrot.slane %v4237_v44, 6  ;;  %v4153_v15 = vpack.c.bf16 %v3164_v8, %v3163_v32  ;;  %v5890_v8 = vld [vmem:[%s4423_s11 + $0x78] sm:$0xff] }
  0xc1   : > { %1286 = vmatprep.mubr.f32.mxu1 %v1121_v46  ;;  %1575 = vmatprep.mubr.f32.mxu0 %v1410_v30  ;;  %v4155_v46 = vpack.c.bf16 %v3182_v40, %v3181_v17  ;;  %v3165_v30 = vld [vmem:[%s6445_s1 + $0x820] sm:$0xff] }
  0xc2   : > { %v1655_v28 = vsel %vm1637_vm4, %v1650_v27, %v1654_v1  ;;  %v4157_v21 = vpack.c.bf16 %v3166_v13, %v3165_v30  ;;  %v1659_v32 = vsel %vm1637_vm4, %v1654_v1, %v1658_v6  ;;  %v3169_v1 = vld [vmem:[%s6445_s1 + $0x840] sm:$0xff]  ;;  %v5921_v13 = vld [vmem:[%s4423_s11 + $0x70] sm:$0xff] }
  0xc4   : > { %1287 = vmatmul.mubr.f32.gmra.mrb[72].mxu1 %v1119_v53  ;;  %1576 = vmatmul.mubr.f32.gmra.mrb[74].mxu0 %v1408_v47  ;;  %v3152_v53 = vld [vmem:[%s6445_s1 + $0x7b8] sm:$0xff]  ;;  %v3183_v47 = vld [vmem:[%s6445_s1 + $0x8b0] sm:$0xff] }
  0xc5   : > { %1794 = vmatprep.mubr.f32.mxu1 %v1643_v11  ;;  %2012 = vmatprep.mubr.f32.mxu0 %v1886_v18  ;;  %v5844_v11 = vld [vmem:[%s4423_s11 + $0x50] sm:$0xff]  ;;  %v4127_v58 = vpack.c.bf16 %v3152_v53, %v3151_v4  ;;  %v4159_v27 = vpack.c.bf16 %v3184_v43, %v3183_v47  ;;  %v1663_v47 = vsel %vm1637_vm4, %v1658_v6, %v1662_v31  ;;  %v1666_v43 = vrot.slane %v5514_v20, 6 }
  0xc6   : > { %v4242_v4 = vld [vmem:[%s4423_s11 + $0x70] sm:$0xff] }
  0xc7   : > { %v1660_v53 = vrot.slane %v4242_v4, 6  ;;  %v3171_v6 = vld [vmem:[%s6445_s1 + $0x850] sm:$0xff]  ;;  %v3176_v4 = vld [vmem:[%s6445_s1 + $0x878] sm:$0xff] }
  0xc8   : > { %1795 = vmatmul.mubr.f32.vlgmr.msra.gmra.mrb[74].mxu1 %v1640_v36  ;;  %2013 = vmatmul.mubr.f32.vlgmr.msra.gmra.mrb[76].mxu0 %v1885_v29  ;;  %v3168_v36 = vld [vmem:[%s6445_s1 + $0x838] sm:$0xff]  ;;  %v3154_v29 = vld [vmem:[%s6445_s1 + $0x7c8] sm:$0xff] }
  0xc9   : > { %4118 = vmatpush3.bf16.msra.mxu1 %v4117_v19  ;;  %1799 = vmatprep.mubr.f32.mxu1 %v5325_v63  ;;  %v3134_v63 = vld [vmem:[%s6445_s1 + $0x728] sm:$0xff]  ;;  %v3153_v19 = vld [vmem:[%s6445_s1 + $0x7c0] sm:$0xff]  ;;  %v4161_v40 = vpack.c.bf16 %v3168_v36, %v3167_v60 }
  0xca   : > { %4150 = vmatpush3.bf16.msra.mxu0 %v4149_v12  ;;  %2017 = vmatprep.mubr.f32.mxu0 %v5780_v9  ;;  %v4125_v22 = vpack.c.bf16 %v3134_v63, %v3133_v54  ;;  %v3185_v12 = vld [vmem:[%s6445_s1 + $0x8c0] sm:$0xff]  ;;  %v3155_v54 = vld [vmem:[%s6445_s1 + $0x7d0] sm:$0xff]  ;;  %v3156_v63 = vld [vmem:[%s6445_s1 + $0x7d8] sm:$0xff] }
  0xcb   : > { %4120 = vmatprep.subr.bf16.mxu1 %v4119_v3  ;;  %4152 = vmatprep.subr.bf16.mxu0 %v4151_v16  ;;  %v4240_v3 = vld [vmem:[%s4423_s11 + $0x60] sm:$0xff]  ;;  %v4163_v44 = vpack.c.bf16 %v3186_v0, %v3185_v12  ;;  %v3190_v60 = vld [vmem:[%s6445_s1 + $0x8e8] sm:$0xff]  ;;  %v1670_v12 = vrot.slane %v5554_v39, 6 }
  0xcc   : > { %1800 = vmatmul.mubr.f32.gmra.mrb[76].mxu1 %v5330_v26  ;;  %2018 = vmatmul.mubr.f32.gmra.mrb[78].mxu0 %v5808_v25  ;;  %v4238_v26 = vld [vmem:[%s4423_s11 + $0x50] sm:$0xff]  ;;  %v1656_v16 = vrot.slane %v4240_v3, 6  ;;  %v3141_v3 = vld [vmem:[%s6445_s1 + $0x760] sm:$0xff] }
  0xcd   : > { %1804 = vmatprep.mubr.f32.mxu1 %v5336_v59  ;;  %2022 = vmatprep.mubr.f32.mxu0 %v5812_v24  ;;  %v1652_v18 = vrot.slane %v4238_v26, 6  ;;  %v3135_v59 = vld [vmem:[%s6445_s1 + $0x730] sm:$0xff] }
  0xce   : > { %4122 = vmatpush3.bf16.msra.mxu1 %v4121_v2  ;;  %4154 = vmatpush3.bf16.msra.mxu0 %v4153_v15  ;;  %v4129_v17 = vpack.c.bf16 %v3136_v57, %v3135_v59  ;;  %v4131_v2 = vpack.c.bf16 %v3154_v29, %v3153_v19  ;;  %v3170_v15 = vld [vmem:[%s6445_s1 + $0x848] sm:$0xff]  ;;  %v3172_v59 = vld [vmem:[%s6445_s1 + $0x858] sm:$0xff]  ;;  %v3157_v57 = vld [vmem:[%s6445_s1 + $0x7e0] sm:$0xff]  ;;  %v1661_v36 = vsel %vm1637_vm4, %v1656_v16, %v1660_v53  ;;  %v1664_v19 = vrot.slane %v5549_v23, 6 }
  0xcf   : > { %4124 = vmatprep.subr.bf16.mxu1 %v4123_v55  ;;  %4156 = vmatprep.subr.bf16.mxu0 %v4155_v46  ;;  %v1653_v51 = vsel %vm1637_vm4, %v1648_v61, %v1652_v18  ;;  %v3138_v61 = vld [vmem:[%s6445_s1 + $0x748] sm:$0xff]  ;;  %v3187_v55 = vld [vmem:[%s6445_s1 + $0x8d0] sm:$0xff]  ;;  %v3188_v46 = vld [vmem:[%s6445_s1 + $0x8d8] sm:$0xff]  ;;  %v1657_v30 = vsel %vm1637_vm4, %v1652_v18, %v1656_v16  ;;  %v1667_v29 = vsel %vm1637_vm4, %v1662_v31, %v1666_v43 }
  0xd0   : > { %1805 = vmatmul.mubr.f32.gmra.mrb[78].mxu1 %v5341_v35  ;;  %2023 = vmatmul.mubr.f32.gmra.mrb[80].mxu0 %v5844_v11  ;;  %v5885_v35 = vld [vmem:[%s4423_s11 + $0x60] sm:$0xff]  ;;  %v4133_v26 = vpack.c.bf16 %v3138_v61, %v3137_v5  ;;  %v3140_v18 = vld [vmem:[%s6445_s1 + $0x758] sm:$0xff]  ;;  %v3142_v16 = vld [vmem:[%s6445_s1 + $0x768] sm:$0xff] }
  0xd1   : > { %1809 = vmatprep.mubr.f32.mxu1 %v1655_v28  ;;  %2027 = vmatprep.mubr.f32.mxu0 %v5851_v10  ;;  %v4165_v28 = vpack.c.bf16 %v3170_v15, %v3169_v1  ;;  %v4137_v0 = vpack.c.bf16 %v3140_v18, %v3139_v49  ;;  %v3174_v31 = vld [vmem:[%s6445_s1 + $0x868] sm:$0xff]  ;;  %v3191_v5 = vld [vmem:[%s6445_s1 + $0x8f0] sm:$0xff]  ;;  %v3192_v61 = vld [vmem:[%s6445_s1 + $0x8f8] sm:$0xff]  ;;  %v1674_v1 = vrot.slane %v5594_v42, 6  ;;  %v4141_v15 = vpack.c.bf16 %v3142_v16, %v3141_v3 }
  0xd2   : > { %4126 = vmatpush3.bf16.msra.mxu1 %v4125_v22  ;;  %4158 = vmatpush3.bf16.msra.mxu0 %v4157_v21  ;;  %v4135_v22 = vpack.c.bf16 %v3156_v63, %v3155_v54  ;;  %v4167_v21 = vpack.c.bf16 %v3188_v46, %v3187_v55  ;;  %v4173_v54 = vpack.c.bf16 %v3174_v31, %v3173_v52  ;;  %v3143_v63 = vld [vmem:[%s6445_s1 + $0x770] sm:$0xff]  ;;  %v6047_v16 = vld [vmem:[%s4423_s11 + $0x118] sm:$0xff] }
  0xd3   : > { %4128 = vmatprep.subr.bf16.mxu1 %v4127_v58  ;;  %4160 = vmatprep.subr.bf16.mxu0 %v4159_v27  ;;  %v3158_v58 = vld [vmem:[%s6445_s1 + $0x7e8] sm:$0xff]  ;;  %v3189_v27 = vld [vmem:[%s6445_s1 + $0x8e0] sm:$0xff]  ;;  %v4175_v46 = vpack.c.bf16 %v3192_v61, %v3191_v5  ;;  %v2201_v5 = vrot.slane %v5808_v25, 1 }
  0xd4   : > { %1810 = vmatmul.mubr.f32.gmra.mrb[80].mxu1 %v1653_v51  ;;  %2028 = vmatmul.mubr.f32.gmra.mrb[82].mxu0 %v5885_v35  ;;  %v4169_v51 = vpack.c.bf16 %v3172_v59, %v3171_v6  ;;  %v1686_v6 = vrot.slane %v5688_v41, 6 }
  0xd5   : > { %1814 = vmatprep.mubr.f32.mxu1 %v1659_v32  ;;  %2032 = vmatprep.mubr.f32.mxu0 %v5890_v8  ;;  %v4171_v32 = vpack.c.bf16 %v3190_v60, %v3189_v27  ;;  %v1694_v27 = vrot.slane %v5716_v56, 6  ;;  %v1599_v60 = vld [vmem:[%s4423_s11 + $0x108] sm:$0x3f] }
  0xd6   : > { %4130 = vmatpush3.bf16.msra.mxu1 %v4129_v17  ;;  %4162 = vmatpush3.bf16.msra.mxu0 %v4161_v40  ;;  %v3159_v17 = vld [vmem:[%s6445_s1 + $0x7f0] sm:$0xff]  ;;  %v3160_v40 = vld [vmem:[%s6445_s1 + $0x7f8] sm:$0xff] }
  0xd7   : > { %4132 = vmatprep.subr.bf16.mxu1 %v4131_v2  ;;  %4164 = vmatprep.subr.bf16.mxu0 %v4163_v44  ;;  %v1665_v2 = vsel %vm1637_vm4, %v1660_v53, %v1664_v19  ;;  %v1668_v44 = vrot.slane %v5589_v14, 6  ;;  %v4143_v55 = vpack.c.bf16 %v3160_v40, %v3159_v17  ;;  %v2103_v17 = vld [vmem:[%s4423_s11 + $0x30] sm:$0xfe] }
  0xd8   : > { %1815 = vmatmul.mubr.f32.gmra.mrb[82].mxu1 %v1657_v30  ;;  %2033 = vmatmul.mubr.f32.gmra.mrb[84].mxu0 %v5921_v13  ;;  %v3175_v30 = vld [vmem:[%s6445_s1 + $0x870] sm:$0xff] }
  0xd9   : > { %1819 = vmatprep.mubr.f32.mxu1 %v1663_v47  ;;  %2037 = vmatprep.mubr.f32.mxu0 %v5514_v20  ;;  %v4139_v20 = vpack.c.bf16 %v3158_v58, %v3157_v57  ;;  %v1669_v53 = vsel %vm1637_vm4, %v1664_v19, %v1668_v44  ;;  %v1672_v47 = vrot.slane %v5629_v50, 6  ;;  %v4177_v49 = vpack.c.bf16 %v3176_v4, %v3175_v30  ;;  %v6035_v19 = vld [vmem:[%s4423_s11 + $0x108] sm:$0xff]  ;;  %v2447_v40 = vld [vmem:[%s4423_s11 + $0x30] sm:$0xfc] }
  0xda   : > { %4134 = vmatpush3.bf16.msra.mxu1 %v4133_v26  ;;  %4166 = vmatpush3.bf16.msra.mxu0 %v4165_v28  ;;  %v1678_v26 = vrot.slane %v5634_v37, 6 }
  0xdb   : > { %4136 = vmatprep.subr.bf16.mxu1 %v4135_v22  ;;  %4168 = vmatprep.subr.bf16.mxu0 %v4167_v21  ;;  %v1682_v22 = vrot.slane %v5674_v34, 6 }
  0xdc   : > { %1820 = vmatmul.mubr.f32.gmra.mrb[84].mxu1 %v1661_v36  ;;  %2038 = vmatmul.mubr.f32.gmra.mrb[86].mxu0 %v5549_v23  ;;  %v1671_v23 = vsel %vm1637_vm4, %v1666_v43, %v1670_v12  ;;  %v1675_v43 = vsel %vm1637_vm4, %v1670_v12, %v1674_v1  ;;  %v1679_v18 = vsel %vm1637_vm4, %v1674_v1, %v1678_v26  ;;  %v1598_v12 = vld [vmem:[%s4423_s11 + $0x100] sm:$0x3f] }
  0xdd   : > { %1824 = vmatprep.mubr.f32.mxu1 %v1667_v29  ;;  %2042 = vmatprep.mubr.f32.mxu0 %v5554_v39  ;;  %v3144_v39 = vld [vmem:[%s6445_s1 + $0x778] sm:$0xff]  ;;  %v1687_v57 = vsel %vm1637_vm4, %v1682_v22, %v1686_v6  ;;  %v1698_v29 = vrot.slane %v1599_v60, 6  ;;  %v1696_v3 = vrot.slane %v1598_v12, 6  ;;  %v2113_v60 = vld [vmem:[%s4423_s11 + $0x80] sm:$0xff] }
  0xde   : > { %4138 = vmatpush3.bf16.msra.mxu1 %v4137_v0  ;;  %4170 = vmatpush3.bf16.msra.mxu0 %v4169_v51  ;;  %v4145_v28 = vpack.c.bf16 %v3144_v39, %v3143_v63  ;;  %v2104_v0 = vld [vmem:[%s4423_s11 + $0x38] sm:$0xfe]  ;;  %v2496_v63 = vrot.slane %v5812_v24, 2 }
  0xdf   : > { %4140 = vmatprep.subr.bf16.mxu1 %v4139_v20  ;;  %4172 = vmatprep.subr.bf16.mxu0 %v4171_v32  ;;  %v2448_v51 = vld [vmem:[%s4423_s11 + $0x38] sm:$0xfc]  ;;  %v2204_v20 = vrot.slane %v5780_v9, 1  ;;  %v2492_v32 = vrot.slane %v5780_v9, 2  ;;  %v1699_v52 = vsel %vm1637_vm4, %v1694_v27, %v1698_v29  ;;  %v2203_v31 = vrot.slane %v2104_v0, 1 }
  0xe0   : > { %1825 = vmatmul.mubr.f32.gmra.mrb[86].mxu1 %v1665_v2  ;;  %2043 = vmatmul.mubr.f32.gmra.mrb[88].mxu0 %v5589_v14  ;;  %v1673_v14 = vsel %vm1637_vm4, %v1668_v44, %v1672_v47  ;;  %v6059_v2 = vld [vmem:[%s4423_s11 + $0x110] sm:$0xff]  ;;  %v2200_v44 = vrot.slane %v2103_v17, 1  ;;  %v2488_v9 = vrot.slane %v2447_v40, 2  ;;  %v2506_v17 = vrot.slane %v2113_v60, 2 }
  0xe1   : > { %1829 = vmatprep.mubr.f32.mxu1 %v1671_v23  ;;  %2047 = vmatprep.mubr.f32.mxu0 %v5594_v42  ;;  %v1676_v42 = vrot.slane %v5670_v62, 6  ;;  %v2489_v23 = vrot.slane %v5808_v25, 2  ;;  %v2205_v1 = vsel %vm300_vm0, %v2203_v31, %v2204_v20  ;;  %v2494_v25 = vrot.slane %v5844_v11, 2 }
  0xe2   : > { %4142 = vmatpush3.bf16.msra.mxu1 %v4141_v15  ;;  %4174 = vmatpush3.bf16.msra.mxu0 %v4173_v54  ;;  %v2208_v54 = vrot.slane %v5812_v24, 1  ;;  %v2202_v39 = vsel %vm300_vm0, %v2200_v44, %v2201_v5  ;;  %v2497_v4 = vsel %vm714_vm3, %v2492_v32, %v2496_v63  ;;  %v2500_v24 = vrot.slane %v5851_v10, 2 }
  0xe3   : > { %4144 = vmatprep.subr.bf16.mxu1 %v4143_v55  ;;  %4176 = vmatprep.subr.bf16.mxu0 %v4175_v46  ;;  %v1677_v21 = vsel %vm1637_vm4, %v1672_v47, %v1676_v42  ;;  %v2206_v55 = vrot.slane %v5844_v11, 1  ;;  %v2490_v46 = vsel %vm714_vm3, %v2488_v9, %v2489_v23 }
  0xe4   : > { %1830 = vmatmul.mubr.f32.gmra.mrb[88].mxu1 %v1669_v53  ;;  %2048 = vmatmul.mubr.f32.gmra.mrb[90].mxu0 %v5629_v50  ;;  %v1680_v50 = vrot.slane %v5684_v48, 6  ;;  %v2209_v30 = vsel %vm300_vm0, %v2204_v20, %v2208_v54  ;;  %v2212_v53 = vrot.slane %v5851_v10, 1  ;;  %v2498_v10 = vrot.slane %v5885_v35, 2 }
  0xe5   : > { %1834 = vmatprep.mubr.f32.mxu1 %v1675_v43  ;;  %2052 = vmatprep.mubr.f32.mxu0 %v5634_v37  ;;  %v1683_v37 = vsel %vm1637_vm4, %v1678_v26, %v1682_v22 }
  0xe6   : > { %4146 = vmatpush3.bf16.msra.mxu1 %v4145_v28  ;;  %4178 = vmatpush3.bf16.msra.mxu0 %v4177_v49  ;;  %v1681_v59 = vsel %vm1637_vm4, %v1676_v42, %v1680_v50  ;;  %v2207_v49 = vsel %vm300_vm0, %v2201_v5, %v2206_v55  ;;  %v2213_v22 = vsel %vm300_vm0, %v2208_v54, %v2212_v53 }
  0xe8   : > { %1835 = vmatmul.mubr.f32.gmra.mrb[90].mxu1 %v1673_v14  ;;  %2053 = vmatmul.mubr.f32.gmra.mrb[92].mxu0 %v5670_v62  ;;  %v1684_v62 = vrot.slane %v5698_v7, 6  ;;  %v2210_v14 = vrot.slane %v5885_v35, 1  ;;  %v2214_v35 = vrot.slane %v5921_v13, 1 }
  0xe9   : > { %1839 = vmatprep.mubr.f32.mxu1 %v1679_v18  ;;  %2057 = vmatprep.mubr.f32.mxu0 %v5674_v34  ;;  %v1690_v34 = vrot.slane %v5702_v38, 6  ;;  %v2495_v18 = vsel %vm714_vm3, %v2489_v23, %v2494_v25 }
  0xea   : > { %v1685_v58 = vsel %vm1637_vm4, %v1680_v50, %v1684_v62  ;;  %v2216_v50 = vrot.slane %v5890_v8, 1  ;;  %v2215_v20 = vsel %vm300_vm0, %v2210_v14, %v2214_v35 }
  0xeb   : > { %v1695_v36 = vsel %vm1637_vm4, %v1690_v34, %v1694_v27  ;;  %v2502_v27 = vrot.slane %v5921_v13, 2 }
  0xec   : > { %1840 = vmatmul.mubr.f32.gmra.mrb[92].mxu1 %v1677_v21  ;;  %2058 = vmatmul.mubr.f32.gmra.mrb[94].mxu0 %v5684_v48  ;;  %v1688_v48 = vrot.slane %v5712_v33, 6  ;;  %v2501_v21 = vsel %vm714_vm3, %v2496_v63, %v2500_v24 }
  0xed   : > { %1844 = vmatprep.mubr.f32.mxu1 %v1683_v37  ;;  %2062 = vmatprep.mubr.f32.mxu0 %v5688_v41  ;;  %v1691_v41 = vsel %vm1637_vm4, %v1686_v6, %v1690_v34  ;;  %v2504_v37 = vrot.slane %v5890_v8, 2  ;;  %v2499_v8 = vsel %vm714_vm3, %v2494_v25, %v2498_v10  ;;  %v2503_v31 = vsel %vm714_vm3, %v2498_v10, %v2502_v27 }
  0xee   : > { %v2507_v25 = vsel %vm714_vm3, %v2502_v27, %v2506_v17  ;;  %v2122_v27 = vld [vmem:[%s4423_s11 + $0xc8] sm:$0xff] }
  0xf0   : > { %1845 = vmatmul.mubr.f32.gmra.mrb[94].mxu1 %v1681_v59  ;;  %2063 = vmatmul.mubr.f32.gmra.mrb[96].mxu0 %v5698_v7  ;;  %v1689_v7 = vsel %vm1637_vm4, %v1684_v62, %v1688_v48  ;;  %v2114_v62 = vld [vmem:[%s4423_s11 + $0x88] sm:$0xff] }
  0xf1   : > { %1849 = vmatprep.mubr.f32.mxu1 %v1687_v57  ;;  %2067 = vmatprep.mubr.f32.mxu0 %v5702_v38  ;;  %v1692_v38 = vrot.slane %v5726_v45, 6  ;;  %v2508_v29 = vrot.slane %v2114_v62, 2 }
  0xf3   : > { %v1697_v61 = vsel %vm1637_vm4, %v1692_v38, %v1696_v3  ;;  %v2509_v5 = vsel %vm714_vm3, %v2504_v37, %v2508_v29 }
  0xf4   : > { %1850 = vmatmul.mubr.f32.gmra.mrb[96].mxu1 %v1685_v58  ;;  %2068 = vmatmul.mubr.f32.gmra.mrb[98].mxu0 %v5712_v33  ;;  %v1693_v33 = vsel %vm1637_vm4, %v1688_v48, %v1692_v38  ;;  %v2211_v58 = vsel %vm300_vm0, %v2206_v55, %v2210_v14  ;;  %v2505_v38 = vsel %vm714_vm3, %v2500_v24, %v2504_v37 }
  0xf5   : > { %1854 = vmatprep.mubr.f32.mxu1 %v1691_v41  ;;  %2072 = vmatprep.mubr.f32.mxu0 %v5716_v56  ;;  %v6044_v56 = vld [vmem:[%s4423_s11 + $0x100] sm:$0xff] }
  0xf8   : > { %1855 = vmatmul.mubr.f32.gmra.mrb[98].mxu1 %v1689_v7  ;;  %2073 = vmatmul.mubr.f32.gmra.mrb[100].mxu0 %v5726_v45  ;;  %v2491_v45 = vrot.slane %v2448_v51, 2  ;;  %v2217_v7 = vsel %vm300_vm0, %v2212_v53, %v2216_v50  ;;  %v2116_v51 = vld [vmem:[%s4423_s11 + $0x98] sm:$0xff] }
  0xf9   : > { %1859 = vmatprep.mubr.f32.mxu1 %v1695_v36  ;;  %2077 = vmatprep.mubr.f32.mxu0 %v6035_v19  ;;  %v2220_v36 = vrot.slane %v2114_v62, 1  ;;  %v2512_v44 = vrot.slane %v2116_v51, 2 }
  0xfa   : > { %v2493_v15 = vsel %vm714_vm3, %v2491_v45, %v2492_v32  ;;  %v2218_v32 = vrot.slane %v2113_v60, 1  ;;  %v2115_v45 = vld [vmem:[%s4423_s11 + $0x90] sm:$0xff] }
  0xfb   : > { %v2221_v40 = vsel %vm300_vm0, %v2216_v50, %v2220_v36  ;;  %v2222_v55 = vrot.slane %v2115_v45, 1  ;;  %v2513_v24 = vsel %vm714_vm3, %v2508_v29, %v2512_v44 }
  0xfc   : > { %1860 = vmatmul.mubr.f32.gmra.mrb[100].mxu1 %v1693_v33  ;;  %2078 = vmatmul.mubr.f32.gmra.mrb[102].mxu0 %v6044_v56  ;;  %v2219_v63 = vsel %vm300_vm0, %v2214_v35, %v2218_v32 }
  0xfd   : > { %1864 = vmatprep.mubr.f32.mxu1 %v1699_v52  ;;  %2082 = vmatprep.mubr.f32.mxu0 %v6047_v16  ;;  %v2223_v10 = vsel %vm300_vm0, %v2218_v32, %v2222_v55  ;;  %v2121_v32 = vld [vmem:[%s4423_s11 + $0xc0] sm:$0xff] }
 0x100   : > { %1865 = vmatmul.mubr.f32.gmra.mrb[102].mxu1 %v1697_v61  ;;  %2083 = vmatmul.mubr.f32.gmra.mrb[104].mxu0 %v6059_v2  ;;  %v2224_v61 = vrot.slane %v2116_v51, 1 }
 0x101   : > { %2356 = vmatprep.mubr.f32.mxu1 %v2205_v1  ;;  %2644 = vmatprep.mubr.f32.mxu0 %v2493_v15  ;;  %v2118_v1 = vld [vmem:[%s4423_s11 + $0xa8] sm:$0xff] }
 0x102   : > { %v2225_v53 = vsel %vm300_vm0, %v2220_v36, %v2224_v61 }
 0x103   : > { %v3254_v47 = vpop.f32.mrb[0].mxu1  ;;  %v3230_v43 = vpop.f32.mrb[0].mxu0 }
 0x104   : > { %v3255_v26 = vpop.f32.mrb[1].mxu1  ;;  %2357 = vmatmul.mubr.f32.vlgmr.msra.gmra.mrb[104].mxu1 %v2202_v39  ;;  %v3231_v28 = vpop.f32.mrb[1].mxu0  ;;  %2645 = vmatmul.mubr.f32.vlgmr.msra.gmra.mrb[106].mxu0 %v2490_v46 }
 0x105   : > { %v6077_v11 = vadd.f32 %v3255_v26, %v3254_v47  ;;  %v6079_v42 = vadd.f32 %v3231_v28, %v3230_v43  ;;  %2361 = vmatprep.mubr.f32.mxu1 %v2209_v30  ;;  %2649 = vmatprep.mubr.f32.mxu0 %v2497_v4  ;;  %v2510_v30 = vrot.slane %v2115_v45, 2  ;;  %v2117_v4 = vld [vmem:[%s4423_s11 + $0xa0] sm:$0xff]  ;;  %v2228_v47 = vrot.slane %v2118_v1, 1 }
 0x106   : > { %v2516_v43 = vrot.slane %v2118_v1, 2 }
 0x107   : > { %v3233_v6 = vpop.f32.mrb[2].mxu0  ;;  %v3257_v59 = vpop.f32.mrb[2].mxu1  ;;  %v2511_v37 = vsel %vm714_vm3, %v2506_v17, %v2510_v30  ;;  %v2229_v62 = vsel %vm300_vm0, %v2224_v61, %v2228_v47 }
 0x108   : > { %2362 = vmatmul.mubr.f32.gmra.mrb[106].mxu1 %v2207_v49  ;;  %v3234_v57 = vpop.f32.mrb[3].mxu0  ;;  %2650 = vmatmul.mubr.f32.gmra.mrb[108].mxu0 %v2495_v18  ;;  %v3258_v34 = vpop.f32.mrb[3].mxu1  ;;  %v2120_v49 = vld [vmem:[%s4423_s11 + $0xb8] sm:$0xff] }
 0x109   : > { %v6090_v48 = vadd.f32 %v3234_v57, %v3233_v6  ;;  %2366 = vmatprep.mubr.f32.mxu1 %v2213_v22  ;;  %v6092_v41 = vadd.f32 %v3258_v34, %v3257_v59  ;;  %2654 = vmatprep.mubr.f32.mxu0 %v2501_v21  ;;  %v2226_v22 = vrot.slane %v2117_v4, 1  ;;  %v2514_v6 = vrot.slane %v2117_v4, 2  ;;  %v2119_v59 = vld [vmem:[%s4423_s11 + $0xb0] sm:$0xff] }
 0x10a   : > { %v2517_v57 = vsel %vm714_vm3, %v2512_v44, %v2516_v43  ;;  %v2232_v34 = vrot.slane %v2120_v49, 1  ;;  %v2230_v36 = vrot.slane %v2119_v59, 1  ;;  %v2518_v29 = vrot.slane %v2119_v59, 2 }
 0x10b   : > { %v3236_v12 = vpop.f32.mrb[4].mxu0  ;;  %v3260_v0 = vpop.f32.mrb[4].mxu1  ;;  %v2515_v51 = vsel %vm714_vm3, %v2510_v30, %v2514_v6 }
 0x10c   : > { %2367 = vmatmul.mubr.f32.gmra.mrb[108].mxu1 %v2211_v58  ;;  %v3237_v33 = vpop.f32.mrb[5].mxu0  ;;  %2655 = vmatmul.mubr.f32.gmra.mrb[110].mxu0 %v2499_v8  ;;  %v3261_v3 = vpop.f32.mrb[5].mxu1  ;;  %v2520_v58 = vrot.slane %v2120_v49, 2  ;;  %v2231_v44 = vsel %vm300_vm0, %v2226_v22, %v2230_v36 }
 0x10d   : > { %v6101_v13 = vadd.f32 %v3237_v33, %v3236_v12  ;;  %2371 = vmatprep.mubr.f32.mxu1 %v2217_v7  ;;  %v6103_v52 = vadd.f32 %v3261_v3, %v3260_v0  ;;  %2659 = vmatprep.mubr.f32.mxu0 %v2505_v38  ;;  %v2227_v38 = vsel %vm300_vm0, %v2222_v55, %v2226_v22 }
 0x10e   : > { %v2233_v33 = vsel %vm300_vm0, %v2228_v47, %v2232_v34  ;;  %v2521_v3 = vsel %vm714_vm3, %v2516_v43, %v2520_v58 }
 0x10f   : > { %v3239_v9 = vpop.f32.mrb[6].mxu0  ;;  %v3263_v23 = vpop.f32.mrb[6].mxu1 }
 0x110   : > { %2372 = vmatmul.mubr.f32.gmra.mrb[110].mxu1 %v2215_v20  ;;  %v3240_v15 = vpop.f32.mrb[7].mxu0  ;;  %2660 = vmatmul.mubr.f32.gmra.mrb[112].mxu0 %v2503_v31  ;;  %v3264_v54 = vpop.f32.mrb[7].mxu1  ;;  %v2236_v20 = vrot.slane %v2122_v27, 1  ;;  %v2524_v31 = vrot.slane %v2122_v27, 2 }
 0x111   : > { %v6111_v39 = vadd.f32 %v3240_v15, %v3239_v9  ;;  %2376 = vmatprep.mubr.f32.mxu1 %v2221_v40  ;;  %v6113_v46 = vadd.f32 %v3264_v54, %v3263_v23  ;;  %2664 = vmatprep.mubr.f32.mxu0 %v2509_v5  ;;  %v2124_v40 = vld [vmem:[%s4423_s11 + $0xd8] sm:$0xff]  ;;  %v2519_v9 = vsel %vm714_vm3, %v2514_v6, %v2518_v29  ;;  %v2234_v15 = vrot.slane %v2121_v32, 1 }
 0x112   : > { %v2522_v54 = vrot.slane %v2121_v32, 2  ;;  %v2237_v55 = vsel %vm300_vm0, %v2232_v34, %v2236_v20  ;;  %v2240_v30 = vrot.slane %v2124_v40, 1  ;;  %v2528_v4 = vrot.slane %v2124_v40, 2 }
 0x113   : > { %v3242_v26 = vpop.f32.mrb[8].mxu0  ;;  %v3266_v28 = vpop.f32.mrb[8].mxu1 }
 0x114   : > { %2377 = vmatmul.mubr.f32.gmra.mrb[112].mxu1 %v2219_v63  ;;  %v3243_v14 = vpop.f32.mrb[9].mxu0  ;;  %2665 = vmatmul.mubr.f32.gmra.mrb[114].mxu0 %v2507_v25  ;;  %v3267_v18 = vpop.f32.mrb[9].mxu1  ;;  %v2123_v63 = vld [vmem:[%s4423_s11 + $0xd0] sm:$0xff]  ;;  %v2525_v25 = vsel %vm714_vm3, %v2520_v58, %v2524_v31  ;;  %v2523_v49 = vsel %vm714_vm3, %v2518_v29, %v2522_v54  ;;  %v2529_v22 = vsel %vm714_vm3, %v2524_v31, %v2528_v4 }
 0x115   : > { %v6121_v21 = vadd.f32 %v3243_v14, %v3242_v26  ;;  %2381 = vmatprep.mubr.f32.mxu1 %v2225_v53  ;;  %v6123_v50 = vadd.f32 %v3267_v18, %v3266_v28  ;;  %2669 = vmatprep.mubr.f32.mxu0 %v2513_v24  ;;  %v2126_v24 = vld [vmem:[%s4423_s11 + $0xe8] sm:$0xff]  ;;  %v2238_v43 = vrot.slane %v2123_v63, 1  ;;  %v2235_v28 = vsel %vm300_vm0, %v2230_v36, %v2234_v15  ;;  %v2125_v18 = vld [vmem:[%s4423_s11 + $0xe0] sm:$0xff]  ;;  %v2127_v36 = vld [vmem:[%s4423_s11 + $0xf0] sm:$0xff] }
 0x116   : > { %v2526_v14 = vrot.slane %v2123_v63, 2  ;;  %v2532_v6 = vrot.slane %v2126_v24, 2  ;;  %v2530_v27 = vrot.slane %v2125_v18, 2 }
 0x117   : > { %v3245_v35 = vpop.f32.mrb[10].mxu0  ;;  %v3269_v8 = vpop.f32.mrb[10].mxu1 }
 0x118   : > { %2382 = vmatmul.mubr.f32.gmra.mrb[114].mxu1 %v2223_v10  ;;  %v3246_v60 = vpop.f32.mrb[11].mxu0  ;;  %2670 = vmatmul.mubr.f32.gmra.mrb[116].mxu0 %v2511_v37  ;;  %v3270_v7 = vpop.f32.mrb[11].mxu1  ;;  %v2241_v10 = vsel %vm300_vm0, %v2236_v20, %v2240_v30  ;;  %v2244_v37 = vrot.slane %v2126_v24, 1 }
 0x119   : > { %v6131_v12 = vadd.f32 %v3246_v60, %v3245_v35  ;;  %2386 = vmatprep.mubr.f32.mxu1 %v2229_v62  ;;  %v6133_v0 = vadd.f32 %v3270_v7, %v3269_v8  ;;  %2674 = vmatprep.mubr.f32.mxu0 %v2517_v57  ;;  %v2128_v57 = vld [vmem:[%s4423_s11 + $0xf8] sm:$0xff]  ;;  %v2239_v35 = vsel %vm300_vm0, %v2234_v15, %v2238_v43  ;;  %v2242_v8 = vrot.slane %v2125_v18, 1 }
 0x11a   : > { %v2245_v29 = vsel %vm300_vm0, %v2240_v30, %v2244_v37 }
 0x11b   : > { %v3248_v17 = vpop.f32.mrb[12].mxu0  ;;  %v3272_v45 = vpop.f32.mrb[12].mxu1  ;;  %v2243_v40 = vsel %vm300_vm0, %v2238_v43, %v2242_v8 }
 0x11c   : > { %2387 = vmatmul.mubr.f32.gmra.mrb[116].mxu1 %v2227_v38  ;;  %v3249_v5 = vpop.f32.mrb[13].mxu0  ;;  %2675 = vmatmul.mubr.f32.gmra.mrb[118].mxu0 %v2515_v51  ;;  %v3273_v61 = vpop.f32.mrb[13].mxu1  ;;  %v2527_v38 = vsel %vm714_vm3, %v2522_v54, %v2526_v14  ;;  %v2533_v51 = vsel %vm714_vm3, %v2528_v4, %v2532_v6 }
 0x11d   : > { %v6142_v23 = vadd.f32 %v3249_v5, %v3248_v17  ;;  %2391 = vmatprep.mubr.f32.mxu1 %v2233_v33  ;;  %v6144_v1 = vadd.f32 %v3273_v61, %v3272_v45  ;;  %2679 = vmatprep.mubr.f32.mxu0 %v2521_v3  ;;  %v2248_v33 = vrot.slane %v2128_v57, 1  ;;  %v2536_v3 = vrot.slane %v2128_v57, 2 }
 0x11e   : > { %v2531_v5 = vsel %vm714_vm3, %v2526_v14, %v2530_v27  ;;  %v2246_v61 = vrot.slane %v2127_v36, 1  ;;  %v2538_v14 = vrot.slane %v6044_v56, 2 }
 0x11f   : > { %v3251_v53 = vpop.f32.mrb[14].mxu0  ;;  %v2537_v63 = vsel %vm714_vm3, %v2532_v6, %v2536_v3  ;;  %v2544_v6 = vrot.slane %v6047_v16, 2 }
 0x120   : > { %2392 = vmatmul.mubr.f32.gmra.mrb[118].mxu1 %v2231_v44  ;;  %v3252_v47 = vpop.f32.mrb[15].mxu0  ;;  %2680 = vmatmul.mubr.f32.gmra.mrb[120].mxu0 %v2519_v9  ;;  %v2534_v44 = vrot.slane %v2127_v36, 2  ;;  %v2247_v43 = vsel %vm300_vm0, %v2242_v8, %v2246_v61  ;;  %v2133_v36 = vld [vmem:[%s4423_s11 + $0x120] sm:$0x1] }
 0x121   : > { %v6150_v26 = vadd.f32 %v3252_v47, %v3251_v53  ;;  %2396 = vmatprep.mubr.f32.mxu1 %v2237_v55  ;;  %2684 = vmatprep.mubr.f32.mxu0 %v2525_v25  ;;  %v2252_v55 = vrot.slane %v6035_v19, 1  ;;  %v2540_v25 = vrot.slane %v6035_v19, 2 }
 0x123   : > { %v3307_v59 = vpop.f32.mrb[14].mxu1  ;;  %v3384_v62 = vpop.f32.mrb[16].mxu0 }
 0x124   : > { %v3308_v34 = vpop.f32.mrb[15].mxu1  ;;  %2397 = vmatmul.mubr.f32.gmra.mrb[120].mxu1 %v2235_v28  ;;  %v3385_v58 = vpop.f32.mrb[17].mxu0  ;;  %2685 = vmatmul.mubr.f32.gmra.mrb[122].mxu0 %v2523_v49  ;;  %v2535_v28 = vsel %vm714_vm3, %v2530_v27, %v2534_v44  ;;  %v2250_v49 = vrot.slane %v6044_v56, 1  ;;  %v2134_v56 = vld [vmem:[%s4423_s11 + $0x128] sm:$0x1]  ;;  %v2539_v27 = vsel %vm714_vm3, %v2534_v44, %v2538_v14 }
 0x125   : > { %v3309_v60 = vadd.f32 %v3308_v34, %v3307_v59  ;;  %v3386_v7 = vadd.f32 %v3385_v58, %v3384_v62  ;;  %2401 = vmatprep.mubr.f32.mxu1 %v2241_v10  ;;  %2689 = vmatprep.mubr.f32.mxu0 %v2529_v22  ;;  %v2253_v10 = vsel %vm300_vm0, %v2248_v33, %v2252_v55  ;;  %v2450_v34 = vld [vmem:[%s4423_s11 + $0x128] sm:$0x3] }
 0x126   : > { %v2541_v22 = vsel %vm714_vm3, %v2536_v3, %v2540_v25  ;;  %v2251_v8 = vsel %vm300_vm0, %v2246_v61, %v2250_v49  ;;  %v2260_v3 = vrot.slane %v2134_v56, 1  ;;  %v2258_v61 = vrot.slane %v2133_v36, 1 }
 0x127   : > { %v600_v20 = vadd.f32 %v3309_v60, %v6079_v42  ;;  %v3310_v32 = vpop.f32.mrb[16].mxu1  ;;  %v3387_v31 = vpop.f32.mrb[18].mxu0  ;;  %v2249_v42 = vsel %vm300_vm0, %v2244_v37, %v2248_v33  ;;  %v2256_v37 = vrot.slane %v6047_v16, 1  ;;  %v2254_v60 = vrot.slane %v6059_v2, 1 }
 0x128   : > { %v3311_v17 = vpop.f32.mrb[17].mxu1  ;;  %2402 = vmatmul.mubr.f32.gmra.mrb[122].mxu1 %v2239_v35  ;;  %v3388_v45 = vpop.f32.mrb[19].mxu0  ;;  %2690 = vmatmul.mubr.f32.gmra.mrb[124].mxu0 %v2527_v38  ;;  %v2542_v16 = vrot.slane %v6059_v2, 2  ;;  %v2545_v33 = vsel %vm714_vm3, %v2540_v25, %v2544_v6 }
 0x129   : > { %v6166_v9 = vadd.f32 %v3386_v7, %v600_v20  ;;  %v3312_v15 = vadd.f32 %v3311_v17, %v3310_v32  ;;  %v3389_v54 = vadd.f32 %v3388_v45, %v3387_v31  ;;  %2406 = vmatprep.mubr.f32.mxu1 %v2245_v29  ;;  %2694 = vmatprep.mubr.f32.mxu0 %v2533_v51  ;;  %v2449_v29 = vld [vmem:[%s4423_s11 + $0x120] sm:$0x3]  ;;  %v2548_v20 = vrot.slane %v2450_v34, 2 }
 0x12a   : > { %v2257_v51 = vsel %vm300_vm0, %v2252_v55, %v2256_v37  ;;  %v2546_v44 = vrot.slane %v2449_v29, 2 }
 0x12b   : > { %v605_v30 = vadd.f32 %v3312_v15, %v6090_v48  ;;  %v3313_v4 = vpop.f32.mrb[18].mxu1  ;;  %v3390_v53 = vpop.f32.mrb[20].mxu0 }
 0x12c   : > { %v3314_v24 = vpop.f32.mrb[19].mxu1  ;;  %2407 = vmatmul.mubr.f32.gmra.mrb[124].mxu1 %v2243_v40  ;;  %v3391_v47 = vpop.f32.mrb[21].mxu0  ;;  %2695 = vmatmul.mubr.f32.gmra.mrb[126].mxu0 %v2531_v5  ;;  %v2255_v40 = vsel %vm300_vm0, %v2250_v49, %v2254_v60  ;;  %v2543_v5 = vsel %vm714_vm3, %v2538_v14, %v2542_v16 }
 0x12d   : > { %v6177_v18 = vadd.f32 %v3389_v54, %v605_v30  ;;  %v3315_v19 = vadd.f32 %v3314_v24, %v3313_v4  ;;  %v3392_v48 = vadd.f32 %v3391_v47, %v3390_v53  ;;  %2411 = vmatprep.mubr.f32.mxu1 %v2249_v42  ;;  %2699 = vmatprep.mubr.f32.mxu0 %v2537_v63 }
 0x12e   : > { %v2549_v63 = vsel %vm714_vm3, %v2544_v6, %v2548_v20  ;;  %v2259_v24 = vsel %vm300_vm0, %v2254_v60, %v2258_v61  ;;  %v2547_v47 = vsel %vm714_vm3, %v2542_v16, %v2546_v44 }
 0x12f   : > { %v610_v59 = vadd.f32 %v3315_v19, %v6101_v13  ;;  %v3316_v62 = vpop.f32.mrb[20].mxu1  ;;  %v3393_v57 = vpop.f32.mrb[22].mxu0 }
 0x130   : > { %v3317_v58 = vpop.f32.mrb[21].mxu1  ;;  %2412 = vmatmul.mubr.f32.gmra.mrb[126].mxu1 %v2247_v43  ;;  %v3394_v35 = vpop.f32.mrb[23].mxu0  ;;  %2700 = vmatmul.mubr.f32.gmra.mrb[128].mxu0 %v2535_v28 }
 0x131   : > { %v6190_v7 = vadd.f32 %v3392_v48, %v610_v59  ;;  %v3318_v13 = vadd.f32 %v3317_v58, %v3316_v62  ;;  %v3395_v38 = vadd.f32 %v3394_v35, %v3393_v57  ;;  %2416 = vmatprep.mubr.f32.mxu1 %v2253_v10  ;;  %2704 = vmatprep.mubr.f32.mxu0 %v2541_v22 }
 0x133   : > { %v615_v32 = vadd.f32 %v3318_v13, %v6111_v39  ;;  %v3319_v31 = vpop.f32.mrb[22].mxu1  ;;  %v3396_v17 = vpop.f32.mrb[24].mxu0  ;;  %v2261_v39 = vsel %vm300_vm0, %v2256_v37, %v2260_v3 }
 0x134   : > { %v3320_v45 = vpop.f32.mrb[23].mxu1  ;;  %2417 = vmatmul.mubr.f32.gmra.mrb[128].mxu1 %v2251_v8  ;;  %v3397_v2 = vpop.f32.mrb[25].mxu0  ;;  %2705 = vmatmul.mubr.f32.gmra.mrb[130].mxu0 %v2539_v27 }
 0x135   : > { %v6199_v15 = vadd.f32 %v3395_v38, %v615_v32  ;;  %v3321_v54 = vadd.f32 %v3320_v45, %v3319_v31  ;;  %v3398_v42 = vadd.f32 %v3397_v2, %v3396_v17  ;;  %2421 = vmatprep.mubr.f32.mxu1 %v2257_v51  ;;  %2709 = vmatprep.mubr.f32.mxu0 %v2545_v33 }
 0x137   : > { %v620_v55 = vadd.f32 %v3321_v54, %v6121_v21  ;;  %v3322_v25 = vpop.f32.mrb[24].mxu1  ;;  %v3399_v30 = vpop.f32.mrb[26].mxu0 }
 0x138   : > { %v3323_v4 = vpop.f32.mrb[25].mxu1  ;;  %2422 = vmatmul.mubr.f32.gmra.mrb[130].mxu1 %v2255_v40  ;;  %v3400_v53 = vpop.f32.mrb[27].mxu0  ;;  %2710 = vmatmul.mubr.f32.gmra.mrb[132].mxu0 %v2543_v5 }
 0x139   : > { %v6206_v43 = vadd.f32 %v3398_v42, %v620_v55  ;;  %v3324_v28 = vadd.f32 %v3323_v4, %v3322_v25  ;;  %v3401_v49 = vadd.f32 %v3400_v53, %v3399_v30  ;;  %2426 = vmatprep.mubr.f32.mxu1 %v2261_v39  ;;  %2714 = vmatprep.mubr.f32.mxu0 %v2549_v63 }
 0x13b   : > { %v625_v14 = vadd.f32 %v3324_v28, %v6131_v12  ;;  %v3325_v19 = vpop.f32.mrb[26].mxu1  ;;  %v3402_v21 = vpop.f32.mrb[28].mxu0 }
 0x13c   : > { %v3326_v48 = vpop.f32.mrb[27].mxu1  ;;  %2427 = vmatmul.mubr.f32.gmra.mrb[132].mxu1 %v2259_v24  ;;  %v3403_v10 = vpop.f32.mrb[29].mxu0  ;;  %2715 = vmatmul.mubr.f32.gmra.mrb[134].mxu0 %v2547_v47 }
 0x13d   : > { %v6209_v22 = vadd.f32 %v3401_v49, %v625_v14  ;;  %v3327_v37 = vadd.f32 %v3326_v48, %v3325_v19  ;;  %v3404_v6 = vadd.f32 %v3403_v10, %v3402_v21 }
 0x13f   : > { %v630_v59 = vadd.f32 %v3327_v37, %v6142_v23  ;;  %v3328_v62 = vpop.f32.mrb[28].mxu1  ;;  %v3405_v57 = vpop.f32.mrb[30].mxu0 }
 0x140   : > { %v3329_v56 = vpop.f32.mrb[29].mxu1  ;;  %v3406_v34 = vpop.f32.mrb[31].mxu0 }
 0x141   : > { %v6212_v58 = vadd.f32 %v3404_v6, %v630_v59  ;;  %v3330_v35 = vadd.f32 %v3329_v56, %v3328_v62  ;;  %v3407_v12 = vadd.f32 %v3406_v34, %v3405_v57 }
 0x143   : > { %v635_v8 = vadd.f32 %v3330_v35, %v6150_v26  ;;  %v3331_v27 = vpop.f32.mrb[30].mxu1  ;;  %v3408_v60 = vpop.f32.mrb[32].mxu0 }
 0x144   : > { %v3332_v16 = vpop.f32.mrb[31].mxu1  ;;  %v3409_v13 = vpop.f32.mrb[33].mxu0 }
 0x145   : > { %v6215_v38 = vadd.f32 %v3407_v12, %v635_v8  ;;  %v3333_v36 = vadd.f32 %v3332_v16, %v3331_v27  ;;  %v3410_v29 = vadd.f32 %v3409_v13, %v3408_v60 }
 0x147   : > { %v640_v23 = vadd.f32 %v3333_v36, %v6077_v11  ;;  %v3334_v51 = vpop.f32.mrb[32].mxu1  ;;  %v3411_v33 = vpop.f32.mrb[34].mxu0 }
 0x148   : > { %v3335_v3 = vpop.f32.mrb[33].mxu1  ;;  %v3412_v20 = vpop.f32.mrb[35].mxu0 }
 0x149   : > { %v6218_v32 = vadd.f32 %v3410_v29, %v640_v23  ;;  %v3336_v31 = vadd.f32 %v3335_v3, %v3334_v51  ;;  %v3413_v17 = vadd.f32 %v3412_v20, %v3411_v33 }
 0x14b   : > { %v645_v26 = vadd.f32 %v3336_v31, %v6092_v41  ;;  %v3337_v45 = vpop.f32.mrb[34].mxu1  ;;  %v3414_v2 = vpop.f32.mrb[36].mxu0 }
 0x14c   : > { %v3338_v40 = vpop.f32.mrb[35].mxu1  ;;  %v3415_v5 = vpop.f32.mrb[37].mxu0 }
 0x14d   : > { %v6221_v61 = vadd.f32 %v3413_v17, %v645_v26  ;;  %v3339_v44 = vadd.f32 %v3338_v40, %v3337_v45  ;;  %v3416_v54 = vadd.f32 %v3415_v5, %v3414_v2 }
 0x14f   : > { %v650_v11 = vadd.f32 %v3339_v44, %v6103_v52  ;;  %v3340_v42 = vpop.f32.mrb[36].mxu1  ;;  %v3417_v39 = vpop.f32.mrb[38].mxu0 }
 0x150   : > { %v3341_v63 = vpop.f32.mrb[37].mxu1  ;;  %v3418_v55 = vpop.f32.mrb[39].mxu0 }
 0x151   : > { %v6224_v25 = vadd.f32 %v3416_v54, %v650_v11  ;;  %v3342_v30 = vadd.f32 %v3341_v63, %v3340_v42  ;;  %v3419_v4 = vadd.f32 %v3418_v55, %v3417_v39 }
 0x153   : > { %v655_v41 = vadd.f32 %v3342_v30, %v6113_v46  ;;  %v3343_v53 = vpop.f32.mrb[38].mxu1  ;;  %v3420_v24 = vpop.f32.mrb[40].mxu0 }
 0x154   : > { %v3344_v47 = vpop.f32.mrb[39].mxu1  ;;  %v3421_v28 = vpop.f32.mrb[41].mxu0 }
 0x155   : > { %v6227_v49 = vadd.f32 %v3419_v4, %v655_v41  ;;  %v3345_v14 = vadd.f32 %v3344_v47, %v3343_v53  ;;  %v3422_v19 = vadd.f32 %v3421_v28, %v3420_v24 }
 0x157   : > { %v660_v52 = vadd.f32 %v3345_v14, %v6123_v50  ;;  %v3346_v21 = vpop.f32.mrb[40].mxu1  ;;  %v3423_v48 = vpop.f32.mrb[42].mxu0 }
 0x158   : > { %v3347_v10 = vpop.f32.mrb[41].mxu1  ;;  %v3424_v37 = vpop.f32.mrb[43].mxu0 }
 0x159   : > { %v6230_v6 = vadd.f32 %v3422_v19, %v660_v52  ;;  %v3348_v59 = vadd.f32 %v3347_v10, %v3346_v21  ;;  %v3425_v62 = vadd.f32 %v3424_v37, %v3423_v48 }
 0x15b   : > { %v665_v46 = vadd.f32 %v3348_v59, %v6133_v0  ;;  %v3349_v57 = vpop.f32.mrb[42].mxu1  ;;  %v3426_v56 = vpop.f32.mrb[44].mxu0 }
 0x15c   : > { %v3350_v34 = vpop.f32.mrb[43].mxu1  ;;  %v3427_v35 = vpop.f32.mrb[45].mxu0 }
 0x15d   : > { %v6233_v12 = vadd.f32 %v3425_v62, %v665_v46  ;;  %v3351_v8 = vadd.f32 %v3350_v34, %v3349_v57  ;;  %v3428_v27 = vadd.f32 %v3427_v35, %v3426_v56 }
 0x15f   : > { %v670_v50 = vadd.f32 %v3351_v8, %v6144_v1  ;;  %v3461_v60 = vpop.f32.mrb[44].mxu1  ;;  %v3538_v16 = vpop.f32.mrb[46].mxu0 }
 0x160   : > { %v3462_v13 = vpop.f32.mrb[45].mxu1  ;;  %v3539_v36 = vpop.f32.mrb[47].mxu0 }
 0x161   : > { %v6236_v29 = vadd.f32 %v3428_v27, %v670_v50  ;;  %v3463_v23 = vadd.f32 %v3462_v13, %v3461_v60  ;;  %v3540_v51 = vadd.f32 %v3539_v36, %v3538_v16 }
 0x163   : > { %v1292_v0 = vadd.f32 %v3463_v23, %v6166_v9  ;;  %v3464_v33 = vpop.f32.mrb[46].mxu1  ;;  %v3541_v3 = vpop.f32.mrb[48].mxu0 }
 0x164   : > { %v3465_v20 = vpop.f32.mrb[47].mxu1  ;;  %v3542_v31 = vpop.f32.mrb[49].mxu0 }
 0x165   : > { %v6239_v17 = vadd.f32 %v3540_v51, %v1292_v0  ;;  %v3466_v26 = vadd.f32 %v3465_v20, %v3464_v33  ;;  %v3543_v45 = vadd.f32 %v3542_v31, %v3541_v3 }
 0x167   : > { %v1293_v1 = vadd.f32 %v3466_v26, %v6177_v18  ;;  %v3467_v2 = vpop.f32.mrb[48].mxu1  ;;  %v3544_v40 = vpop.f32.mrb[50].mxu0 }
 0x168   : > { %v3468_v5 = vpop.f32.mrb[49].mxu1  ;;  %v3545_v44 = vpop.f32.mrb[51].mxu0 }
 0x169   : > { %v6242_v54 = vadd.f32 %v3543_v45, %v1293_v1  ;;  %v3469_v11 = vadd.f32 %v3468_v5, %v3467_v2  ;;  %v3546_v42 = vadd.f32 %v3545_v44, %v3544_v40 }
 0x16b   : > { %v1294_v9 = vadd.f32 %v3469_v11, %v6190_v7  ;;  %v3470_v39 = vpop.f32.mrb[50].mxu1  ;;  %v3547_v63 = vpop.f32.mrb[52].mxu0 }
 0x16c   : > { %v3471_v55 = vpop.f32.mrb[51].mxu1  ;;  %v3548_v30 = vpop.f32.mrb[53].mxu0 }
 0x16d   : > { %v6245_v4 = vadd.f32 %v3546_v42, %v1294_v9  ;;  %v3472_v41 = vadd.f32 %v3471_v55, %v3470_v39  ;;  %v3549_v53 = vadd.f32 %v3548_v30, %v3547_v63 }
 0x16f   : > { %v1295_v18 = vadd.f32 %v3472_v41, %v6199_v15  ;;  %v3473_v24 = vpop.f32.mrb[52].mxu1  ;;  %v3550_v47 = vpop.f32.mrb[54].mxu0 }
 0x170   : > { %v3474_v28 = vpop.f32.mrb[53].mxu1  ;;  %v3551_v14 = vpop.f32.mrb[55].mxu0 }
 0x171   : > { %v6248_v19 = vadd.f32 %v3549_v53, %v1295_v18  ;;  %v3475_v52 = vadd.f32 %v3474_v28, %v3473_v24  ;;  %v3552_v21 = vadd.f32 %v3551_v14, %v3550_v47 }
 0x173   : > { %v1296_v7 = vadd.f32 %v3475_v52, %v6206_v43  ;;  %v3476_v48 = vpop.f32.mrb[54].mxu1  ;;  %v3553_v10 = vpop.f32.mrb[56].mxu0 }
 0x174   : > { %v3477_v37 = vpop.f32.mrb[55].mxu1  ;;  %v3554_v59 = vpop.f32.mrb[57].mxu0 }
 0x175   : > { %v6251_v62 = vadd.f32 %v3552_v21, %v1296_v7  ;;  %v3478_v46 = vadd.f32 %v3477_v37, %v3476_v48  ;;  %v3555_v57 = vadd.f32 %v3554_v59, %v3553_v10 }
 0x177   : > { %v1297_v15 = vadd.f32 %v3478_v46, %v6209_v22  ;;  %v3479_v56 = vpop.f32.mrb[56].mxu1  ;;  %v3556_v34 = vpop.f32.mrb[58].mxu0 }
 0x178   : > { %v3480_v35 = vpop.f32.mrb[57].mxu1  ;;  %v3557_v8 = vpop.f32.mrb[59].mxu0 }
 0x179   : > { %v6254_v27 = vadd.f32 %v3555_v57, %v1297_v15  ;;  %v3481_v50 = vadd.f32 %v3480_v35, %v3479_v56  ;;  %v3558_v60 = vadd.f32 %v3557_v8, %v3556_v34 }
 0x17b   : > { %v1298_v43 = vadd.f32 %v3481_v50, %v6212_v58  ;;  %v3482_v16 = vpop.f32.mrb[58].mxu1  ;;  %v3559_v13 = vpop.f32.mrb[60].mxu0 }
 0x17c   : > { %v3483_v36 = vpop.f32.mrb[59].mxu1  ;;  %v3560_v23 = vpop.f32.mrb[61].mxu0 }
 0x17d   : > { %v6257_v51 = vadd.f32 %v3558_v60, %v1298_v43  ;;  %v3484_v0 = vadd.f32 %v3483_v36, %v3482_v16  ;;  %v3561_v33 = vadd.f32 %v3560_v23, %v3559_v13 }
 0x17f   : > { %v1299_v22 = vadd.f32 %v3484_v0, %v6215_v38  ;;  %v3485_v3 = vpop.f32.mrb[60].mxu1  ;;  %v3562_v20 = vpop.f32.mrb[62].mxu0 }
 0x180   : > { %v3486_v31 = vpop.f32.mrb[61].mxu1  ;;  %v3563_v26 = vpop.f32.mrb[63].mxu0 }
 0x181   : > { %v6260_v45 = vadd.f32 %v3561_v33, %v1299_v22  ;;  %v3487_v1 = vadd.f32 %v3486_v31, %v3485_v3  ;;  %v3564_v2 = vadd.f32 %v3563_v26, %v3562_v20 }
 0x183   : > { %v1300_v58 = vadd.f32 %v3487_v1, %v6218_v32  ;;  %v3488_v40 = vpop.f32.mrb[62].mxu1  ;;  %v3565_v5 = vpop.f32.mrb[64].mxu0 }
 0x184   : > { %v3489_v44 = vpop.f32.mrb[63].mxu1  ;;  %v3566_v11 = vpop.f32.mrb[65].mxu0 }
 0x185   : > { %v6263_v42 = vadd.f32 %v3564_v2, %v1300_v58  ;;  %v3490_v9 = vadd.f32 %v3489_v44, %v3488_v40  ;;  %v3567_v39 = vadd.f32 %v3566_v11, %v3565_v5 }
 0x187   : > { %v1301_v38 = vadd.f32 %v3490_v9, %v6221_v61  ;;  %v3491_v63 = vpop.f32.mrb[64].mxu1  ;;  %v3568_v55 = vpop.f32.mrb[66].mxu0 }
 0x188   : > { %v3492_v30 = vpop.f32.mrb[65].mxu1  ;;  %v3569_v41 = vpop.f32.mrb[67].mxu0 }
 0x189   : > { %v6266_v53 = vadd.f32 %v3567_v39, %v1301_v38  ;;  %v3493_v18 = vadd.f32 %v3492_v30, %v3491_v63  ;;  %v3570_v24 = vadd.f32 %v3569_v41, %v3568_v55 }
 0x18b   : > { %v1302_v32 = vadd.f32 %v3493_v18, %v6224_v25  ;;  %v3494_v47 = vpop.f32.mrb[66].mxu1  ;;  %v3571_v28 = vpop.f32.mrb[68].mxu0 }
 0x18c   : > { %v3495_v14 = vpop.f32.mrb[67].mxu1  ;;  %v3572_v52 = vpop.f32.mrb[69].mxu0 }
 0x18d   : > { %v6269_v21 = vadd.f32 %v3570_v24, %v1302_v32  ;;  %v3496_v7 = vadd.f32 %v3495_v14, %v3494_v47  ;;  %v3573_v48 = vadd.f32 %v3572_v52, %v3571_v28 }
 0x18f   : > { %v1303_v61 = vadd.f32 %v3496_v7, %v6227_v49  ;;  %v3497_v10 = vpop.f32.mrb[68].mxu1  ;;  %v3574_v37 = vpop.f32.mrb[70].mxu0 }
 0x190   : > { %v3498_v59 = vpop.f32.mrb[69].mxu1  ;;  %v3575_v46 = vpop.f32.mrb[71].mxu0 }
 0x191   : > { %v6272_v57 = vadd.f32 %v3573_v48, %v1303_v61  ;;  %v3499_v15 = vadd.f32 %v3498_v59, %v3497_v10  ;;  %v3576_v56 = vadd.f32 %v3575_v46, %v3574_v37 }
 0x193   : > { %v1304_v25 = vadd.f32 %v3499_v15, %v6230_v6  ;;  %v3500_v34 = vpop.f32.mrb[70].mxu1  ;;  %v3577_v35 = vpop.f32.mrb[72].mxu0 }
 0x194   : > { %v3501_v8 = vpop.f32.mrb[71].mxu1  ;;  %v3578_v50 = vpop.f32.mrb[73].mxu0 }
 0x195   : > { %v6275_v60 = vadd.f32 %v3576_v56, %v1304_v25  ;;  %v3502_v43 = vadd.f32 %v3501_v8, %v3500_v34  ;;  %v3579_v16 = vadd.f32 %v3578_v50, %v3577_v35 }
 0x197   : > { %v1305_v49 = vadd.f32 %v3502_v43, %v6233_v12  ;;  %v3503_v13 = vpop.f32.mrb[72].mxu1  ;;  %v3580_v36 = vpop.f32.mrb[74].mxu0 }
 0x198   : > { %v3504_v23 = vpop.f32.mrb[73].mxu1  ;;  %v3581_v0 = vpop.f32.mrb[75].mxu0 }
 0x199   : > { %v6278_v33 = vadd.f32 %v3579_v16, %v1305_v49  ;;  %v3505_v22 = vadd.f32 %v3504_v23, %v3503_v13  ;;  %v3582_v3 = vadd.f32 %v3581_v0, %v3580_v36 }
 0x19b   : > { %v1306_v6 = vadd.f32 %v3505_v22, %v6236_v29  ;;  %v3615_v20 = vpop.f32.mrb[74].mxu1  ;;  %v3692_v31 = vpop.f32.mrb[76].mxu0 }
 0x19c   : > { %v3616_v26 = vpop.f32.mrb[75].mxu1  ;;  %v3693_v1 = vpop.f32.mrb[77].mxu0 }
 0x19d   : > { %v6281_v2 = vadd.f32 %v3582_v3, %v1306_v6  ;;  %v3617_v58 = vadd.f32 %v3616_v26, %v3615_v20  ;;  %v3694_v40 = vadd.f32 %v3693_v1, %v3692_v31 }
 0x19f   : > { %v1870_v12 = vadd.f32 %v3617_v58, %v6239_v17  ;;  %v3618_v5 = vpop.f32.mrb[76].mxu1  ;;  %v3695_v44 = vpop.f32.mrb[78].mxu0 }
 0x1a0   : > { %v3619_v11 = vpop.f32.mrb[77].mxu1  ;;  %v3696_v9 = vpop.f32.mrb[79].mxu0 }
 0x1a1   : > { %v6284_v39 = vadd.f32 %v3694_v40, %v1870_v12  ;;  %v3620_v38 = vadd.f32 %v3619_v11, %v3618_v5  ;;  %v3697_v63 = vadd.f32 %v3696_v9, %v3695_v44 }
 0x1a3   : > { %v1871_v29 = vadd.f32 %v3620_v38, %v6242_v54  ;;  %v3621_v55 = vpop.f32.mrb[78].mxu1  ;;  %v3698_v30 = vpop.f32.mrb[80].mxu0 }
 0x1a4   : > { %v3622_v41 = vpop.f32.mrb[79].mxu1  ;;  %v3699_v18 = vpop.f32.mrb[81].mxu0 }
 0x1a5   : > { %v6287_v24 = vadd.f32 %v3697_v63, %v1871_v29  ;;  %v3623_v32 = vadd.f32 %v3622_v41, %v3621_v55  ;;  %v3700_v47 = vadd.f32 %v3699_v18, %v3698_v30 }
 0x1a7   : > { %v1872_v17 = vadd.f32 %v3623_v32, %v6245_v4  ;;  %v3624_v28 = vpop.f32.mrb[80].mxu1  ;;  %v3701_v14 = vpop.f32.mrb[82].mxu0 }
 0x1a8   : > { %v3625_v52 = vpop.f32.mrb[81].mxu1  ;;  %v3702_v7 = vpop.f32.mrb[83].mxu0 }
 0x1a9   : > { %v6290_v48 = vadd.f32 %v3700_v47, %v1872_v17  ;;  %v3626_v61 = vadd.f32 %v3625_v52, %v3624_v28  ;;  %v3703_v10 = vadd.f32 %v3702_v7, %v3701_v14 }
 0x1ab   : > { %v1873_v54 = vadd.f32 %v3626_v61, %v6248_v19  ;;  %v3627_v37 = vpop.f32.mrb[82].mxu1  ;;  %v3704_v59 = vpop.f32.mrb[84].mxu0 }
 0x1ac   : > { %v3628_v46 = vpop.f32.mrb[83].mxu1  ;;  %v3705_v15 = vpop.f32.mrb[85].mxu0 }
 0x1ad   : > { %v6293_v56 = vadd.f32 %v3703_v10, %v1873_v54  ;;  %v3629_v25 = vadd.f32 %v3628_v46, %v3627_v37  ;;  %v3706_v34 = vadd.f32 %v3705_v15, %v3704_v59 }
 0x1af   : > { %v1874_v4 = vadd.f32 %v3629_v25, %v6251_v62  ;;  %v3630_v35 = vpop.f32.mrb[84].mxu1  ;;  %v3707_v8 = vpop.f32.mrb[86].mxu0 }
 0x1b0   : > { %v3631_v50 = vpop.f32.mrb[85].mxu1  ;;  %v3708_v43 = vpop.f32.mrb[87].mxu0 }
 0x1b1   : > { %v6296_v16 = vadd.f32 %v3706_v34, %v1874_v4  ;;  %v3632_v49 = vadd.f32 %v3631_v50, %v3630_v35  ;;  %v3709_v13 = vadd.f32 %v3708_v43, %v3707_v8 }
 0x1b3   : > { %v1875_v19 = vadd.f32 %v3632_v49, %v6254_v27  ;;  %v3633_v36 = vpop.f32.mrb[86].mxu1  ;;  %v3710_v23 = vpop.f32.mrb[88].mxu0 }
 0x1b4   : > { %v3634_v0 = vpop.f32.mrb[87].mxu1  ;;  %v3711_v22 = vpop.f32.mrb[89].mxu0 }
 0x1b5   : > { %v6299_v3 = vadd.f32 %v3709_v13, %v1875_v19  ;;  %v3635_v6 = vadd.f32 %v3634_v0, %v3633_v36  ;;  %v3712_v20 = vadd.f32 %v3711_v22, %v3710_v23 }
 0x1b7   : > { %v1876_v62 = vadd.f32 %v3635_v6, %v6257_v51  ;;  %v3636_v31 = vpop.f32.mrb[88].mxu1  ;;  %v3713_v26 = vpop.f32.mrb[90].mxu0 }
 0x1b8   : > { %v3637_v1 = vpop.f32.mrb[89].mxu1  ;;  %v3714_v58 = vpop.f32.mrb[91].mxu0 }
 0x1b9   : > { %v6302_v40 = vadd.f32 %v3712_v20, %v1876_v62  ;;  %v3638_v12 = vadd.f32 %v3637_v1, %v3636_v31  ;;  %v3715_v5 = vadd.f32 %v3714_v58, %v3713_v26 }
 0x1bb   : > { %v1877_v27 = vadd.f32 %v3638_v12, %v6260_v45  ;;  %v3639_v44 = vpop.f32.mrb[90].mxu1  ;;  %v3716_v11 = vpop.f32.mrb[92].mxu0 }
 0x1bc   : > { %v3640_v9 = vpop.f32.mrb[91].mxu1  ;;  %v3717_v38 = vpop.f32.mrb[93].mxu0 }
 0x1bd   : > { %v6305_v63 = vadd.f32 %v3715_v5, %v1877_v27  ;;  %v3641_v29 = vadd.f32 %v3640_v9, %v3639_v44  ;;  %v3718_v55 = vadd.f32 %v3717_v38, %v3716_v11 }
 0x1bf   : > { %v1878_v51 = vadd.f32 %v3641_v29, %v6263_v42  ;;  %v3642_v30 = vpop.f32.mrb[92].mxu1  ;;  %v3719_v41 = vpop.f32.mrb[94].mxu0 }
 0x1c0   : > { %v3643_v18 = vpop.f32.mrb[93].mxu1  ;;  %v3720_v32 = vpop.f32.mrb[95].mxu0 }
 0x1c1   : > { %v6308_v47 = vadd.f32 %v3718_v55, %v1878_v51  ;;  %v3644_v17 = vadd.f32 %v3643_v18, %v3642_v30  ;;  %v3721_v28 = vadd.f32 %v3720_v32, %v3719_v41  ;;  %v6332_v32 = vld [vmem:[%s6446_s2] ss:$0 sm:$0xff] }
 0x1c3   : > { %v1879_v45 = vadd.f32 %v3644_v17, %v6266_v53  ;;  %v3645_v14 = vpop.f32.mrb[94].mxu1  ;;  %v3722_v52 = vpop.f32.mrb[96].mxu0 }
 0x1c4   : > { %v3646_v7 = vpop.f32.mrb[95].mxu1  ;;  %v3723_v61 = vpop.f32.mrb[97].mxu0 }
 0x1c5   : > { %v6311_v10 = vadd.f32 %v3721_v28, %v1879_v45  ;;  %v3647_v54 = vadd.f32 %v3646_v7, %v3645_v14  ;;  %v3724_v37 = vadd.f32 %v3723_v61, %v3722_v52 }
 0x1c7   : > { %v1880_v42 = vadd.f32 %v3647_v54, %v6269_v21  ;;  %v3648_v59 = vpop.f32.mrb[96].mxu1  ;;  %v3725_v46 = vpop.f32.mrb[98].mxu0 }
 0x1c8   : > { %v3649_v15 = vpop.f32.mrb[97].mxu1  ;;  %v3726_v25 = vpop.f32.mrb[99].mxu0 }
 0x1c9   : > { %v6314_v34 = vadd.f32 %v3724_v37, %v1880_v42  ;;  %v3650_v4 = vadd.f32 %v3649_v15, %v3648_v59  ;;  %v3727_v35 = vadd.f32 %v3726_v25, %v3725_v46 }
 0x1cb   : > { %v1881_v53 = vadd.f32 %v3650_v4, %v6272_v57  ;;  %v3651_v8 = vpop.f32.mrb[98].mxu1  ;;  %v3728_v50 = vpop.f32.mrb[100].mxu0 }
 0x1cc   : > { %v3652_v43 = vpop.f32.mrb[99].mxu1  ;;  %v3729_v49 = vpop.f32.mrb[101].mxu0 }
 0x1cd   : > { %v6317_v13 = vadd.f32 %v3727_v35, %v1881_v53  ;;  %v3653_v19 = vadd.f32 %v3652_v43, %v3651_v8  ;;  %v3730_v36 = vadd.f32 %v3729_v49, %v3728_v50 }
 0x1cf   : > { %v1882_v21 = vadd.f32 %v3653_v19, %v6275_v60  ;;  %v3654_v23 = vpop.f32.mrb[100].mxu1  ;;  %v3731_v0 = vpop.f32.mrb[102].mxu0 }
 0x1d0   : > { %v3655_v22 = vpop.f32.mrb[101].mxu1  ;;  %v3732_v6 = vpop.f32.mrb[103].mxu0 }
 0x1d1   : > { %v6320_v20 = vadd.f32 %v3730_v36, %v1882_v21  ;;  %v3656_v62 = vadd.f32 %v3655_v22, %v3654_v23  ;;  %v3733_v31 = vadd.f32 %v3732_v6, %v3731_v0 }
 0x1d3   : > { %v1883_v57 = vadd.f32 %v3656_v62, %v6278_v33  ;;  %v3657_v26 = vpop.f32.mrb[102].mxu1  ;;  %v3734_v1 = vpop.f32.mrb[104].mxu0 }
 0x1d4   : > { %v3658_v58 = vpop.f32.mrb[103].mxu1  ;;  %v3735_v12 = vpop.f32.mrb[105].mxu0 }
 0x1d5   : > { %v6323_v5 = vadd.f32 %v3733_v31, %v1883_v57  ;;  %v3659_v27 = vadd.f32 %v3658_v58, %v3657_v26  ;;  %v3736_v44 = vadd.f32 %v3735_v12, %v3734_v1 }
 0x1d7   : > { %v1884_v60 = vadd.f32 %v3659_v27, %v6281_v2  ;;  %v3769_v11 = vpop.f32.mrb[104].mxu1  ;;  %v3846_v9 = vpop.f32.mrb[106].mxu0 }
 0x1d8   : > { %v3770_v38 = vpop.f32.mrb[105].mxu1  ;;  %v3847_v29 = vpop.f32.mrb[107].mxu0 }
 0x1d9   : > { %v6326_v55 = vadd.f32 %v3736_v44, %v1884_v60  ;;  %v3771_v51 = vadd.f32 %v3770_v38, %v3769_v11  ;;  %v3848_v30 = vadd.f32 %v3847_v29, %v3846_v9 }
 0x1db   : > { %v2432_v33 = vadd.f32 %v3771_v51, %v6284_v39  ;;  %v3772_v41 = vpop.f32.mrb[106].mxu1  ;;  %v3849_v18 = vpop.f32.mrb[108].mxu0 }
 0x1dc   : > { %v3773_v17 = vpop.f32.mrb[107].mxu1  ;;  %v3850_v28 = vpop.f32.mrb[109].mxu0 }
 0x1dd   : > { %v2720_v2 = vadd.f32 %v3848_v30, %v2432_v33  ;;  %v3774_v45 = vadd.f32 %v3773_v17, %v3772_v41  ;;  %v3851_v14 = vadd.f32 %v3850_v28, %v3849_v18 }
 0x1df   : > { %v2742_v52 = vadd.f32 %v6332_v32, %v2720_v2  ;;  %v2433_v7 = vadd.f32 %v3774_v45, %v6287_v24  ;;  %v3775_v61 = vpop.f32.mrb[108].mxu1  ;;  %v3852_v54 = vpop.f32.mrb[110].mxu0 }
 0x1e0   : > { %v3776_v39 = vpop.f32.mrb[109].mxu1  ;;  %v3853_v37 = vpop.f32.mrb[111].mxu0 }
 0x1e1   : > { %v2757_v42 = vmax.f32 %v2742_v52, 0.0  ;;  %v2721_v59 = vadd.f32 %v3851_v14, %v2433_v7  ;;  %v3777_v46 = vadd.f32 %v3776_v39, %v3775_v61  ;;  %v3854_v15 = vadd.f32 %v3853_v37, %v3852_v54 }
 0x1e3   : > { %2773 = vst.msk [vmem:[#allocation2] sm:$0xff] %vm2772_vm5, %v2757_v42  ;;  %v2743_v25 = vadd.f32 %v6332_v32, %v2721_v59  ;;  %v2434_v4 = vadd.f32 %v3777_v46, %v6290_v48  ;;  %v3778_v35 = vpop.f32.mrb[110].mxu1  ;;  %v3855_v53 = vpop.f32.mrb[112].mxu0 }
 0x1e4   : > { %v3779_v8 = vpop.f32.mrb[111].mxu1  ;;  %v3856_v50 = vpop.f32.mrb[113].mxu0 }
 0x1e5   : > { %v2758_v24 = vmax.f32 %v2743_v25, 0.0  ;;  %v2722_v43 = vadd.f32 %v3854_v15, %v2434_v4  ;;  %v3780_v49 = vadd.f32 %v3779_v8, %v3778_v35  ;;  %v3857_v19 = vadd.f32 %v3856_v50, %v3855_v53 }
 0x1e7   : > { %2774 = vst.msk [vmem:[#allocation2 + $0x8] sm:$0xff] %vm2772_vm5, %v2758_v24  ;;  %v2744_v36 = vadd.f32 %v6332_v32, %v2722_v43  ;;  %v2435_v21 = vadd.f32 %v3780_v49, %v6293_v56  ;;  %v3781_v23 = vpop.f32.mrb[112].mxu1  ;;  %v3858_v0 = vpop.f32.mrb[114].mxu0 }
 0x1e8   : > { %v3782_v22 = vpop.f32.mrb[113].mxu1  ;;  %v3859_v6 = vpop.f32.mrb[115].mxu0 }
 0x1e9   : > { %v2759_v62 = vmax.f32 %v2744_v36, 0.0  ;;  %v2723_v48 = vadd.f32 %v3857_v19, %v2435_v21  ;;  %v3783_v31 = vadd.f32 %v3782_v22, %v3781_v23  ;;  %v3860_v57 = vadd.f32 %v3859_v6, %v3858_v0 }
 0x1ea   : > { %v2788_v36 = vld [vmem:[#allocation2] sm:$0x1f] }
 0x1eb   : > { %2775 = vst.msk [vmem:[#allocation2 + $0x10] sm:$0xff] %vm2772_vm5, %v2759_v62  ;;  %v2745_v26 = vadd.f32 %v6332_v32, %v2723_v48  ;;  %v2436_v1 = vadd.f32 %v3783_v31, %v6296_v16  ;;  %v3784_v58 = vpop.f32.mrb[114].mxu1  ;;  %v3861_v12 = vpop.f32.mrb[116].mxu0 }
 0x1ec   : > { %v3785_v27 = vpop.f32.mrb[115].mxu1  ;;  %v3862_v44 = vpop.f32.mrb[117].mxu0 }
 0x1ed   : > { %v2760_v60 = vmax.f32 %v2745_v26, 0.0  ;;  %v2724_v56 = vadd.f32 %v3860_v57, %v2436_v1  ;;  %v3786_v11 = vadd.f32 %v3785_v27, %v3784_v58  ;;  %v3863_v9 = vadd.f32 %v3862_v44, %v3861_v12 }
 0x1ee   : > { %v2807_v27 = vld [vmem:[#allocation2 + $0x5] sm:$0x1f] }
 0x1ef   : > { %2776 = vst.msk [vmem:[#allocation2 + $0x18] sm:$0xff] %vm2772_vm5, %v2760_v60  ;;  %v2746_v38 = vadd.f32 %v6332_v32, %v2724_v56  ;;  %v2437_v29 = vadd.f32 %v3786_v11, %v6299_v3  ;;  %v3787_v51 = vpop.f32.mrb[116].mxu1  ;;  %v3864_v30 = vpop.f32.mrb[118].mxu0 }
 0x1f0   : > { %v3788_v33 = vpop.f32.mrb[117].mxu1  ;;  %v3865_v41 = vpop.f32.mrb[119].mxu0 }
 0x1f1   : > { %v2761_v18 = vmax.f32 %v2746_v38, 0.0  ;;  %v2725_v16 = vadd.f32 %v3863_v9, %v2437_v29  ;;  %v3789_v17 = vadd.f32 %v3788_v33, %v3787_v51  ;;  %v3866_v28 = vadd.f32 %v3865_v41, %v3864_v30 }
 0x1f2   : > { %v2789_v50 = vld [vmem:[#allocation2 + $0xc] sm:$0x1f]  ;;  %v2808_v31 = vld [vmem:[#allocation2 + $0x11] sm:$0x1f] }
 0x1f3   : > { %2777 = vst.msk [vmem:[#allocation2 + $0x20] sm:$0xff] %vm2772_vm5, %v2761_v18  ;;  %v2747_v2 = vadd.f32 %v6332_v32, %v2725_v16  ;;  %v2438_v45 = vadd.f32 %v3789_v17, %v6302_v40  ;;  %v3790_v14 = vpop.f32.mrb[118].mxu1  ;;  %v3867_v52 = vpop.f32.mrb[120].mxu0  ;;  %v2790_v0 = vmax.f32 %v2788_v36, %v2789_v50  ;;  %v2809_v9 = vmax.f32 %v2807_v27, %v2808_v31 }
 0x1f4   : > { %v3791_v7 = vpop.f32.mrb[119].mxu1  ;;  %v3868_v61 = vpop.f32.mrb[121].mxu0 }
 0x1f5   : > { %v2762_v54 = vmax.f32 %v2747_v2, 0.0  ;;  %v2726_v3 = vadd.f32 %v3866_v28, %v2438_v45  ;;  %v3792_v39 = vadd.f32 %v3791_v7, %v3790_v14  ;;  %v3869_v37 = vadd.f32 %v3868_v61, %v3867_v52 }
 0x1f6   : > { %v2791_v21 = vld [vmem:[#allocation2 + $0x18] sm:$0x1f] }
 0x1f7   : > { %2778 = vst.msk [vmem:[#allocation2 + $0x28] sm:$0xff] %vm2772_vm5, %v2762_v54  ;;  %v2748_v42 = vadd.f32 %v6332_v32, %v2726_v3  ;;  %v2439_v59 = vadd.f32 %v3792_v39, %v6305_v63  ;;  %v3793_v46 = vpop.f32.mrb[120].mxu1  ;;  %v3870_v15 = vpop.f32.mrb[122].mxu0  ;;  %v2792_v57 = vmax.f32 %v2790_v0, %v2791_v21 }
 0x1f8   : > { %v3794_v25 = vpop.f32.mrb[121].mxu1  ;;  %v3871_v4 = vpop.f32.mrb[123].mxu0 }
 0x1f9   : > { %v2763_v35 = vmax.f32 %v2748_v42, 0.0  ;;  %v2727_v40 = vadd.f32 %v3869_v37, %v2439_v59  ;;  %v3795_v53 = vadd.f32 %v3794_v25, %v3793_v46  ;;  %v3872_v8 = vadd.f32 %v3871_v4, %v3870_v15 }
 0x1fa   : > { %v2810_v44 = vld [vmem:[#allocation2 + $0x1d] sm:$0x1f] }
 0x1fb   : > { %2779 = vst.msk [vmem:[#allocation2 + $0x30] sm:$0xff] %vm2772_vm5, %v2763_v35  ;;  %v2749_v24 = vadd.f32 %v6332_v32, %v2727_v40  ;;  %v2440_v43 = vadd.f32 %v3795_v53, %v6308_v47  ;;  %v3796_v49 = vpop.f32.mrb[122].mxu1  ;;  %v3873_v19 = vpop.f32.mrb[124].mxu0  ;;  %v2811_v18 = vmax.f32 %v2809_v9, %v2810_v44 }
 0x1fc   : > { %v3797_v63 = vpop.f32.mrb[123].mxu1  ;;  %v3874_v23 = vpop.f32.mrb[125].mxu0 }
 0x1fd   : > { %v2764_v22 = vmax.f32 %v2749_v24, 0.0  ;;  %v2728_v6 = vadd.f32 %v3872_v8, %v2440_v43  ;;  %v3798_v62 = vadd.f32 %v3797_v63, %v3796_v49  ;;  %v3875_v48 = vadd.f32 %v3874_v23, %v3873_v19 }
 0x1fe   : > { %v2793_v26 = vld [vmem:[#allocation2 + $0x24] sm:$0x1f]  ;;  %v2812_v33 = vld [vmem:[#allocation2 + $0x29] sm:$0x1f] }
 0x1ff   : > { %2780 = vst.msk [vmem:[#allocation2 + $0x38] sm:$0xff] %vm2772_vm5, %v2764_v22  ;;  %v2750_v1 = vadd.f32 %v6332_v32, %v2728_v6  ;;  %v2441_v47 = vadd.f32 %v3798_v62, %v6311_v10  ;;  %v3799_v58 = vpop.f32.mrb[124].mxu1  ;;  %v3876_v12 = vpop.f32.mrb[126].mxu0  ;;  %v2794_v11 = vmax.f32 %v2792_v57, %v2793_v26  ;;  %v2813_v52 = vmax.f32 %v2811_v18, %v2812_v33 }
 0x200   : > { %v3800_v60 = vpop.f32.mrb[125].mxu1  ;;  %v3877_v56 = vpop.f32.mrb[127].mxu0 }
 0x201   : > { %v2765_v38 = vmax.f32 %v2750_v1, 0.0  ;;  %v2729_v29 = vadd.f32 %v3875_v48, %v2441_v47  ;;  %v3801_v51 = vadd.f32 %v3800_v60, %v3799_v58  ;;  %v3878_v30 = vadd.f32 %v3877_v56, %v3876_v12 }
 0x202   : > { %v2795_v41 = vld [vmem:[#allocation2 + $0x30] sm:$0x1f] }
 0x203   : > { %2781 = vst.msk [vmem:[#allocation2 + $0x40] sm:$0xff] %vm2772_vm5, %v2765_v38  ;;  %v2751_v16 = vadd.f32 %v6332_v32, %v2729_v29  ;;  %v2442_v10 = vadd.f32 %v3801_v51, %v6314_v34  ;;  %v3802_v17 = vpop.f32.mrb[126].mxu1  ;;  %v3879_v28 = vpop.f32.mrb[128].mxu0  ;;  %v2796_v2 = vmax.f32 %v2794_v11, %v2795_v41 }
 0x204   : > { %v3803_v45 = vpop.f32.mrb[127].mxu1  ;;  %v3880_v14 = vpop.f32.mrb[129].mxu0 }
 0x205   : > { %v2766_v7 = vmax.f32 %v2751_v16, 0.0  ;;  %v2730_v61 = vadd.f32 %v3878_v30, %v2442_v10  ;;  %v3804_v54 = vadd.f32 %v3803_v45, %v3802_v17  ;;  %v3881_v3 = vadd.f32 %v3880_v14, %v3879_v28 }
 0x206   : > { %v2798_v39 = vsel %vm2797_vm6, %v2796_v2, -inf  ;;  %v2814_v37 = vld [vmem:[#allocation2 + $0x35] sm:$0x1f] }
 0x207   : > { %2782 = vst.msk [vmem:[#allocation2 + $0x48] sm:$0xff] %vm2772_vm5, %v2766_v7  ;;  %v2752_v42 = vadd.f32 %v6332_v32, %v2730_v61  ;;  %v2443_v34 = vadd.f32 %v3804_v54, %v6317_v13  ;;  %v3805_v59 = vpop.f32.mrb[128].mxu1  ;;  %v3882_v46 = vpop.f32.mrb[130].mxu0  ;;  %v2799_v15 = vrot.slane %v2798_v39, 4  ;;  %v2815_v25 = vmax.f32 %v2813_v52, %v2814_v37 }
 0x208   : > { %v3806_v4 = vpop.f32.mrb[129].mxu1  ;;  %v3883_v35 = vpop.f32.mrb[131].mxu0 }
 0x209   : > { %v2767_v40 = vmax.f32 %v2752_v42, 0.0  ;;  %v2731_v53 = vadd.f32 %v3881_v3, %v2443_v34  ;;  %v3807_v8 = vadd.f32 %v3806_v4, %v3805_v59  ;;  %v3884_v50 = vadd.f32 %v3883_v35, %v3882_v46 }
 0x20a   : > { %v2800_v24 = vmax.f32 %v2798_v39, %v2799_v15  ;;  %v2816_v43 = vsel %vm2797_vm6, %v2815_v25, -inf  ;;  %v2841_v45 = vld [vmem:[#allocation2 + $0x41] sm:$0x1f] }
 0x20b   : > { %2783 = vst.msk [vmem:[#allocation2 + $0x50] sm:$0xff] %vm2772_vm5, %v2767_v40  ;;  %v2753_v49 = vadd.f32 %v6332_v32, %v2731_v53  ;;  %v2444_v13 = vadd.f32 %v3807_v8, %v6320_v20  ;;  %v3808_v19 = vpop.f32.mrb[130].mxu1  ;;  %v3885_v36 = vpop.f32.mrb[132].mxu0  ;;  %v2817_v21 = vrot.slane %v2816_v43, 4 }
 0x20c   : > { %v3809_v63 = vpop.f32.mrb[131].mxu1  ;;  %v3886_v23 = vpop.f32.mrb[133].mxu0  ;;  %v2801_v0 = vrot.slane %v2800_v24, 2 }
 0x20d   : > { %v2768_v22 = vmax.f32 %v2753_v49, 0.0  ;;  %v2732_v6 = vadd.f32 %v3884_v50, %v2444_v13  ;;  %v3810_v62 = vadd.f32 %v3809_v63, %v3808_v19  ;;  %v3887_v48 = vadd.f32 %v3886_v23, %v3885_v36 }
 0x20e   : > { %v2802_v31 = vmax.f32 %v2800_v24, %v2801_v0  ;;  %v2818_v57 = vmax.f32 %v2816_v43, %v2817_v21  ;;  %v2825_v17 = vld [vmem:[#allocation2 + $0x48] sm:$0x1f] }
 0x20f   : > { %2784 = vst.msk [vmem:[#allocation2 + $0x58] sm:$0xff] %vm2772_vm5, %v2768_v22  ;;  %v2754_v26 = vadd.f32 %v6332_v32, %v2732_v6  ;;  %v2445_v20 = vadd.f32 %v3810_v62, %v6323_v5  ;;  %v3811_v1 = vpop.f32.mrb[132].mxu1  ;;  %v3888_v47 = vpop.f32.mrb[134].mxu0 }
 0x210   : > { %v3812_v58 = vpop.f32.mrb[133].mxu1  ;;  %v3889_v12 = vpop.f32.mrb[135].mxu0  ;;  %v2803_v27 = vrot.slane %v2802_v31, 1  ;;  %v2819_v44 = vrot.slane %v2818_v57, 2 }
 0x211   : > { %v2769_v60 = vmax.f32 %v2754_v26, 0.0  ;;  %v2733_v56 = vadd.f32 %v3887_v48, %v2445_v20  ;;  %v3813_v11 = vadd.f32 %v3812_v58, %v3811_v1  ;;  %v3890_v9 = vadd.f32 %v3889_v12, %v3888_v47 }
 0x212   : > { %v2804_v38 = vmax.f32 %v2802_v31, %v2803_v27  ;;  %v2820_v29 = vmax.f32 %v2818_v57, %v2819_v44  ;;  %v2842_v28 = vld [vmem:[#allocation2 + $0x4d] sm:$0x1f] }
 0x213   : > { %2785 = vst.msk [vmem:[#allocation2 + $0x60] sm:$0xff] %vm2772_vm5, %v2769_v60  ;;  %v2755_v51 = vadd.f32 %v6332_v32, %v2733_v56  ;;  %v2446_v30 = vadd.f32 %v3813_v11, %v6326_v55  ;;  %v2824_v55 = vld [vmem:[#allocation2 + $0x3c] sm:$0x1f]  ;;  %v2843_v7 = vmax.f32 %v2841_v45, %v2842_v28 }
 0x214   : > { %2806 = vst.msk [vmem:[%s6380_s28] sm:$0x1] %vm2805_vm7, %v2804_v38  ;;  %v2821_v5 = vrot.slane %v2820_v29, 1  ;;  %v2826_v52 = vmax.f32 %v2824_v55, %v2825_v17 }
 0x215   : > { %v2770_v33 = vmax.f32 %v2755_v51, 0.0  ;;  %v2734_v41 = vadd.f32 %v3890_v9, %v2446_v30 }
 0x216   : > { %v2822_v18 = vmax.f32 %v2820_v29, %v2821_v5  ;;  %v2827_v2 = vld [vmem:[#allocation2 + $0x54] sm:$0x1f]  ;;  %v2844_v14 = vld [vmem:[#allocation2 + $0x59] sm:$0x1f] }
 0x217   : > { %2786 = vst.msk [vmem:[#allocation2 + $0x68] sm:$0xff] %vm2772_vm5, %v2770_v33  ;;  %v2756_v16 = vadd.f32 %v6332_v32, %v2734_v41  ;;  %v2828_v3 = vmax.f32 %v2826_v52, %v2827_v2  ;;  %v2845_v39 = vmax.f32 %v2843_v7, %v2844_v14 }
 0x218   : > { %2823 = vst.msk [vmem:[%s6380_s28 + $0x1] sm:$0x1] %vm2805_vm7, %v2822_v18 }
 0x219   : > { %v2771_v10 = vmax.f32 %v2756_v16, 0.0 }
 0x21a   : > { %v2829_v61 = vld [vmem:[#allocation2 + $0x60] sm:$0x1f] }
 0x21b   : > { %2787 = vst.msk [vmem:[#allocation2 + $0x70] sm:$0xff] %vm2772_vm5, %v2771_v10  ;;  %v2830_v37 = vmax.f32 %v2828_v3, %v2829_v61 }
 0x21e   : > { %v2846_v54 = vld [vmem:[#allocation2 + $0x65] sm:$0x1f] }
 0x21f   : > { %v2847_v32 = vmax.f32 %v2845_v39, %v2846_v54 }
 0x222   : > { %v2831_v42 = vld [vmem:[#allocation2 + $0x6c] sm:$0x1f]  ;;  %v2848_v34 = vld [vmem:[#allocation2 + $0x71] sm:$0x1f] }
 0x223   : > { %v2832_v59 = vmax.f32 %v2830_v37, %v2831_v42  ;;  %v2849_v46 = vmax.f32 %v2847_v32, %v2848_v34 }
 0x225   : > { %v2833_v15 = vsel %vm2797_vm6, %v2832_v59, -inf  ;;  %v2850_v25 = vsel %vm2797_vm6, %v2849_v46, -inf }
 0x226   : > { %v2834_v4 = vrot.slane %v2833_v15, 4  ;;  %v2851_v35 = vrot.slane %v2850_v25, 4 }
 0x228   : > { %v2835_v40 = vmax.f32 %v2833_v15, %v2834_v4  ;;  %v2852_v53 = vmax.f32 %v2850_v25, %v2851_v35 }
 0x22a   : > { %v2836_v8 = vrot.slane %v2835_v40, 2  ;;  %v2853_v50 = vrot.slane %v2852_v53, 2 }
 0x22c   : > { %v2837_v24 = vmax.f32 %v2835_v40, %v2836_v8  ;;  %v2854_v43 = vmax.f32 %v2852_v53, %v2853_v50 }
 0x22e   : > { %v2838_v49 = vrot.slane %v2837_v24, 1  ;;  %v2855_v13 = vrot.slane %v2854_v43, 1 }
 0x230   : > { %v2839_v19 = vmax.f32 %v2837_v24, %v2838_v49  ;;  %v2856_v36 = vmax.f32 %v2854_v43, %v2855_v13 }
 0x232   : > { %2840 = vst.msk [vmem:[%s6380_s28 + $0x2] sm:$0x1] %vm2805_vm7, %v2839_v19  ;;  %2857 = vst.msk [vmem:[%s6380_s28 + $0x3] sm:$0x1] %vm2805_vm7, %v2856_v36 }
 0x233   : > { %4256 = shalt.err (!%p4253_p3)
}
 0x234   : > { %s4257_s17 = scalar_lea.hbm %s6396_s6, 64  ;;  %s4261_s24 = scalar_lea.hbm %s6447_s3, 128 }
 0x235   : > { %p4258_p4 = scmp.ne.s32.totalorder %s6396_s6, %s4257_s17  ;;  %p4262_p9 = scmp.lt.u32.totalorder %s6396_s6, %s6447_s3 }
 0x236   : > { %p4263_p10 = scmp.lt.u32.totalorder %s4261_s24, %s4257_s17  ;;  %p4265_p12 = scmp.lt.u32.totalorder %s4257_s17, %s6396_s6 }
 0x237   : > { %p4259_p7 = pnand %p4258_p4, %p4366_p5 }
 0x238   : > { %p4264_p11 = por %p4263_p10, %p4262_p9 }
 0x239   : > { %p4260_p8 = pneg %p4259_p7 }
 0x23a   : > { %p4266_p13 = por %p4265_p12, %p4264_p11 }
 0x23c   : > { %p4267_p0 = pnand %p4266_p13, %p4260_p8 }
 0x23e   : > { %4270 = shalt.err (!%p4267_p0)
}
 0x23f   : > { %4196 = dma.vmem_to_hbm [thread:$0]  (%p4366_p5), %s6398_s30, 64, %s6396_s6, %s2859_s16  }
 0x240 PF: > { %p4202_p1 = scmp.ge.s32.totalorder %s4305_s15, 2  ;;  %s2884_s26 = sand.u32 1, %s4293_s12  }
 0x241   : > { %s2885_s27 = scalar_lea.sflag [#allocation4], %s2884_s26 }
 0x242   : > { %p4199_p2 = pnand %p4202_p1, %p4370_p6 }
 0x244   : > { %4288 = dma.done.wait (!%p4199_p2), %s2885_s27, 64  }
 0x245   : > { %4290 = vsyncadd (!%p4199_p2), %s2885_s27, 4294967232  ;;  %p13_p3 = scmp.ge.s32.totalorder %s4353_s18, 4   ;;  %s6460_s12 = smov %s4297_s13 }
 0x246   : > { %s6461_s13 = smov %s4301_s14  ;;  %s6462_s14 = smov %s4364_s21 }
 0x247   : > { %s6463_s15 = smov %s4353_s18  ;;  %15 = sbr.rel (!%p13_p3) target bundleno = 3 (0x3), region = 75 }
 0x24e   :  { %2890 = vsyncpa [#allocation4], 1 }
 0x24f   :  { %2892 = vsyncpa [#allocation4 + $0x1], 1 }

</bundles_post_ra>
